<compile_context>
chip_gen: v6e
topology: v6e:2x2x1
jax: 0.10.0
libtpu: 0.0.40
codegen_flags: <defaults>
</compile_context>

<pallas_src>
import math
from functools import partial

import jax
import jax.numpy as jnp
from jax.experimental import pallas as pl
from jax.experimental.pallas import tpu as pltpu


# ----------------------------- Pallas kernel -------------------------------

def _layer_norm(x, g, b, eps=1e-5):
    # PyTorch LayerNorm: biased variance over the last dim, f32 math.
    mu = jnp.mean(x, axis=-1, keepdims=True)
    var = jnp.mean((x - mu) ** 2, axis=-1, keepdims=True)
    return (x - mu) * jax.lax.rsqrt(var + eps) * g + b


def fused_forward_kernel(idx_ref, emb_ref, pe_ref,
                         wqkv_ref, bqkv_ref, wo_ref, bo_ref,
                         w1_ref, b1_ref, w2_ref, b2_ref,
                         g1_ref, be1_ref, g2_ref, be2_ref,
                         wout_ref, bout_ref, o_ref,
                         *, B, T, E, H, L, V):
    """Embedding gather + PE add + L encoder layers + classifier, fused."""
    D = E // H
    BT = B * T
    bf16 = jnp.bfloat16

    # ---- Embedding lookup as a one-hot matmul (exact for {0,1} weights). ----
    ids = idx_ref[...]                                            # (BT, 1) i32
    iota = jax.lax.broadcasted_iota(jnp.int32, (BT, V), 1)        # (BT, V)
    onehot = jnp.where(iota == ids, 1.0, 0.0)                     # (BT, V) f32
    x = jnp.dot(onehot, emb_ref[...],
                preferred_element_type=jnp.float32)               # (BT, E)
    # Positional encoding add (module's seq-first quirk pre-baked by wrapper).
    # TODO(synk): nn.Dropout is identity here (inference semantics).
    x = x + pe_ref[...]                                           # (BT, E) f32

    # ------------------------- encoder layers ------------------------------
    for l in range(L):
        # Fused QKV projection (bf16 MXU, f32 accumulate). 1/sqrt(D) is
        # already folded into the Q columns of wqkv/bqkv at init time.
        qkv = jnp.dot(x.astype(bf16), wqkv_ref[l],
                      preferred_element_type=jnp.float32) + bqkv_ref[l]  # (BT,3E)

        # Slice / reshape / cast the Q, K, V chunks once per layer.
        q = qkv[:, 0 * E:1 * E].reshape(B, T, E).astype(bf16)
        k = qkv[:, 1 * E:2 * E].reshape(B, T, E).astype(bf16)
        v = qkv[:, 2 * E:3 * E].reshape(B, T, E).astype(bf16)

        ctx_heads = []
        for h in range(H):
            sl = slice(h * D, (h + 1) * D)
            qh, kh, vh = q[:, :, sl], k[:, :, sl], v[:, :, sl]     # (B, T, D)

            s = jnp.einsum('bqd,bkd->bqk', qh, kh,
                           preferred_element_type=jnp.float32)     # (B, T, T)
            s = s - jnp.max(s, axis=-1, keepdims=True)
            p = jnp.exp(s)
            p = p * pl.reciprocal(jnp.sum(p, axis=-1, keepdims=True),
                                  approx=True)                     # softmax
            ctx_heads.append(
                jnp.einsum('bqk,bkd->bqd', p.astype(bf16), vh,
                           preferred_element_type=jnp.float32))    # (B, T, D)

        # Concatenate heads along lanes -> ONE out-projection + ONE bias add.
        ctx = jnp.concatenate(ctx_heads, axis=-1).reshape(BT, E)   # (BT, E)
        attn = jnp.dot(ctx.astype(bf16), wo_ref[l],
                       preferred_element_type=jnp.float32) + bo_ref[l]

        # Residual + LayerNorm1 (post-norm, PyTorch default norm_first=False).
        y = _layer_norm(x + attn, g1_ref[l], be1_ref[l])

        # Feed-forward (ReLU), residual + LayerNorm2.
        h1 = jnp.dot(y.astype(bf16), w1_ref[l],
                     preferred_element_type=jnp.float32) + b1_ref[l]
        h1 = jnp.maximum(h1, 0.0)
        h2 = jnp.dot(h1.astype(bf16), w2_ref[l],
                     preferred_element_type=jnp.float32) + b2_ref[l]
        x = _layer_norm(y + h2, g2_ref[l], be2_ref[l])             # (BT, E)

    # ---- Flatten (B*T, E) -> (B, T*E) with layout-safe slice + concat, ----
    # ---- then one lane-dense (padded-to-128) classifier matmul.        ----
    flat = jnp.concatenate(
        [jnp.concatenate([x[b * T + t: b * T + t + 1, :] for t in range(T)],
                         axis=1)
         for b in range(B)], axis=0)                               # (B, T*E)
    o_ref[...] = jnp.dot(flat.astype(bf16), wout_ref[...],
                         preferred_element_type=jnp.float32) + bout_ref[...]


# --------------------------- parameters & wrapper ---------------------------

def positional_encoding_table(emb_size, maxlen=5000):
    den = jnp.exp(-jnp.arange(0, emb_size, 2, dtype=jnp.float32)
                  * math.log(10000.0) / emb_size)
    pos = jnp.arange(0, maxlen, dtype=jnp.float32).reshape(maxlen, 1)
    pe = jnp.zeros((maxlen, emb_size), jnp.float32)
    pe = pe.at[:, 0::2].set(jnp.sin(pos * den))
    pe = pe.at[:, 1::2].set(jnp.cos(pos * den))
    return pe                                   # (maxlen, E)


def init_params(key, vocab_size, emb_dim, nhead, num_layers, num_classes,
                num_tokens, dim_ff=2048, maxlen=5000):
    D = emb_dim // nhead
    scale = 1.0 / math.sqrt(D)
    keys = jax.random.split(key, 2 + num_layers)
    emb = jax.random.normal(keys[0], (vocab_size, emb_dim), jnp.float32)

    s = 0.05
    stacks = {n: [] for n in
              ('wqkv', 'bqkv', 'wo', 'bo', 'w1', 'b1', 'w2', 'b2',
               'g1', 'be1', 'g2', 'be2')}
    for l in range(num_layers):
        lk = jax.random.split(keys[1 + l], 4)
        wqkv = s * jax.random.normal(lk[0], (emb_dim, 3 * emb_dim), jnp.float32)
        bqkv = jnp.zeros((1, 3 * emb_dim), jnp.float32)
        # Fold the 1/sqrt(D) attention scale into the Q projection (W and b).
        wqkv = wqkv.at[:, :emb_dim].multiply(scale)
        bqkv = bqkv.at[:, :emb_dim].multiply(scale)
        stacks['wqkv'].append(wqkv)
        stacks['bqkv'].append(bqkv)
        stacks['wo'].append(s * jax.random.normal(lk[1], (emb_dim, emb_dim), jnp.float32))
        stacks['bo'].append(jnp.zeros((1, emb_dim), jnp.float32))
        stacks['w1'].append(s * jax.random.normal(lk[2], (emb_dim, dim_ff), jnp.float32))
        stacks['b1'].append(jnp.zeros((1, dim_ff), jnp.float32))
        stacks['w2'].append(s * jax.random.normal(lk[3], (dim_ff, emb_dim), jnp.float32))
        stacks['b2'].append(jnp.zeros((1, emb_dim), jnp.float32))
        stacks['g1'].append(jnp.ones((1, emb_dim), jnp.float32))
        stacks['be1'].append(jnp.zeros((1, emb_dim), jnp.float32))
        stacks['g2'].append(jnp.ones((1, emb_dim), jnp.float32))
        stacks['be2'].append(jnp.zeros((1, emb_dim), jnp.float32))

    # Classifier, columns zero-padded to a lane-dense multiple of 128.
    cpad = max(128, ((num_classes + 127) // 128) * 128)
    wout = s * jax.random.normal(keys[1 + num_layers],
                                 (emb_dim * num_tokens, num_classes), jnp.float32)
    wout_pad = jnp.zeros((emb_dim * num_tokens, cpad), jnp.float32)
    wout_pad = wout_pad.at[:, :num_classes].set(wout)
    bout_pad = jnp.zeros((1, cpad), jnp.float32)

    bf16 = jnp.bfloat16
    return dict(
        emb=emb,                                            # f32 (exact gather)
        pe=positional_encoding_table(emb_dim, maxlen),      # (maxlen, E) f32
        wqkv=jnp.stack(stacks['wqkv']).astype(bf16),
        bqkv=jnp.stack(stacks['bqkv']),
        wo=jnp.stack(stacks['wo']).astype(bf16),
        bo=jnp.stack(stacks['bo']),
        w1=jnp.stack(stacks['w1']).astype(bf16),
        b1=jnp.stack(stacks['b1']),
        w2=jnp.stack(stacks['w2']).astype(bf16),
        b2=jnp.stack(stacks['b2']),
        g1=jnp.stack(stacks['g1']), be1=jnp.stack(stacks['be1']),
        g2=jnp.stack(stacks['g2']), be2=jnp.stack(stacks['be2']),
        wout=wout_pad.astype(bf16), bout=bout_pad,
        nhead=nhead, emb_dim=emb_dim, num_tokens=num_tokens,
        num_classes=num_classes, num_layers=num_layers,
        vocab=vocab_size, cpad=cpad,
    )


def modelo_forward(params, input_indices):
    B, T = input_indices.shape
    E, H = params['emb_dim'], params['nhead']
    L, V = params['num_layers'], params['vocab']
    C, CPAD = params['num_classes'], params['cpad']

    expected = E * params['num_tokens']
    if T * E != expected:
        raise ValueError(f'Expected size {expected}, but got {T * E}')

    idx = input_indices.reshape(B * T, 1).astype(jnp.int32)
    # PositionalEncoding quirk reproduced exactly: the module's buffer is
    # (maxlen,1,E) and it slices the *batch* dim (written for seq-first
    # input), so each batch row gets PE[batch_index] broadcast over tokens.
    pe_rows = jnp.repeat(params['pe'][:B], T, axis=0)        # (B*T, E)

    args = (idx, params['emb'], pe_rows,
            params['wqkv'], params['bqkv'], params['wo'], params['bo'],
            params['w1'], params['b1'], params['w2'], params['b2'],
            params['g1'], params['be1'], params['g2'], params['be2'],
            params['wout'], params['bout'])
    vmem = pl.BlockSpec(memory_space=pltpu.MemorySpace.VMEM)

    out = pl.pallas_call(
        partial(fused_forward_kernel, B=B, T=T, E=E, H=H, L=L, V=V),
        out_shape=jax.ShapeDtypeStruct((B, CPAD), jnp.float32),
        in_specs=[vmem] * len(args),
        out_specs=vmem,
    )(*args)
    return out[:, :C]


# ---------------------------------- main ------------------------------------

if __name__ == "__main__":
    VOCAB, EMB_DIM, NHEAD, NUM_LAYERS = 32, 32, 4, 2
    NUM_TOKENS, NUM_CLASSES, BATCH = 8, 8, 2

    key = jax.random.PRNGKey(0)
    pkey, dkey = jax.random.split(key)
    params = init_params(pkey, VOCAB, EMB_DIM, NHEAD, NUM_LAYERS,
                         NUM_CLASSES, NUM_TOKENS)
    input_indices = jax.random.randint(dkey, (BATCH, NUM_TOKENS), 0, VOCAB,
                                       dtype=jnp.int32)

    out = modelo_forward(params, input_indices)
    out = jax.block_until_ready(out)
    assert out.shape == (BATCH, NUM_CLASSES)
    assert bool(jnp.all(jnp.isfinite(out)))
    print("KERNEL_OK")
</pallas_src>

<mosaic_0001>
module attributes {stable_mosaic.version = 11 : i64} {
  func.func @fused_forward_kernel(%arg0: memref<16x1xi32, #tpu.memory_space<vmem>>, %arg1: memref<32x32xf32, #tpu.memory_space<vmem>>, %arg2: memref<16x32xf32, #tpu.memory_space<vmem>>, %arg3: memref<2x32x96xbf16, #tpu.memory_space<vmem>>, %arg4: memref<2x1x96xf32, #tpu.memory_space<vmem>>, %arg5: memref<2x32x32xbf16, #tpu.memory_space<vmem>>, %arg6: memref<2x1x32xf32, #tpu.memory_space<vmem>>, %arg7: memref<2x32x2048xbf16, #tpu.memory_space<vmem>>, %arg8: memref<2x1x2048xf32, #tpu.memory_space<vmem>>, %arg9: memref<2x2048x32xbf16, #tpu.memory_space<vmem>>, %arg10: memref<2x1x32xf32, #tpu.memory_space<vmem>>, %arg11: memref<2x1x32xf32, #tpu.memory_space<vmem>>, %arg12: memref<2x1x32xf32, #tpu.memory_space<vmem>>, %arg13: memref<2x1x32xf32, #tpu.memory_space<vmem>>, %arg14: memref<2x1x32xf32, #tpu.memory_space<vmem>>, %arg15: memref<256x128xbf16, #tpu.memory_space<vmem>>, %arg16: memref<1x128xf32, #tpu.memory_space<vmem>>, %arg17: memref<2x128xf32, #tpu.memory_space<vmem>>) attributes {dimension_semantics = [], scalar_prefetch = 0 : i64, scratch_operands = 0 : i64, tpu.core_type = #tpu.core_type<tc>} {
    %c0 = arith.constant 0 : index
    %c0_0 = arith.constant 0 : index
    %0 = vector.load %arg0[%c0, %c0_0] : memref<16x1xi32, #tpu.memory_space<vmem>>, vector<16x1xi32>
    %1 = tpu.iota {dimensions = array<i32: 1>} : vector<16x32xi32>
    %2 = vector.broadcast %0 : vector<16x1xi32> to vector<16x32xi32>
    %3 = arith.cmpi eq, %1, %2 : vector<16x32xi32>
    %cst = arith.constant 1.000000e+00 : f32
    %cst_1 = arith.constant 0.000000e+00 : f32
    %4 = vector.broadcast %cst : f32 to vector<16x32xf32>
    %5 = vector.broadcast %cst_1 : f32 to vector<16x32xf32>
    %6 = arith.select %3, %4, %5 : vector<16x32xi1>, vector<16x32xf32>
    %c0_2 = arith.constant 0 : index
    %c0_3 = arith.constant 0 : index
    %7 = vector.load %arg1[%c0_2, %c0_3] : memref<32x32xf32, #tpu.memory_space<vmem>>, vector<32x32xf32>
    %cst_4 = arith.constant dense<0.000000e+00> : vector<16x32xf32>
    %8 = tpu.matmul %6, %7, %cst_4 {dimension_numbers = #tpu.dot_dimension_numbers<[1], [0], [0], [1], [0, 0, 1, 1], [], []>} : vector<16x32xf32>, vector<32x32xf32>, vector<16x32xf32> -> vector<16x32xf32>
    %c0_5 = arith.constant 0 : index
    %c0_6 = arith.constant 0 : index
    %9 = vector.load %arg2[%c0_5, %c0_6] : memref<16x32xf32, #tpu.memory_space<vmem>>, vector<16x32xf32>
    %10 = arith.addf %8, %9 : vector<16x32xf32>
    %11 = arith.truncf %10 : vector<16x32xf32> to vector<16x32xbf16>
    %c0_7 = arith.constant 0 : index
    %c0_8 = arith.constant 0 : index
    %c0_9 = arith.constant 0 : index
    %12 = vector.load %arg3[%c0_7, %c0_8, %c0_9] : memref<2x32x96xbf16, #tpu.memory_space<vmem>>, vector<1x32x96xbf16>
    %13 = vector.shape_cast %12 : vector<1x32x96xbf16> to vector<32x96xbf16>
    %cst_10 = arith.constant dense<0.000000e+00> : vector<16x96xf32>
    %14 = tpu.matmul %11, %13, %cst_10 {dimension_numbers = #tpu.dot_dimension_numbers<[1], [0], [0], [1], [0, 0, 1, 1], [], []>} : vector<16x32xbf16>, vector<32x96xbf16>, vector<16x96xf32> -> vector<16x96xf32>
    %c0_11 = arith.constant 0 : index
    %c0_12 = arith.constant 0 : index
    %c0_13 = arith.constant 0 : index
    %15 = vector.load %arg4[%c0_11, %c0_12, %c0_13] : memref<2x1x96xf32, #tpu.memory_space<vmem>>, vector<1x1x96xf32>
    %16 = vector.shape_cast %15 : vector<1x1x96xf32> to vector<1x96xf32>
    %17 = vector.broadcast %16 : vector<1x96xf32> to vector<16x96xf32>
    %18 = arith.addf %14, %17 : vector<16x96xf32>
    %19 = vector.extract_strided_slice %18 {offsets = [0, 0], sizes = [16, 32], strides = [1, 1]} : vector<16x96xf32> to vector<16x32xf32>
    %20 = vector.shape_cast %19 : vector<16x32xf32> to vector<2x8x32xf32>
    %21 = arith.truncf %20 : vector<2x8x32xf32> to vector<2x8x32xbf16>
    %22 = vector.extract_strided_slice %18 {offsets = [0, 32], sizes = [16, 32], strides = [1, 1]} : vector<16x96xf32> to vector<16x32xf32>
    %23 = vector.shape_cast %22 : vector<16x32xf32> to vector<2x8x32xf32>
    %24 = arith.truncf %23 : vector<2x8x32xf32> to vector<2x8x32xbf16>
    %25 = vector.extract_strided_slice %18 {offsets = [0, 64], sizes = [16, 32], strides = [1, 1]} : vector<16x96xf32> to vector<16x32xf32>
    %26 = vector.shape_cast %25 : vector<16x32xf32> to vector<2x8x32xf32>
    %27 = arith.truncf %26 : vector<2x8x32xf32> to vector<2x8x32xbf16>
    %28 = vector.extract_strided_slice %21 {offsets = [0, 0, 0], sizes = [2, 8, 8], strides = [1, 1, 1]} : vector<2x8x32xbf16> to vector<2x8x8xbf16>
    %29 = vector.extract_strided_slice %24 {offsets = [0, 0, 0], sizes = [2, 8, 8], strides = [1, 1, 1]} : vector<2x8x32xbf16> to vector<2x8x8xbf16>
    %30 = vector.extract_strided_slice %27 {offsets = [0, 0, 0], sizes = [2, 8, 8], strides = [1, 1, 1]} : vector<2x8x32xbf16> to vector<2x8x8xbf16>
    "tpu.trace_start"() <{level = 10 : i32, message = "bqd,bkd->bqk"}> : () -> ()
    %cst_14 = arith.constant dense<0.000000e+00> : vector<2x8x8xf32>
    %31 = tpu.matmul %28, %29, %cst_14 {dimension_numbers = #tpu.dot_dimension_numbers<[2], [2], [1], [1], [0, 0, 0, 1, 1, 1], [0], [0]>} : vector<2x8x8xbf16>, vector<2x8x8xbf16>, vector<2x8x8xf32> -> vector<2x8x8xf32>
    "tpu.trace_stop"() : () -> ()
    %cst_15 = arith.constant dense<0xFF800000> : vector<2x8xf32>
    %32 = vector.multi_reduction <maximumf>, %31, %cst_15 [2] : vector<2x8x8xf32> to vector<2x8xf32>
    %33 = vector.shape_cast %32 : vector<2x8xf32> to vector<2x8x1xf32>
    %34 = vector.broadcast %33 : vector<2x8x1xf32> to vector<2x8x8xf32>
    %35 = arith.subf %31, %34 : vector<2x8x8xf32>
    %36 = math.exp %35 : vector<2x8x8xf32>
    %cst_16 = arith.constant dense<0.000000e+00> : vector<2x8xf32>
    %37 = vector.multi_reduction <add>, %36, %cst_16 [2] : vector<2x8x8xf32> to vector<2x8xf32>
    %38 = vector.shape_cast %37 : vector<2x8xf32> to vector<2x8x1xf32>
    %39 = tpu.reciprocal %38 {approx = true} : vector<2x8x1xf32> -> vector<2x8x1xf32>
    %40 = vector.broadcast %39 : vector<2x8x1xf32> to vector<2x8x8xf32>
    %41 = arith.mulf %36, %40 : vector<2x8x8xf32>
    %42 = arith.truncf %41 : vector<2x8x8xf32> to vector<2x8x8xbf16>
    "tpu.trace_start"() <{level = 10 : i32, message = "bqk,bkd->bqd"}> : () -> ()
    %cst_17 = arith.constant dense<0.000000e+00> : vector<2x8x8xf32>
    %43 = tpu.matmul %42, %30, %cst_17 {dimension_numbers = #tpu.dot_dimension_numbers<[2], [1], [1], [2], [0, 0, 0, 1, 1, 2], [0], [0]>} : vector<2x8x8xbf16>, vector<2x8x8xbf16>, vector<2x8x8xf32> -> vector<2x8x8xf32>
    "tpu.trace_stop"() : () -> ()
    %44 = vector.extract_strided_slice %21 {offsets = [0, 0, 8], sizes = [2, 8, 8], strides = [1, 1, 1]} : vector<2x8x32xbf16> to vector<2x8x8xbf16>
    %45 = vector.extract_strided_slice %24 {offsets = [0, 0, 8], sizes = [2, 8, 8], strides = [1, 1, 1]} : vector<2x8x32xbf16> to vector<2x8x8xbf16>
    %46 = vector.extract_strided_slice %27 {offsets = [0, 0, 8], sizes = [2, 8, 8], strides = [1, 1, 1]} : vector<2x8x32xbf16> to vector<2x8x8xbf16>
    "tpu.trace_start"() <{level = 10 : i32, message = "bqd,bkd->bqk"}> : () -> ()
    %cst_18 = arith.constant dense<0.000000e+00> : vector<2x8x8xf32>
    %47 = tpu.matmul %44, %45, %cst_18 {dimension_numbers = #tpu.dot_dimension_numbers<[2], [2], [1], [1], [0, 0, 0, 1, 1, 1], [0], [0]>} : vector<2x8x8xbf16>, vector<2x8x8xbf16>, vector<2x8x8xf32> -> vector<2x8x8xf32>
    "tpu.trace_stop"() : () -> ()
    %cst_19 = arith.constant dense<0xFF800000> : vector<2x8xf32>
    %48 = vector.multi_reduction <maximumf>, %47, %cst_19 [2] : vector<2x8x8xf32> to vector<2x8xf32>
    %49 = vector.shape_cast %48 : vector<2x8xf32> to vector<2x8x1xf32>
    %50 = vector.broadcast %49 : vector<2x8x1xf32> to vector<2x8x8xf32>
    %51 = arith.subf %47, %50 : vector<2x8x8xf32>
    %52 = math.exp %51 : vector<2x8x8xf32>
    %cst_20 = arith.constant dense<0.000000e+00> : vector<2x8xf32>
    %53 = vector.multi_reduction <add>, %52, %cst_20 [2] : vector<2x8x8xf32> to vector<2x8xf32>
    %54 = vector.shape_cast %53 : vector<2x8xf32> to vector<2x8x1xf32>
    %55 = tpu.reciprocal %54 {approx = true} : vector<2x8x1xf32> -> vector<2x8x1xf32>
    %56 = vector.broadcast %55 : vector<2x8x1xf32> to vector<2x8x8xf32>
    %57 = arith.mulf %52, %56 : vector<2x8x8xf32>
    %58 = arith.truncf %57 : vector<2x8x8xf32> to vector<2x8x8xbf16>
    "tpu.trace_start"() <{level = 10 : i32, message = "bqk,bkd->bqd"}> : () -> ()
    %cst_21 = arith.constant dense<0.000000e+00> : vector<2x8x8xf32>
    %59 = tpu.matmul %58, %46, %cst_21 {dimension_numbers = #tpu.dot_dimension_numbers<[2], [1], [1], [2], [0, 0, 0, 1, 1, 2], [0], [0]>} : vector<2x8x8xbf16>, vector<2x8x8xbf16>, vector<2x8x8xf32> -> vector<2x8x8xf32>
    "tpu.trace_stop"() : () -> ()
    %60 = vector.extract_strided_slice %21 {offsets = [0, 0, 16], sizes = [2, 8, 8], strides = [1, 1, 1]} : vector<2x8x32xbf16> to vector<2x8x8xbf16>
    %61 = vector.extract_strided_slice %24 {offsets = [0, 0, 16], sizes = [2, 8, 8], strides = [1, 1, 1]} : vector<2x8x32xbf16> to vector<2x8x8xbf16>
    %62 = vector.extract_strided_slice %27 {offsets = [0, 0, 16], sizes = [2, 8, 8], strides = [1, 1, 1]} : vector<2x8x32xbf16> to vector<2x8x8xbf16>
    "tpu.trace_start"() <{level = 10 : i32, message = "bqd,bkd->bqk"}> : () -> ()
    %cst_22 = arith.constant dense<0.000000e+00> : vector<2x8x8xf32>
    %63 = tpu.matmul %60, %61, %cst_22 {dimension_numbers = #tpu.dot_dimension_numbers<[2], [2], [1], [1], [0, 0, 0, 1, 1, 1], [0], [0]>} : vector<2x8x8xbf16>, vector<2x8x8xbf16>, vector<2x8x8xf32> -> vector<2x8x8xf32>
    "tpu.trace_stop"() : () -> ()
    %cst_23 = arith.constant dense<0xFF800000> : vector<2x8xf32>
    %64 = vector.multi_reduction <maximumf>, %63, %cst_23 [2] : vector<2x8x8xf32> to vector<2x8xf32>
    %65 = vector.shape_cast %64 : vector<2x8xf32> to vector<2x8x1xf32>
    %66 = vector.broadcast %65 : vector<2x8x1xf32> to vector<2x8x8xf32>
    %67 = arith.subf %63, %66 : vector<2x8x8xf32>
    %68 = math.exp %67 : vector<2x8x8xf32>
    %cst_24 = arith.constant dense<0.000000e+00> : vector<2x8xf32>
    %69 = vector.multi_reduction <add>, %68, %cst_24 [2] : vector<2x8x8xf32> to vector<2x8xf32>
    %70 = vector.shape_cast %69 : vector<2x8xf32> to vector<2x8x1xf32>
    %71 = tpu.reciprocal %70 {approx = true} : vector<2x8x1xf32> -> vector<2x8x1xf32>
    %72 = vector.broadcast %71 : vector<2x8x1xf32> to vector<2x8x8xf32>
    %73 = arith.mulf %68, %72 : vector<2x8x8xf32>
    %74 = arith.truncf %73 : vector<2x8x8xf32> to vector<2x8x8xbf16>
    "tpu.trace_start"() <{level = 10 : i32, message = "bqk,bkd->bqd"}> : () -> ()
    %cst_25 = arith.constant dense<0.000000e+00> : vector<2x8x8xf32>
    %75 = tpu.matmul %74, %62, %cst_25 {dimension_numbers = #tpu.dot_dimension_numbers<[2], [1], [1], [2], [0, 0, 0, 1, 1, 2], [0], [0]>} : vector<2x8x8xbf16>, vector<2x8x8xbf16>, vector<2x8x8xf32> -> vector<2x8x8xf32>
    "tpu.trace_stop"() : () -> ()
    %76 = vector.extract_strided_slice %21 {offsets = [0, 0, 24], sizes = [2, 8, 8], strides = [1, 1, 1]} : vector<2x8x32xbf16> to vector<2x8x8xbf16>
    %77 = vector.extract_strided_slice %24 {offsets = [0, 0, 24], sizes = [2, 8, 8], strides = [1, 1, 1]} : vector<2x8x32xbf16> to vector<2x8x8xbf16>
    %78 = vector.extract_strided_slice %27 {offsets = [0, 0, 24], sizes = [2, 8, 8], strides = [1, 1, 1]} : vector<2x8x32xbf16> to vector<2x8x8xbf16>
    "tpu.trace_start"() <{level = 10 : i32, message = "bqd,bkd->bqk"}> : () -> ()
    %cst_26 = arith.constant dense<0.000000e+00> : vector<2x8x8xf32>
    %79 = tpu.matmul %76, %77, %cst_26 {dimension_numbers = #tpu.dot_dimension_numbers<[2], [2], [1], [1], [0, 0, 0, 1, 1, 1], [0], [0]>} : vector<2x8x8xbf16>, vector<2x8x8xbf16>, vector<2x8x8xf32> -> vector<2x8x8xf32>
    "tpu.trace_stop"() : () -> ()
    %cst_27 = arith.constant dense<0xFF800000> : vector<2x8xf32>
    %80 = vector.multi_reduction <maximumf>, %79, %cst_27 [2] : vector<2x8x8xf32> to vector<2x8xf32>
    %81 = vector.shape_cast %80 : vector<2x8xf32> to vector<2x8x1xf32>
    %82 = vector.broadcast %81 : vector<2x8x1xf32> to vector<2x8x8xf32>
    %83 = arith.subf %79, %82 : vector<2x8x8xf32>
    %84 = math.exp %83 : vector<2x8x8xf32>
    %cst_28 = arith.constant dense<0.000000e+00> : vector<2x8xf32>
    %85 = vector.multi_reduction <add>, %84, %cst_28 [2] : vector<2x8x8xf32> to vector<2x8xf32>
    %86 = vector.shape_cast %85 : vector<2x8xf32> to vector<2x8x1xf32>
    %87 = tpu.reciprocal %86 {approx = true} : vector<2x8x1xf32> -> vector<2x8x1xf32>
    %88 = vector.broadcast %87 : vector<2x8x1xf32> to vector<2x8x8xf32>
    %89 = arith.mulf %84, %88 : vector<2x8x8xf32>
    %90 = arith.truncf %89 : vector<2x8x8xf32> to vector<2x8x8xbf16>
    "tpu.trace_start"() <{level = 10 : i32, message = "bqk,bkd->bqd"}> : () -> ()
    %cst_29 = arith.constant dense<0.000000e+00> : vector<2x8x8xf32>
    %91 = tpu.matmul %90, %78, %cst_29 {dimension_numbers = #tpu.dot_dimension_numbers<[2], [1], [1], [2], [0, 0, 0, 1, 1, 2], [0], [0]>} : vector<2x8x8xbf16>, vector<2x8x8xbf16>, vector<2x8x8xf32> -> vector<2x8x8xf32>
    "tpu.trace_stop"() : () -> ()
    %92 = tpu.concatenate %43, %59, %75, %91 in 2 : vector<2x8x8xf32>, vector<2x8x8xf32>, vector<2x8x8xf32>, vector<2x8x8xf32> -> vector<2x8x32xf32>
    %93 = vector.shape_cast %92 : vector<2x8x32xf32> to vector<16x32xf32>
    %94 = arith.truncf %93 : vector<16x32xf32> to vector<16x32xbf16>
    %c0_30 = arith.constant 0 : index
    %c0_31 = arith.constant 0 : index
    %c0_32 = arith.constant 0 : index
    %95 = vector.load %arg5[%c0_30, %c0_31, %c0_32] : memref<2x32x32xbf16, #tpu.memory_space<vmem>>, vector<1x32x32xbf16>
    %96 = vector.shape_cast %95 : vector<1x32x32xbf16> to vector<32x32xbf16>
    %cst_33 = arith.constant dense<0.000000e+00> : vector<16x32xf32>
    %97 = tpu.matmul %94, %96, %cst_33 {dimension_numbers = #tpu.dot_dimension_numbers<[1], [0], [0], [1], [0, 0, 1, 1], [], []>} : vector<16x32xbf16>, vector<32x32xbf16>, vector<16x32xf32> -> vector<16x32xf32>
    %c0_34 = arith.constant 0 : index
    %c0_35 = arith.constant 0 : index
    %c0_36 = arith.constant 0 : index
    %98 = vector.load %arg6[%c0_34, %c0_35, %c0_36] : memref<2x1x32xf32, #tpu.memory_space<vmem>>, vector<1x1x32xf32>
    %99 = vector.shape_cast %98 : vector<1x1x32xf32> to vector<1x32xf32>
    %100 = vector.broadcast %99 : vector<1x32xf32> to vector<16x32xf32>
    %101 = arith.addf %97, %100 : vector<16x32xf32>
    %102 = arith.addf %10, %101 : vector<16x32xf32>
    %c0_37 = arith.constant 0 : index
    %c0_38 = arith.constant 0 : index
    %c0_39 = arith.constant 0 : index
    %103 = vector.load %arg11[%c0_37, %c0_38, %c0_39] : memref<2x1x32xf32, #tpu.memory_space<vmem>>, vector<1x1x32xf32>
    %104 = vector.shape_cast %103 : vector<1x1x32xf32> to vector<1x32xf32>
    %c0_40 = arith.constant 0 : index
    %c0_41 = arith.constant 0 : index
    %c0_42 = arith.constant 0 : index
    %105 = vector.load %arg12[%c0_40, %c0_41, %c0_42] : memref<2x1x32xf32, #tpu.memory_space<vmem>>, vector<1x1x32xf32>
    %106 = vector.shape_cast %105 : vector<1x1x32xf32> to vector<1x32xf32>
    %cst_43 = arith.constant dense<0.000000e+00> : vector<16xf32>
    %107 = vector.multi_reduction <add>, %102, %cst_43 [1] : vector<16x32xf32> to vector<16xf32>
    %108 = vector.shape_cast %107 : vector<16xf32> to vector<16x1xf32>
    %cst_44 = arith.constant 3.200000e+01 : f32
    %109 = vector.broadcast %cst_44 : f32 to vector<16x1xf32>
    %110 = arith.divf %108, %109 : vector<16x1xf32>
    %111 = vector.broadcast %110 : vector<16x1xf32> to vector<16x32xf32>
    %112 = arith.subf %102, %111 : vector<16x32xf32>
    %113 = arith.mulf %112, %112 : vector<16x32xf32>
    %cst_45 = arith.constant dense<0.000000e+00> : vector<16xf32>
    %114 = vector.multi_reduction <add>, %113, %cst_45 [1] : vector<16x32xf32> to vector<16xf32>
    %115 = vector.shape_cast %114 : vector<16xf32> to vector<16x1xf32>
    %cst_46 = arith.constant 3.200000e+01 : f32
    %116 = vector.broadcast %cst_46 : f32 to vector<16x1xf32>
    %117 = arith.divf %115, %116 : vector<16x1xf32>
    %118 = vector.broadcast %110 : vector<16x1xf32> to vector<16x32xf32>
    %119 = arith.subf %102, %118 : vector<16x32xf32>
    %cst_47 = arith.constant 9.99999974E-6 : f32
    %120 = vector.broadcast %cst_47 : f32 to vector<16x1xf32>
    %121 = arith.addf %117, %120 : vector<16x1xf32>
    %122 = math.rsqrt %121 : vector<16x1xf32>
    %123 = vector.broadcast %122 : vector<16x1xf32> to vector<16x32xf32>
    %124 = arith.mulf %119, %123 : vector<16x32xf32>
    %125 = vector.broadcast %104 : vector<1x32xf32> to vector<16x32xf32>
    %126 = arith.mulf %124, %125 : vector<16x32xf32>
    %127 = vector.broadcast %106 : vector<1x32xf32> to vector<16x32xf32>
    %128 = arith.addf %126, %127 : vector<16x32xf32>
    %129 = arith.truncf %128 : vector<16x32xf32> to vector<16x32xbf16>
    %c0_48 = arith.constant 0 : index
    %c0_49 = arith.constant 0 : index
    %c0_50 = arith.constant 0 : index
    %130 = vector.load %arg7[%c0_48, %c0_49, %c0_50] : memref<2x32x2048xbf16, #tpu.memory_space<vmem>>, vector<1x32x2048xbf16>
    %131 = vector.shape_cast %130 : vector<1x32x2048xbf16> to vector<32x2048xbf16>
    %cst_51 = arith.constant dense<0.000000e+00> : vector<16x2048xf32>
    %132 = tpu.matmul %129, %131, %cst_51 {dimension_numbers = #tpu.dot_dimension_numbers<[1], [0], [0], [1], [0, 0, 1, 1], [], []>} : vector<16x32xbf16>, vector<32x2048xbf16>, vector<16x2048xf32> -> vector<16x2048xf32>
    %c0_52 = arith.constant 0 : index
    %c0_53 = arith.constant 0 : index
    %c0_54 = arith.constant 0 : index
    %133 = vector.load %arg8[%c0_52, %c0_53, %c0_54] : memref<2x1x2048xf32, #tpu.memory_space<vmem>>, vector<1x1x2048xf32>
    %134 = vector.shape_cast %133 : vector<1x1x2048xf32> to vector<1x2048xf32>
    %135 = vector.broadcast %134 : vector<1x2048xf32> to vector<16x2048xf32>
    %136 = arith.addf %132, %135 : vector<16x2048xf32>
    %cst_55 = arith.constant 0.000000e+00 : f32
    %137 = vector.broadcast %cst_55 : f32 to vector<16x2048xf32>
    %138 = arith.maximumf %136, %137 : vector<16x2048xf32>
    %139 = arith.truncf %138 : vector<16x2048xf32> to vector<16x2048xbf16>
    %c0_56 = arith.constant 0 : index
    %c0_57 = arith.constant 0 : index
    %c0_58 = arith.constant 0 : index
    %140 = vector.load %arg9[%c0_56, %c0_57, %c0_58] : memref<2x2048x32xbf16, #tpu.memory_space<vmem>>, vector<1x2048x32xbf16>
    %141 = vector.shape_cast %140 : vector<1x2048x32xbf16> to vector<2048x32xbf16>
    %cst_59 = arith.constant dense<0.000000e+00> : vector<16x32xf32>
    %142 = tpu.matmul %139, %141, %cst_59 {dimension_numbers = #tpu.dot_dimension_numbers<[1], [0], [0], [1], [0, 0, 1, 1], [], []>} : vector<16x2048xbf16>, vector<2048x32xbf16>, vector<16x32xf32> -> vector<16x32xf32>
    %c0_60 = arith.constant 0 : index
    %c0_61 = arith.constant 0 : index
    %c0_62 = arith.constant 0 : index
    %143 = vector.load %arg10[%c0_60, %c0_61, %c0_62] : memref<2x1x32xf32, #tpu.memory_space<vmem>>, vector<1x1x32xf32>
    %144 = vector.shape_cast %143 : vector<1x1x32xf32> to vector<1x32xf32>
    %145 = vector.broadcast %144 : vector<1x32xf32> to vector<16x32xf32>
    %146 = arith.addf %142, %145 : vector<16x32xf32>
    %147 = arith.addf %128, %146 : vector<16x32xf32>
    %c0_63 = arith.constant 0 : index
    %c0_64 = arith.constant 0 : index
    %c0_65 = arith.constant 0 : index
    %148 = vector.load %arg13[%c0_63, %c0_64, %c0_65] : memref<2x1x32xf32, #tpu.memory_space<vmem>>, vector<1x1x32xf32>
    %149 = vector.shape_cast %148 : vector<1x1x32xf32> to vector<1x32xf32>
    %c0_66 = arith.constant 0 : index
    %c0_67 = arith.constant 0 : index
    %c0_68 = arith.constant 0 : index
    %150 = vector.load %arg14[%c0_66, %c0_67, %c0_68] : memref<2x1x32xf32, #tpu.memory_space<vmem>>, vector<1x1x32xf32>
    %151 = vector.shape_cast %150 : vector<1x1x32xf32> to vector<1x32xf32>
    %cst_69 = arith.constant dense<0.000000e+00> : vector<16xf32>
    %152 = vector.multi_reduction <add>, %147, %cst_69 [1] : vector<16x32xf32> to vector<16xf32>
    %153 = vector.shape_cast %152 : vector<16xf32> to vector<16x1xf32>
    %cst_70 = arith.constant 3.200000e+01 : f32
    %154 = vector.broadcast %cst_70 : f32 to vector<16x1xf32>
    %155 = arith.divf %153, %154 : vector<16x1xf32>
    %156 = vector.broadcast %155 : vector<16x1xf32> to vector<16x32xf32>
    %157 = arith.subf %147, %156 : vector<16x32xf32>
    %158 = arith.mulf %157, %157 : vector<16x32xf32>
    %cst_71 = arith.constant dense<0.000000e+00> : vector<16xf32>
    %159 = vector.multi_reduction <add>, %158, %cst_71 [1] : vector<16x32xf32> to vector<16xf32>
    %160 = vector.shape_cast %159 : vector<16xf32> to vector<16x1xf32>
    %cst_72 = arith.constant 3.200000e+01 : f32
    %161 = vector.broadcast %cst_72 : f32 to vector<16x1xf32>
    %162 = arith.divf %160, %161 : vector<16x1xf32>
    %163 = vector.broadcast %155 : vector<16x1xf32> to vector<16x32xf32>
    %164 = arith.subf %147, %163 : vector<16x32xf32>
    %cst_73 = arith.constant 9.99999974E-6 : f32
    %165 = vector.broadcast %cst_73 : f32 to vector<16x1xf32>
    %166 = arith.addf %162, %165 : vector<16x1xf32>
    %167 = math.rsqrt %166 : vector<16x1xf32>
    %168 = vector.broadcast %167 : vector<16x1xf32> to vector<16x32xf32>
    %169 = arith.mulf %164, %168 : vector<16x32xf32>
    %170 = vector.broadcast %149 : vector<1x32xf32> to vector<16x32xf32>
    %171 = arith.mulf %169, %170 : vector<16x32xf32>
    %172 = vector.broadcast %151 : vector<1x32xf32> to vector<16x32xf32>
    %173 = arith.addf %171, %172 : vector<16x32xf32>
    %174 = arith.truncf %173 : vector<16x32xf32> to vector<16x32xbf16>
    %c1 = arith.constant 1 : index
    %c0_74 = arith.constant 0 : index
    %c0_75 = arith.constant 0 : index
    %175 = vector.load %arg3[%c1, %c0_74, %c0_75] : memref<2x32x96xbf16, #tpu.memory_space<vmem>>, vector<1x32x96xbf16>
    %176 = vector.shape_cast %175 : vector<1x32x96xbf16> to vector<32x96xbf16>
    %cst_76 = arith.constant dense<0.000000e+00> : vector<16x96xf32>
    %177 = tpu.matmul %174, %176, %cst_76 {dimension_numbers = #tpu.dot_dimension_numbers<[1], [0], [0], [1], [0, 0, 1, 1], [], []>} : vector<16x32xbf16>, vector<32x96xbf16>, vector<16x96xf32> -> vector<16x96xf32>
    %c1_77 = arith.constant 1 : index
    %c0_78 = arith.constant 0 : index
    %c0_79 = arith.constant 0 : index
    %178 = vector.load %arg4[%c1_77, %c0_78, %c0_79] : memref<2x1x96xf32, #tpu.memory_space<vmem>>, vector<1x1x96xf32>
    %179 = vector.shape_cast %178 : vector<1x1x96xf32> to vector<1x96xf32>
    %180 = vector.broadcast %179 : vector<1x96xf32> to vector<16x96xf32>
    %181 = arith.addf %177, %180 : vector<16x96xf32>
    %182 = vector.extract_strided_slice %181 {offsets = [0, 0], sizes = [16, 32], strides = [1, 1]} : vector<16x96xf32> to vector<16x32xf32>
    %183 = vector.shape_cast %182 : vector<16x32xf32> to vector<2x8x32xf32>
    %184 = arith.truncf %183 : vector<2x8x32xf32> to vector<2x8x32xbf16>
    %185 = vector.extract_strided_slice %181 {offsets = [0, 32], sizes = [16, 32], strides = [1, 1]} : vector<16x96xf32> to vector<16x32xf32>
    %186 = vector.shape_cast %185 : vector<16x32xf32> to vector<2x8x32xf32>
    %187 = arith.truncf %186 : vector<2x8x32xf32> to vector<2x8x32xbf16>
    %188 = vector.extract_strided_slice %181 {offsets = [0, 64], sizes = [16, 32], strides = [1, 1]} : vector<16x96xf32> to vector<16x32xf32>
    %189 = vector.shape_cast %188 : vector<16x32xf32> to vector<2x8x32xf32>
    %190 = arith.truncf %189 : vector<2x8x32xf32> to vector<2x8x32xbf16>
    %191 = vector.extract_strided_slice %184 {offsets = [0, 0, 0], sizes = [2, 8, 8], strides = [1, 1, 1]} : vector<2x8x32xbf16> to vector<2x8x8xbf16>
    %192 = vector.extract_strided_slice %187 {offsets = [0, 0, 0], sizes = [2, 8, 8], strides = [1, 1, 1]} : vector<2x8x32xbf16> to vector<2x8x8xbf16>
    %193 = vector.extract_strided_slice %190 {offsets = [0, 0, 0], sizes = [2, 8, 8], strides = [1, 1, 1]} : vector<2x8x32xbf16> to vector<2x8x8xbf16>
    "tpu.trace_start"() <{level = 10 : i32, message = "bqd,bkd->bqk"}> : () -> ()
    %cst_80 = arith.constant dense<0.000000e+00> : vector<2x8x8xf32>
    %194 = tpu.matmul %191, %192, %cst_80 {dimension_numbers = #tpu.dot_dimension_numbers<[2], [2], [1], [1], [0, 0, 0, 1, 1, 1], [0], [0]>} : vector<2x8x8xbf16>, vector<2x8x8xbf16>, vector<2x8x8xf32> -> vector<2x8x8xf32>
    "tpu.trace_stop"() : () -> ()
    %cst_81 = arith.constant dense<0xFF800000> : vector<2x8xf32>
    %195 = vector.multi_reduction <maximumf>, %194, %cst_81 [2] : vector<2x8x8xf32> to vector<2x8xf32>
    %196 = vector.shape_cast %195 : vector<2x8xf32> to vector<2x8x1xf32>
    %197 = vector.broadcast %196 : vector<2x8x1xf32> to vector<2x8x8xf32>
    %198 = arith.subf %194, %197 : vector<2x8x8xf32>
    %199 = math.exp %198 : vector<2x8x8xf32>
    %cst_82 = arith.constant dense<0.000000e+00> : vector<2x8xf32>
    %200 = vector.multi_reduction <add>, %199, %cst_82 [2] : vector<2x8x8xf32> to vector<2x8xf32>
    %201 = vector.shape_cast %200 : vector<2x8xf32> to vector<2x8x1xf32>
    %202 = tpu.reciprocal %201 {approx = true} : vector<2x8x1xf32> -> vector<2x8x1xf32>
    %203 = vector.broadcast %202 : vector<2x8x1xf32> to vector<2x8x8xf32>
    %204 = arith.mulf %199, %203 : vector<2x8x8xf32>
    %205 = arith.truncf %204 : vector<2x8x8xf32> to vector<2x8x8xbf16>
    "tpu.trace_start"() <{level = 10 : i32, message = "bqk,bkd->bqd"}> : () -> ()
    %cst_83 = arith.constant dense<0.000000e+00> : vector<2x8x8xf32>
    %206 = tpu.matmul %205, %193, %cst_83 {dimension_numbers = #tpu.dot_dimension_numbers<[2], [1], [1], [2], [0, 0, 0, 1, 1, 2], [0], [0]>} : vector<2x8x8xbf16>, vector<2x8x8xbf16>, vector<2x8x8xf32> -> vector<2x8x8xf32>
    "tpu.trace_stop"() : () -> ()
    %207 = vector.extract_strided_slice %184 {offsets = [0, 0, 8], sizes = [2, 8, 8], strides = [1, 1, 1]} : vector<2x8x32xbf16> to vector<2x8x8xbf16>
    %208 = vector.extract_strided_slice %187 {offsets = [0, 0, 8], sizes = [2, 8, 8], strides = [1, 1, 1]} : vector<2x8x32xbf16> to vector<2x8x8xbf16>
    %209 = vector.extract_strided_slice %190 {offsets = [0, 0, 8], sizes = [2, 8, 8], strides = [1, 1, 1]} : vector<2x8x32xbf16> to vector<2x8x8xbf16>
    "tpu.trace_start"() <{level = 10 : i32, message = "bqd,bkd->bqk"}> : () -> ()
    %cst_84 = arith.constant dense<0.000000e+00> : vector<2x8x8xf32>
    %210 = tpu.matmul %207, %208, %cst_84 {dimension_numbers = #tpu.dot_dimension_numbers<[2], [2], [1], [1], [0, 0, 0, 1, 1, 1], [0], [0]>} : vector<2x8x8xbf16>, vector<2x8x8xbf16>, vector<2x8x8xf32> -> vector<2x8x8xf32>
    "tpu.trace_stop"() : () -> ()
    %cst_85 = arith.constant dense<0xFF800000> : vector<2x8xf32>
    %211 = vector.multi_reduction <maximumf>, %210, %cst_85 [2] : vector<2x8x8xf32> to vector<2x8xf32>
    %212 = vector.shape_cast %211 : vector<2x8xf32> to vector<2x8x1xf32>
    %213 = vector.broadcast %212 : vector<2x8x1xf32> to vector<2x8x8xf32>
    %214 = arith.subf %210, %213 : vector<2x8x8xf32>
    %215 = math.exp %214 : vector<2x8x8xf32>
    %cst_86 = arith.constant dense<0.000000e+00> : vector<2x8xf32>
    %216 = vector.multi_reduction <add>, %215, %cst_86 [2] : vector<2x8x8xf32> to vector<2x8xf32>
    %217 = vector.shape_cast %216 : vector<2x8xf32> to vector<2x8x1xf32>
    %218 = tpu.reciprocal %217 {approx = true} : vector<2x8x1xf32> -> vector<2x8x1xf32>
    %219 = vector.broadcast %218 : vector<2x8x1xf32> to vector<2x8x8xf32>
    %220 = arith.mulf %215, %219 : vector<2x8x8xf32>
    %221 = arith.truncf %220 : vector<2x8x8xf32> to vector<2x8x8xbf16>
    "tpu.trace_start"() <{level = 10 : i32, message = "bqk,bkd->bqd"}> : () -> ()
    %cst_87 = arith.constant dense<0.000000e+00> : vector<2x8x8xf32>
    %222 = tpu.matmul %221, %209, %cst_87 {dimension_numbers = #tpu.dot_dimension_numbers<[2], [1], [1], [2], [0, 0, 0, 1, 1, 2], [0], [0]>} : vector<2x8x8xbf16>, vector<2x8x8xbf16>, vector<2x8x8xf32> -> vector<2x8x8xf32>
    "tpu.trace_stop"() : () -> ()
    %223 = vector.extract_strided_slice %184 {offsets = [0, 0, 16], sizes = [2, 8, 8], strides = [1, 1, 1]} : vector<2x8x32xbf16> to vector<2x8x8xbf16>
    %224 = vector.extract_strided_slice %187 {offsets = [0, 0, 16], sizes = [2, 8, 8], strides = [1, 1, 1]} : vector<2x8x32xbf16> to vector<2x8x8xbf16>
    %225 = vector.extract_strided_slice %190 {offsets = [0, 0, 16], sizes = [2, 8, 8], strides = [1, 1, 1]} : vector<2x8x32xbf16> to vector<2x8x8xbf16>
    "tpu.trace_start"() <{level = 10 : i32, message = "bqd,bkd->bqk"}> : () -> ()
    %cst_88 = arith.constant dense<0.000000e+00> : vector<2x8x8xf32>
    %226 = tpu.matmul %223, %224, %cst_88 {dimension_numbers = #tpu.dot_dimension_numbers<[2], [2], [1], [1], [0, 0, 0, 1, 1, 1], [0], [0]>} : vector<2x8x8xbf16>, vector<2x8x8xbf16>, vector<2x8x8xf32> -> vector<2x8x8xf32>
    "tpu.trace_stop"() : () -> ()
    %cst_89 = arith.constant dense<0xFF800000> : vector<2x8xf32>
    %227 = vector.multi_reduction <maximumf>, %226, %cst_89 [2] : vector<2x8x8xf32> to vector<2x8xf32>
    %228 = vector.shape_cast %227 : vector<2x8xf32> to vector<2x8x1xf32>
    %229 = vector.broadcast %228 : vector<2x8x1xf32> to vector<2x8x8xf32>
    %230 = arith.subf %226, %229 : vector<2x8x8xf32>
    %231 = math.exp %230 : vector<2x8x8xf32>
    %cst_90 = arith.constant dense<0.000000e+00> : vector<2x8xf32>
    %232 = vector.multi_reduction <add>, %231, %cst_90 [2] : vector<2x8x8xf32> to vector<2x8xf32>
    %233 = vector.shape_cast %232 : vector<2x8xf32> to vector<2x8x1xf32>
    %234 = tpu.reciprocal %233 {approx = true} : vector<2x8x1xf32> -> vector<2x8x1xf32>
    %235 = vector.broadcast %234 : vector<2x8x1xf32> to vector<2x8x8xf32>
    %236 = arith.mulf %231, %235 : vector<2x8x8xf32>
    %237 = arith.truncf %236 : vector<2x8x8xf32> to vector<2x8x8xbf16>
    "tpu.trace_start"() <{level = 10 : i32, message = "bqk,bkd->bqd"}> : () -> ()
    %cst_91 = arith.constant dense<0.000000e+00> : vector<2x8x8xf32>
    %238 = tpu.matmul %237, %225, %cst_91 {dimension_numbers = #tpu.dot_dimension_numbers<[2], [1], [1], [2], [0, 0, 0, 1, 1, 2], [0], [0]>} : vector<2x8x8xbf16>, vector<2x8x8xbf16>, vector<2x8x8xf32> -> vector<2x8x8xf32>
    "tpu.trace_stop"() : () -> ()
    %239 = vector.extract_strided_slice %184 {offsets = [0, 0, 24], sizes = [2, 8, 8], strides = [1, 1, 1]} : vector<2x8x32xbf16> to vector<2x8x8xbf16>
    %240 = vector.extract_strided_slice %187 {offsets = [0, 0, 24], sizes = [2, 8, 8], strides = [1, 1, 1]} : vector<2x8x32xbf16> to vector<2x8x8xbf16>
    %241 = vector.extract_strided_slice %190 {offsets = [0, 0, 24], sizes = [2, 8, 8], strides = [1, 1, 1]} : vector<2x8x32xbf16> to vector<2x8x8xbf16>
    "tpu.trace_start"() <{level = 10 : i32, message = "bqd,bkd->bqk"}> : () -> ()
    %cst_92 = arith.constant dense<0.000000e+00> : vector<2x8x8xf32>
    %242 = tpu.matmul %239, %240, %cst_92 {dimension_numbers = #tpu.dot_dimension_numbers<[2], [2], [1], [1], [0, 0, 0, 1, 1, 1], [0], [0]>} : vector<2x8x8xbf16>, vector<2x8x8xbf16>, vector<2x8x8xf32> -> vector<2x8x8xf32>
    "tpu.trace_stop"() : () -> ()
    %cst_93 = arith.constant dense<0xFF800000> : vector<2x8xf32>
    %243 = vector.multi_reduction <maximumf>, %242, %cst_93 [2] : vector<2x8x8xf32> to vector<2x8xf32>
    %244 = vector.shape_cast %243 : vector<2x8xf32> to vector<2x8x1xf32>
    %245 = vector.broadcast %244 : vector<2x8x1xf32> to vector<2x8x8xf32>
    %246 = arith.subf %242, %245 : vector<2x8x8xf32>
    %247 = math.exp %246 : vector<2x8x8xf32>
    %cst_94 = arith.constant dense<0.000000e+00> : vector<2x8xf32>
    %248 = vector.multi_reduction <add>, %247, %cst_94 [2] : vector<2x8x8xf32> to vector<2x8xf32>
    %249 = vector.shape_cast %248 : vector<2x8xf32> to vector<2x8x1xf32>
    %250 = tpu.reciprocal %249 {approx = true} : vector<2x8x1xf32> -> vector<2x8x1xf32>
    %251 = vector.broadcast %250 : vector<2x8x1xf32> to vector<2x8x8xf32>
    %252 = arith.mulf %247, %251 : vector<2x8x8xf32>
    %253 = arith.truncf %252 : vector<2x8x8xf32> to vector<2x8x8xbf16>
    "tpu.trace_start"() <{level = 10 : i32, message = "bqk,bkd->bqd"}> : () -> ()
    %cst_95 = arith.constant dense<0.000000e+00> : vector<2x8x8xf32>
    %254 = tpu.matmul %253, %241, %cst_95 {dimension_numbers = #tpu.dot_dimension_numbers<[2], [1], [1], [2], [0, 0, 0, 1, 1, 2], [0], [0]>} : vector<2x8x8xbf16>, vector<2x8x8xbf16>, vector<2x8x8xf32> -> vector<2x8x8xf32>
    "tpu.trace_stop"() : () -> ()
    %255 = tpu.concatenate %206, %222, %238, %254 in 2 : vector<2x8x8xf32>, vector<2x8x8xf32>, vector<2x8x8xf32>, vector<2x8x8xf32> -> vector<2x8x32xf32>
    %256 = vector.shape_cast %255 : vector<2x8x32xf32> to vector<16x32xf32>
    %257 = arith.truncf %256 : vector<16x32xf32> to vector<16x32xbf16>
    %c1_96 = arith.constant 1 : index
    %c0_97 = arith.constant 0 : index
    %c0_98 = arith.constant 0 : index
    %258 = vector.load %arg5[%c1_96, %c0_97, %c0_98] : memref<2x32x32xbf16, #tpu.memory_space<vmem>>, vector<1x32x32xbf16>
    %259 = vector.shape_cast %258 : vector<1x32x32xbf16> to vector<32x32xbf16>
    %cst_99 = arith.constant dense<0.000000e+00> : vector<16x32xf32>
    %260 = tpu.matmul %257, %259, %cst_99 {dimension_numbers = #tpu.dot_dimension_numbers<[1], [0], [0], [1], [0, 0, 1, 1], [], []>} : vector<16x32xbf16>, vector<32x32xbf16>, vector<16x32xf32> -> vector<16x32xf32>
    %c1_100 = arith.constant 1 : index
    %c0_101 = arith.constant 0 : index
    %c0_102 = arith.constant 0 : index
    %261 = vector.load %arg6[%c1_100, %c0_101, %c0_102] : memref<2x1x32xf32, #tpu.memory_space<vmem>>, vector<1x1x32xf32>
    %262 = vector.shape_cast %261 : vector<1x1x32xf32> to vector<1x32xf32>
    %263 = vector.broadcast %262 : vector<1x32xf32> to vector<16x32xf32>
    %264 = arith.addf %260, %263 : vector<16x32xf32>
    %265 = arith.addf %173, %264 : vector<16x32xf32>
    %c1_103 = arith.constant 1 : index
    %c0_104 = arith.constant 0 : index
    %c0_105 = arith.constant 0 : index
    %266 = vector.load %arg11[%c1_103, %c0_104, %c0_105] : memref<2x1x32xf32, #tpu.memory_space<vmem>>, vector<1x1x32xf32>
    %267 = vector.shape_cast %266 : vector<1x1x32xf32> to vector<1x32xf32>
    %c1_106 = arith.constant 1 : index
    %c0_107 = arith.constant 0 : index
    %c0_108 = arith.constant 0 : index
    %268 = vector.load %arg12[%c1_106, %c0_107, %c0_108] : memref<2x1x32xf32, #tpu.memory_space<vmem>>, vector<1x1x32xf32>
    %269 = vector.shape_cast %268 : vector<1x1x32xf32> to vector<1x32xf32>
    %cst_109 = arith.constant dense<0.000000e+00> : vector<16xf32>
    %270 = vector.multi_reduction <add>, %265, %cst_109 [1] : vector<16x32xf32> to vector<16xf32>
    %271 = vector.shape_cast %270 : vector<16xf32> to vector<16x1xf32>
    %cst_110 = arith.constant 3.200000e+01 : f32
    %272 = vector.broadcast %cst_110 : f32 to vector<16x1xf32>
    %273 = arith.divf %271, %272 : vector<16x1xf32>
    %274 = vector.broadcast %273 : vector<16x1xf32> to vector<16x32xf32>
    %275 = arith.subf %265, %274 : vector<16x32xf32>
    %276 = arith.mulf %275, %275 : vector<16x32xf32>
    %cst_111 = arith.constant dense<0.000000e+00> : vector<16xf32>
    %277 = vector.multi_reduction <add>, %276, %cst_111 [1] : vector<16x32xf32> to vector<16xf32>
    %278 = vector.shape_cast %277 : vector<16xf32> to vector<16x1xf32>
    %cst_112 = arith.constant 3.200000e+01 : f32
    %279 = vector.broadcast %cst_112 : f32 to vector<16x1xf32>
    %280 = arith.divf %278, %279 : vector<16x1xf32>
    %281 = vector.broadcast %273 : vector<16x1xf32> to vector<16x32xf32>
    %282 = arith.subf %265, %281 : vector<16x32xf32>
    %cst_113 = arith.constant 9.99999974E-6 : f32
    %283 = vector.broadcast %cst_113 : f32 to vector<16x1xf32>
    %284 = arith.addf %280, %283 : vector<16x1xf32>
    %285 = math.rsqrt %284 : vector<16x1xf32>
    %286 = vector.broadcast %285 : vector<16x1xf32> to vector<16x32xf32>
    %287 = arith.mulf %282, %286 : vector<16x32xf32>
    %288 = vector.broadcast %267 : vector<1x32xf32> to vector<16x32xf32>
    %289 = arith.mulf %287, %288 : vector<16x32xf32>
    %290 = vector.broadcast %269 : vector<1x32xf32> to vector<16x32xf32>
    %291 = arith.addf %289, %290 : vector<16x32xf32>
    %292 = arith.truncf %291 : vector<16x32xf32> to vector<16x32xbf16>
    %c1_114 = arith.constant 1 : index
    %c0_115 = arith.constant 0 : index
    %c0_116 = arith.constant 0 : index
    %293 = vector.load %arg7[%c1_114, %c0_115, %c0_116] : memref<2x32x2048xbf16, #tpu.memory_space<vmem>>, vector<1x32x2048xbf16>
    %294 = vector.shape_cast %293 : vector<1x32x2048xbf16> to vector<32x2048xbf16>
    %cst_117 = arith.constant dense<0.000000e+00> : vector<16x2048xf32>
    %295 = tpu.matmul %292, %294, %cst_117 {dimension_numbers = #tpu.dot_dimension_numbers<[1], [0], [0], [1], [0, 0, 1, 1], [], []>} : vector<16x32xbf16>, vector<32x2048xbf16>, vector<16x2048xf32> -> vector<16x2048xf32>
    %c1_118 = arith.constant 1 : index
    %c0_119 = arith.constant 0 : index
    %c0_120 = arith.constant 0 : index
    %296 = vector.load %arg8[%c1_118, %c0_119, %c0_120] : memref<2x1x2048xf32, #tpu.memory_space<vmem>>, vector<1x1x2048xf32>
    %297 = vector.shape_cast %296 : vector<1x1x2048xf32> to vector<1x2048xf32>
    %298 = vector.broadcast %297 : vector<1x2048xf32> to vector<16x2048xf32>
    %299 = arith.addf %295, %298 : vector<16x2048xf32>
    %cst_121 = arith.constant 0.000000e+00 : f32
    %300 = vector.broadcast %cst_121 : f32 to vector<16x2048xf32>
    %301 = arith.maximumf %299, %300 : vector<16x2048xf32>
    %302 = arith.truncf %301 : vector<16x2048xf32> to vector<16x2048xbf16>
    %c1_122 = arith.constant 1 : index
    %c0_123 = arith.constant 0 : index
    %c0_124 = arith.constant 0 : index
    %303 = vector.load %arg9[%c1_122, %c0_123, %c0_124] : memref<2x2048x32xbf16, #tpu.memory_space<vmem>>, vector<1x2048x32xbf16>
    %304 = vector.shape_cast %303 : vector<1x2048x32xbf16> to vector<2048x32xbf16>
    %cst_125 = arith.constant dense<0.000000e+00> : vector<16x32xf32>
    %305 = tpu.matmul %302, %304, %cst_125 {dimension_numbers = #tpu.dot_dimension_numbers<[1], [0], [0], [1], [0, 0, 1, 1], [], []>} : vector<16x2048xbf16>, vector<2048x32xbf16>, vector<16x32xf32> -> vector<16x32xf32>
    %c1_126 = arith.constant 1 : index
    %c0_127 = arith.constant 0 : index
    %c0_128 = arith.constant 0 : index
    %306 = vector.load %arg10[%c1_126, %c0_127, %c0_128] : memref<2x1x32xf32, #tpu.memory_space<vmem>>, vector<1x1x32xf32>
    %307 = vector.shape_cast %306 : vector<1x1x32xf32> to vector<1x32xf32>
    %308 = vector.broadcast %307 : vector<1x32xf32> to vector<16x32xf32>
    %309 = arith.addf %305, %308 : vector<16x32xf32>
    %310 = arith.addf %291, %309 : vector<16x32xf32>
    %c1_129 = arith.constant 1 : index
    %c0_130 = arith.constant 0 : index
    %c0_131 = arith.constant 0 : index
    %311 = vector.load %arg13[%c1_129, %c0_130, %c0_131] : memref<2x1x32xf32, #tpu.memory_space<vmem>>, vector<1x1x32xf32>
    %312 = vector.shape_cast %311 : vector<1x1x32xf32> to vector<1x32xf32>
    %c1_132 = arith.constant 1 : index
    %c0_133 = arith.constant 0 : index
    %c0_134 = arith.constant 0 : index
    %313 = vector.load %arg14[%c1_132, %c0_133, %c0_134] : memref<2x1x32xf32, #tpu.memory_space<vmem>>, vector<1x1x32xf32>
    %314 = vector.shape_cast %313 : vector<1x1x32xf32> to vector<1x32xf32>
    %cst_135 = arith.constant dense<0.000000e+00> : vector<16xf32>
    %315 = vector.multi_reduction <add>, %310, %cst_135 [1] : vector<16x32xf32> to vector<16xf32>
    %316 = vector.shape_cast %315 : vector<16xf32> to vector<16x1xf32>
    %cst_136 = arith.constant 3.200000e+01 : f32
    %317 = vector.broadcast %cst_136 : f32 to vector<16x1xf32>
    %318 = arith.divf %316, %317 : vector<16x1xf32>
    %319 = vector.broadcast %318 : vector<16x1xf32> to vector<16x32xf32>
    %320 = arith.subf %310, %319 : vector<16x32xf32>
    %321 = arith.mulf %320, %320 : vector<16x32xf32>
    %cst_137 = arith.constant dense<0.000000e+00> : vector<16xf32>
    %322 = vector.multi_reduction <add>, %321, %cst_137 [1] : vector<16x32xf32> to vector<16xf32>
    %323 = vector.shape_cast %322 : vector<16xf32> to vector<16x1xf32>
    %cst_138 = arith.constant 3.200000e+01 : f32
    %324 = vector.broadcast %cst_138 : f32 to vector<16x1xf32>
    %325 = arith.divf %323, %324 : vector<16x1xf32>
    %326 = vector.broadcast %318 : vector<16x1xf32> to vector<16x32xf32>
    %327 = arith.subf %310, %326 : vector<16x32xf32>
    %cst_139 = arith.constant 9.99999974E-6 : f32
    %328 = vector.broadcast %cst_139 : f32 to vector<16x1xf32>
    %329 = arith.addf %325, %328 : vector<16x1xf32>
    %330 = math.rsqrt %329 : vector<16x1xf32>
    %331 = vector.broadcast %330 : vector<16x1xf32> to vector<16x32xf32>
    %332 = arith.mulf %327, %331 : vector<16x32xf32>
    %333 = vector.broadcast %312 : vector<1x32xf32> to vector<16x32xf32>
    %334 = arith.mulf %332, %333 : vector<16x32xf32>
    %335 = vector.broadcast %314 : vector<1x32xf32> to vector<16x32xf32>
    %336 = arith.addf %334, %335 : vector<16x32xf32>
    %337 = vector.extract_strided_slice %336 {offsets = [0, 0], sizes = [1, 32], strides = [1, 1]} : vector<16x32xf32> to vector<1x32xf32>
    %338 = vector.extract_strided_slice %336 {offsets = [1, 0], sizes = [1, 32], strides = [1, 1]} : vector<16x32xf32> to vector<1x32xf32>
    %339 = vector.extract_strided_slice %336 {offsets = [2, 0], sizes = [1, 32], strides = [1, 1]} : vector<16x32xf32> to vector<1x32xf32>
    %340 = vector.extract_strided_slice %336 {offsets = [3, 0], sizes = [1, 32], strides = [1, 1]} : vector<16x32xf32> to vector<1x32xf32>
    %341 = vector.extract_strided_slice %336 {offsets = [4, 0], sizes = [1, 32], strides = [1, 1]} : vector<16x32xf32> to vector<1x32xf32>
    %342 = vector.extract_strided_slice %336 {offsets = [5, 0], sizes = [1, 32], strides = [1, 1]} : vector<16x32xf32> to vector<1x32xf32>
    %343 = vector.extract_strided_slice %336 {offsets = [6, 0], sizes = [1, 32], strides = [1, 1]} : vector<16x32xf32> to vector<1x32xf32>
    %344 = vector.extract_strided_slice %336 {offsets = [7, 0], sizes = [1, 32], strides = [1, 1]} : vector<16x32xf32> to vector<1x32xf32>
    %345 = tpu.concatenate %337, %338, %339, %340, %341, %342, %343, %344 in 1 : vector<1x32xf32>, vector<1x32xf32>, vector<1x32xf32>, vector<1x32xf32>, vector<1x32xf32>, vector<1x32xf32>, vector<1x32xf32>, vector<1x32xf32> -> vector<1x256xf32>
    %346 = vector.extract_strided_slice %336 {offsets = [8, 0], sizes = [1, 32], strides = [1, 1]} : vector<16x32xf32> to vector<1x32xf32>
    %347 = vector.extract_strided_slice %336 {offsets = [9, 0], sizes = [1, 32], strides = [1, 1]} : vector<16x32xf32> to vector<1x32xf32>
    %348 = vector.extract_strided_slice %336 {offsets = [10, 0], sizes = [1, 32], strides = [1, 1]} : vector<16x32xf32> to vector<1x32xf32>
    %349 = vector.extract_strided_slice %336 {offsets = [11, 0], sizes = [1, 32], strides = [1, 1]} : vector<16x32xf32> to vector<1x32xf32>
    %350 = vector.extract_strided_slice %336 {offsets = [12, 0], sizes = [1, 32], strides = [1, 1]} : vector<16x32xf32> to vector<1x32xf32>
    %351 = vector.extract_strided_slice %336 {offsets = [13, 0], sizes = [1, 32], strides = [1, 1]} : vector<16x32xf32> to vector<1x32xf32>
    %352 = vector.extract_strided_slice %336 {offsets = [14, 0], sizes = [1, 32], strides = [1, 1]} : vector<16x32xf32> to vector<1x32xf32>
    %353 = vector.extract_strided_slice %336 {offsets = [15, 0], sizes = [1, 32], strides = [1, 1]} : vector<16x32xf32> to vector<1x32xf32>
    %354 = tpu.concatenate %346, %347, %348, %349, %350, %351, %352, %353 in 1 : vector<1x32xf32>, vector<1x32xf32>, vector<1x32xf32>, vector<1x32xf32>, vector<1x32xf32>, vector<1x32xf32>, vector<1x32xf32>, vector<1x32xf32> -> vector<1x256xf32>
    %355 = tpu.concatenate %345, %354 in 0 : vector<1x256xf32>, vector<1x256xf32> -> vector<2x256xf32>
    %356 = arith.truncf %355 : vector<2x256xf32> to vector<2x256xbf16>
    %c0_140 = arith.constant 0 : index
    %c0_141 = arith.constant 0 : index
    %357 = vector.load %arg15[%c0_140, %c0_141] : memref<256x128xbf16, #tpu.memory_space<vmem>>, vector<256x128xbf16>
    %cst_142 = arith.constant dense<0.000000e+00> : vector<2x128xf32>
    %358 = tpu.matmul %356, %357, %cst_142 {dimension_numbers = #tpu.dot_dimension_numbers<[1], [0], [0], [1], [0, 0, 1, 1], [], []>} : vector<2x256xbf16>, vector<256x128xbf16>, vector<2x128xf32> -> vector<2x128xf32>
    %c0_143 = arith.constant 0 : index
    %c0_144 = arith.constant 0 : index
    %359 = vector.load %arg16[%c0_143, %c0_144] : memref<1x128xf32, #tpu.memory_space<vmem>>, vector<1x128xf32>
    %360 = vector.broadcast %359 : vector<1x128xf32> to vector<2x128xf32>
    %361 = arith.addf %358, %360 : vector<2x128xf32>
    %c0_145 = arith.constant 0 : index
    %c0_146 = arith.constant 0 : index
    %362 = vector.load %arg17[%c0_145, %c0_146] : memref<2x128xf32, #tpu.memory_space<vmem>>, vector<2x128xf32>
    tpu.vector_store %arg17[%c0_145, %c0_146], %361 {strides = array<i32>} : memref<2x128xf32, #tpu.memory_space<vmem>>, vector<2x128xf32>,
    return
  }
}

</mosaic_0001>

<bundles_post_ra>
// kernel: tpu_custom_call.1
= control target key start
LH: loop header
LB: loop body
LE: loop exit
PB: predicated region body
PF: predicated region fallthrough
CT: control target
= control target key end

     0   :  { %s10543_s0 = inlined_call_operand.vmem [shape: s32[16,1], index: 0, kind: input, shape index: {}]   ;;  %s10544_s1 = inlined_call_operand.vmem [shape: f32[32,32], index: 1, kind: input, shape index: {}]   ;;  %s10545_s2 = inlined_call_operand.vmem [shape: f32[16,32], index: 2, kind: input, shape index: {}]   ;;  %s10546_s3 = inlined_call_operand.vmem [shape: bf16[2,32,96], index: 3, kind: input, shape index: {}]   ;;  %s10547_s4 = inlined_call_operand.vmem [shape: f32[2,1,96], index: 4, kind: input, shape index: {}]   ;;  %s10548_s5 = inlined_call_operand.vmem [shape: bf16[2,32,32], index: 5, kind: input, shape index: {}]   ;;  %s10549_s6 = inlined_call_operand.vmem [shape: f32[2,1,32], index: 6, kind: input, shape index: {}]   ;;  %s10550_s7 = inlined_call_operand.vmem [shape: bf16[2,32,2048], index: 7, kind: input, shape index: {}]   ;;  %s10551_s8 = inlined_call_operand.vmem [shape: f32[2,1,2048], index: 8, kind: input, shape index: {}]   ;;  %s10552_s9 = inlined_call_operand.vmem [shape: bf16[2,2048,32], index: 9, kind: input, shape index: {}]   ;;  %s10553_s10 = inlined_call_operand.vmem [shape: f32[2,1,32], index: 10, kind: input, shape index: {}]   ;;  %s10554_s11 = inlined_call_operand.vmem [shape: f32[2,1,32], index: 11, kind: input, shape index: {}]   ;;  %s10555_s12 = inlined_call_operand.vmem [shape: f32[2,1,32], index: 12, kind: input, shape index: {}]   ;;  %s10556_s13 = inlined_call_operand.vmem [shape: f32[2,1,32], index: 13, kind: input, shape index: {}]   ;;  %s10557_s14 = inlined_call_operand.vmem [shape: f32[2,1,32], index: 14, kind: input, shape index: {}]   ;;  %s10558_s15 = inlined_call_operand.vmem [shape: bf16[256,128], index: 15, kind: input, shape index: {}]   ;;  %s10559_s16 = inlined_call_operand.vmem [shape: f32[1,128], index: 16, kind: input, shape index: {}]   ;;  %s10560_s17 = inlined_call_operand.hbm [shape: f32[2,128], index: 17, kind: output, shape index: {}]  }
   0x1   :  { %10575 = sst [smem:[#allocation5_spill]] %s10543_s0 }
   0x2   :  { %10576 = sst [smem:[#allocation6_spill]] %s10544_s1 }
   0x3   :  { %10577 = sst [smem:[#allocation7_spill]] %s10553_s10 }
   0x4   :  { %s10578_s26 = sld [smem:[#allocation5_spill]]  ;;  %v60_v2 = vlaneseq  ;;  %v8655_v3 = vmov 0   ;;  %v8656_v7 = vmov 0.0   ;;  %vm78_vm0 = vcmask 261120  }
   0x5   :  { %s10579_s10 = sld [smem:[#allocation6_spill]]  ;;  %8212 = vset.pattern.permute.xlu0 %v8655_v3  ;;  %7983 = vmatprep.subr.bf16.mxu1 %v8656_v7 }
   0x6   :  { %v61_v8 = vand.u32 127, %v60_v2 }
   0xa   :  { %v58_v0 = vld [vmem:[%s10578_s26] sm:$0xff]  ;;  %v59_v4 = vld [vmem:[%s10578_s26 + $0x8] sm:$0xff] }
   0xb   :  { %v75_v1 = vld [vmem:[%s10579_s10 + $0x18] sm:$0xff]  ;;  %v74_v5 = vld [vmem:[%s10579_s10 + $0x10] sm:$0xff]  ;;  %63 = vperm.xlu0 %8212, %v58_v0   ;;  %v73_v6 = vld [vmem:[%s10579_s10 + $0x8] sm:$0xff] }
   0xc   :  { %7958 = vmatprep.subr.mxu0 %v75_v1  ;;  %v72_v9 = vld [vmem:[%s10579_s10] sm:$0xff] }
   0xd   :  { %7959 = vmatpush3.msra.mxu0 %v75_v1 }
   0xe   :  { %7960 = vmatprep.subr.mxu0 %v74_v5 }
   0xf   :  { %7961 = vmatpush3.msra.mxu0 %v74_v5  ;;  %66 = vperm.xlu0 %8212, %v59_v4  }
  0x10   :  { %7962 = vmatprep.subr.mxu0 %v73_v6 }
  0x11   :  { %7963 = vmatpush3.msra.mxu0 %v73_v6 }
  0x12   :  { %7964 = vmatprep.subr.mxu0 %v72_v9 }
  0x13   :  { %7965 = vmatpush3.msra.mxu0 %v72_v9 }
  0x14   :  { %7969 = vmatprep.subr.bf16.mxu0 %v8656_v7 }
  0x86   :  { %v64_v10 = vpop.permute.xlu0 %63 }
  0x87   :  { %vm68_vm1 = vcmp.eq.s32.totalorder %v61_v8, %v64_v10 }
  0x88   :  { %v70_v11 = vsel %vm68_vm1, 1.0, %v8656_v7 }
  0x89   :  { %7966 = vmatprep.mubr.msk.f32.mxu0 %vm78_vm0, %v70_v11 }
  0x8a   :  { %v67_v12 = vpop.permute.xlu0 %66 }
  0x8b   :  { %vm69_vm2 = vcmp.eq.s32.totalorder %v61_v8, %v67_v12 }
  0x8c   :  { %v71_v13 = vsel %vm69_vm2, 1.0, %v8656_v7 }
  0x8d   :  { %7967 = vmatmul.mubr.msk.f32.vlgmr.msra.gmra.mxu0 %vm78_vm0, %v71_v13 }
  0x8e   :  { %22 = vsyncpa [#allocation3], 0  ;;  %v8273_v14 = vld [vmem:[%s10546_s3 + $0x8] sm:$0xff]   ;;  %v8274_v15 = vld [vmem:[%s10546_s3] sm:$0xff]   ;;  %vm8657_vm3 = vmmov 0   ;;  %vm233_vm4 = vcmask 64512  }
  0x8f   :  { %7970 = vmatpush3.bf16.msra.mxu0 %v8273_v14  ;;  %7973 = vmatprep.mubr.msk.bf16.mxu0 %vm8657_vm3, %v8656_v7  ;;  %v77_v16 = vld [vmem:[%s10545_s2 + $0x8] sm:$0xff]  ;;  %v76_v18 = vld [vmem:[%s10545_s2] sm:$0xff]  ;;  %s8658_s2 = smov 96   ;;  %s8659_s30 = smov 64   ;;  %vm358_vm5 = vcmask 1043456   ;;  %vm1136_vm6 = vcmask 130048  }
  0x90   :  { %7971 = vmatprep.subr.bf16.mxu0 %v8656_v7  ;;  %7985 = vmatprep.mubr.msk.bf16.mxu1 %vm8657_vm3, %v8656_v7  ;;  %v6786_v23 = vld [vmem:[%s10547_s4] ss:$0 sm:$0xff]  ;;  %s8660_s18 = smov 88   ;;  %s8661_s19 = smov 120   ;;  %vm1139_vm7 = vcmask 195584   ;;  %vm6543_vm8 = vcmask 523264  }
  0x91   :  { %s8662_s1 = smov 56   ;;  %s8663_s20 = smov 80   ;;  %vm6545_vm9 = vcmask 785408   ;;  %vm6589_vm10 = vcmask 1040384  }
  0x92   :  { %s8664_s21 = smov 112   ;;  %s10573_s10 = smov 48  }
  0x93   :  { %7972 = vmatpush3.bf16.msra.mxu0 %v8274_v15  ;;  %s10571_s22 = smov 72   ;;  %s10569_s23 = smov 104  }
  0x94   :  { %7977 = vmatprep.subr.bf16.mxu0 %v8656_v7  ;;  %s10567_s24 = smov 40   ;;  %s10566_s25 = smov 8  }
  0x95   :  { %s10564_s26 = smov 16   ;;  %s10587_s0 = smov 24  }
 0x14d   :  { %v7968_v17 = vpop.f32.mrf.mxu0 }
 0x14e   :  { %v8808_v20 = vadd.f32 %v7968_v17, %v77_v16 }
 0x14f   :  { %v151_v19 = vpop.f32.mrf.mxu0 }
 0x150   :  { %v8810_v21 = vadd.f32 %v151_v19, %v76_v18 }
 0x152   :  { %v160_v22 = vpack.c.bf16 %v8808_v20, %v8810_v21 }
 0x154   :  { %7974 = vmatmul.mubr.msk.bf16.vlgmr.msra.gmra.mxu0 %vm78_vm0, %v160_v22 }
 0x155   :  { %7979 = vmatprep.mubr.msk.bf16.mxu0 %vm8657_vm3, %v8656_v7 }
 0x214   :  { %v221_v24 = vpop.f32.mrf.mxu0 }
 0x215   :  { %v222_v25 = vadd.f32 %v6786_v23, %v221_v24 }
 0x216   :  { %v7975_v26 = vpop.f32.mrf.mxu0 }
 0x217   :  { %v8820_v27 = vpack.c.bf16 %v222_v25, %v222_v25 }
 0x218   :  { %v224_v28 = vpop.f32.mrf.mxu0 }
 0x219   :  { %v225_v29 = vadd.f32 %v6786_v23, %v224_v28  ;;  %231 = vrot.lane.b32.xlu1 %v8820_v27, %s8658_s2 }
 0x21a   :  { %v7976_v30 = vpop.f32.mrf.mxu0 }
 0x21b   :  { %v8824_v31 = vpack.c.bf16 %v225_v29, %v225_v29 }
 0x21d   :  { %281 = vrot.lane.b32.xlu1 %v8824_v31, %s8658_s2 }
 0x28b   :  { %v232_v32 = vpop.permute.xlu1 %231 }
 0x28c   :  { %v238_v33 = vsel %vm233_vm4, %v232_v32, 0 }
 0x28d   :  { %7978 = vmatpush3.bf16.xpose.msra.mxu0 %v238_v33 }
 0x28e   :  { %7989 = vmatprep.subr.bf16.mxu0 %v8656_v7 }
 0x28f   :  { %v282_v34 = vpop.permute.xlu1 %281 }
 0x290   :  { %v287_v35 = vsel %vm233_vm4, %v282_v34, 0 }
 0x291   :  { %7984 = vmatpush3.bf16.xpose.msra.mxu1 %v287_v35 }
 0x292   :  { %7995 = vmatprep.subr.bf16.mxu1 %v8656_v7 }
 0x294   :  { %7980 = vmatmul.mubr.msk.bf16.vlgmr.msra.gmra.mxu0 %vm233_vm4, %v8820_v27 }
 0x295   :  { %7991 = vmatprep.mubr.msk.bf16.mxu0 %vm8657_vm3, %v8656_v7 }
 0x298   :  { %7986 = vmatmul.mubr.msk.bf16.vlgmr.msra.gmra.mxu1 %vm233_vm4, %v8824_v31 }
 0x299   :  { %7997 = vmatprep.mubr.msk.bf16.mxu1 %vm8657_vm3, %v8656_v7 }
 0x354   :  { %v274_v36 = vpop.f32.mrf.mxu0 }
 0x355   :  { %v329_v37 = vsel %vm233_vm4, %v274_v36, -inf }
 0x356   :  { %330 = vmax.xlane.f32.xlu0 %v329_v37  ;;  %v7981_v38 = vpop.f32.mrf.mxu0 }
 0x358   :  { %v277_v39 = vpop.f32.mrf.mxu0  ;;  %v323_v40 = vpop.f32.mrf.mxu1 }
 0x359   :  { %v332_v41 = vsel %vm233_vm4, %v323_v40, -inf }
 0x35a   :  { %333 = vmax.xlane.f32.xlu1 %v332_v41  ;;  %v7982_v42 = vpop.f32.mrf.mxu0  ;;  %v7987_v43 = vpop.f32.mrf.mxu1 }
 0x35c   :  { %v326_v44 = vpop.f32.mrf.mxu1 }
 0x35e   :  { %v7988_v45 = vpop.f32.mrf.mxu1 }
 0x36b   :  { %353 = vrot.lane.b32.xlu1 %v8820_v27, %s8659_s30 }
 0x36f   :  { %452 = vrot.lane.b32.xlu1 %v8820_v27, %s8660_s18 }
 0x373   :  { %502 = vrot.lane.b32.xlu1 %v8824_v31, %s8660_s18 }
 0x377   :  { %500 = vrot.lane.b32.xlu1 %v8824_v31, %s8661_s19 }
 0x3df   :  { %v331_v46 = vpop.xlane.xlu0 %330 }
 0x3e0   :  { %v335_v47 = vsub.f32 %v274_v36, %v331_v46 }
 0x3e2   :  { %v337_v48 = vmul.f32 1.442695, %v335_v47 }
 0x3e3   :  { %v334_v49 = vpop.xlane.xlu1 %333 }
 0x3e4   :  { %8553 = vpow2.f32 %v337_v48  ;;  %v336_v50 = vsub.f32 %v323_v40, %v334_v49 }
 0x3e6   :  { %v339_v51 = vmul.f32 1.442695, %v336_v50 }
 0x3e7   :  { %v354_v52 = vpop.permute.xlu1 %353 }
 0x3e8   :  { %8555 = vpow2.f32 %v339_v51  ;;  %v360_v53 = vsel %vm358_vm5, %v354_v52, 0 }
 0x3e9   :  { %7990 = vmatpush3.bf16.msra.mxu0 %v360_v53 }
 0x3ea   :  { %8001 = vmatprep.subr.bf16.mxu0 %v8656_v7 }
 0x3eb   :  { %v453_v63 = vpop.permute.xlu1 %452 }
 0x3ec   :  { %v458_v5 = vsel %vm233_vm4, %v453_v63, 0 }
 0x3ef   :  { %v503_v8 = vpop.permute.xlu1 %502 }
 0x3f0   :  { %v508_v10 = vsel %vm233_vm4, %v503_v8, 0 }
 0x3f1   :  { %v8554_v54 = vpop.eup %8553 }
 0x3f2   :  { %v341_v55 = vsel %vm233_vm4, %v8554_v54, 0.0 }
 0x3f3   :  { %342 = vadd.xlane.f32.xlu0 %v341_v55  ;;  %v501_v12 = vpop.permute.xlu1 %500 }
 0x3f5   :  { %v8556_v56 = vpop.eup %8555 }
 0x3f6   :  { %v344_v57 = vsel %vm233_vm4, %v8556_v56, 0.0 }
 0x3f7   :  { %345 = vadd.xlane.f32.xlu0 %v344_v57 }
 0x40d   :  { %402 = vrot.lane.b32.xlu0 %v8824_v31, %s8659_s30 }
 0x411   :  { %450 = vrot.lane.b32.xlu0 %v8820_v27, %s8661_s19 }
 0x47c   :  { %v343_v58 = vpop.xlane.xlu0 %342 }
 0x47d   :  { %8557 = vrcp.f32 %v343_v58 }
 0x480   :  { %v346_v59 = vpop.xlane.xlu0 %345 }
 0x481   :  { %8559 = vrcp.f32 %v346_v59 }
 0x484   :  { %v403_v60 = vpop.permute.xlu0 %402 }
 0x485   :  { %v408_v61 = vsel %vm358_vm5, %v403_v60, 0 }
 0x486   :  { %7996 = vmatpush3.bf16.msra.mxu1 %v408_v61 }
 0x487   :  { %8007 = vmatprep.subr.bf16.mxu1 %v8656_v7 }
 0x488   :  { %v451_v11 = vpop.permute.xlu0 %450 }
 0x48a   :  { %v8558_v62 = vpop.eup %8557 }
 0x48b   :  { %v349_v0 = vmul.f32 %v8558_v62, %v8554_v54 }
 0x48d   :  { %v351_v1 = vpack.c.bf16 %v349_v0, %v349_v0 }
 0x48e   :  { %v8560_v4 = vpop.eup %8559 }
 0x48f   :  { %7992 = vmatmul.mubr.msk.bf16.vlgmr.msra.gmra.mxu0 %vm233_vm4, %v351_v1  ;;  %v350_v6 = vmul.f32 %v8560_v4, %v8556_v56 }
 0x490   :  { %8002 = vmatpush3.bf16.xpose.msra.mxu0 %v458_v5  ;;  %8003 = vmatprep.mubr.msk.bf16.mxu0 %vm8657_vm3, %v8656_v7 }
 0x491   :  { %v352_v9 = vpack.c.bf16 %v350_v6, %v350_v6  ;;  %8013 = vmatprep.subr.bf16.mxu0 %v8656_v7 }
 0x493   :  { %7998 = vmatmul.mubr.msk.bf16.vlgmr.msra.gmra.mxu1 %vm233_vm4, %v352_v9 }
 0x494   :  { %8008 = vmatpush3.bf16.xpose.msra.mxu1 %v508_v10  ;;  %8009 = vmatprep.mubr.msk.bf16.mxu1 %vm8657_vm3, %v8656_v7 }
 0x495   :  { %8019 = vmatprep.subr.bf16.mxu1 %v8656_v7 }
 0x497   :  { %8004 = vmatmul.mubr.msk.bf16.vlgmr.msra.gmra.mxu0 %vm233_vm4, %v451_v11 }
 0x498   :  { %8015 = vmatprep.mubr.msk.bf16.mxu0 %vm8657_vm3, %v8656_v7 }
 0x49b   :  { %8010 = vmatmul.mubr.msk.bf16.vlgmr.msra.gmra.mxu1 %vm233_vm4, %v501_v12 }
 0x49c   :  { %8021 = vmatprep.mubr.msk.bf16.mxu1 %vm8657_vm3, %v8656_v7 }
 0x54f   :  { %v8876_v13 = vpop.f32.mrf.mxu0 }
 0x551   :  { %v7993_v14 = vpop.f32.mrf.mxu0 }
 0x553   :  { %v399_v15 = vpop.f32.mrf.mxu0  ;;  %v8878_v16 = vpop.f32.mrf.mxu1 }
 0x555   :  { %v7994_v17 = vpop.f32.mrf.mxu0  ;;  %v7999_v18 = vpop.f32.mrf.mxu1 }
 0x557   :  { %v447_v19 = vpop.f32.mrf.mxu1  ;;  %v494_v22 = vpop.f32.mrf.mxu0 }
 0x558   :  { %v550_v23 = vsel %vm233_vm4, %v494_v22, -inf }
 0x559   :  { %v8000_v24 = vpop.f32.mrf.mxu1  ;;  %551 = vmax.xlane.f32.xlu0 %v550_v23  ;;  %v8005_v25 = vpop.f32.mrf.mxu0 }
 0x55b   :  { %v497_v26 = vpop.f32.mrf.mxu0  ;;  %v544_v28 = vpop.f32.mrf.mxu1 }
 0x55c   :  { %v553_v29 = vsel %vm233_vm4, %v544_v28, -inf }
 0x55d   :  { %554 = vmax.xlane.f32.xlu1 %v553_v29  ;;  %v8006_v30 = vpop.f32.mrf.mxu0  ;;  %v8011_v32 = vpop.f32.mrf.mxu1 }
 0x55f   :  { %v547_v33 = vpop.f32.mrf.mxu1 }
 0x561   :  { %v8012_v34 = vpop.f32.mrf.mxu1 }
 0x56e   :  { %574 = vrot.lane.b32.xlu1 %v8820_v27, %s8662_s1 }
 0x572   :  { %672 = vrot.lane.b32.xlu1 %v8820_v27, %s8663_s20 }
 0x576   :  { %722 = vrot.lane.b32.xlu1 %v8824_v31, %s8663_s20 }
 0x57a   :  { %720 = vrot.lane.b32.xlu1 %v8824_v31, %s8664_s21 }
 0x5e2   :  { %v552_v35 = vpop.xlane.xlu0 %551 }
 0x5e3   :  { %v556_v36 = vsub.f32 %v494_v22, %v552_v35 }
 0x5e5   :  { %v558_v37 = vmul.f32 1.442695, %v556_v36 }
 0x5e6   :  { %v555_v38 = vpop.xlane.xlu1 %554 }
 0x5e7   :  { %8561 = vpow2.f32 %v558_v37  ;;  %v557_v39 = vsub.f32 %v544_v28, %v555_v38 }
 0x5e9   :  { %v560_v40 = vmul.f32 1.442695, %v557_v39 }
 0x5ea   :  { %v575_v41 = vpop.permute.xlu1 %574 }
 0x5eb   :  { %8563 = vpow2.f32 %v560_v40  ;;  %v580_v42 = vsel %vm358_vm5, %v575_v41, 0 }
 0x5ec   :  { %8014 = vmatpush3.bf16.msra.mxu0 %v580_v42 }
 0x5ed   :  { %8025 = vmatprep.subr.bf16.mxu0 %v8656_v7 }
 0x5ee   :  { %v673_v52 = vpop.permute.xlu1 %672 }
 0x5ef   :  { %v678_v56 = vsel %vm233_vm4, %v673_v52, 0 }
 0x5f2   :  { %v723_v58 = vpop.permute.xlu1 %722 }
 0x5f3   :  { %v728_v60 = vsel %vm233_vm4, %v723_v58, 0 }
 0x5f4   :  { %v8562_v43 = vpop.eup %8561 }
 0x5f5   :  { %v562_v44 = vsel %vm233_vm4, %v8562_v43, 0.0 }
 0x5f6   :  { %563 = vadd.xlane.f32.xlu0 %v562_v44  ;;  %v721_v62 = vpop.permute.xlu1 %720 }
 0x5f8   :  { %v8564_v45 = vpop.eup %8563 }
 0x5f9   :  { %v565_v46 = vsel %vm233_vm4, %v8564_v45, 0.0 }
 0x5fa   :  { %566 = vadd.xlane.f32.xlu0 %v565_v46 }
 0x610   :  { %622 = vrot.lane.b32.xlu0 %v8824_v31, %s8662_s1 }
 0x614   :  { %670 = vrot.lane.b32.xlu0 %v8820_v27, %s8664_s21 }
 0x67f   :  { %v564_v47 = vpop.xlane.xlu0 %563 }
 0x680   :  { %8565 = vrcp.f32 %v564_v47 }
 0x683   :  { %v567_v48 = vpop.xlane.xlu0 %566 }
 0x684   :  { %8567 = vrcp.f32 %v567_v48 }
 0x687   :  { %v623_v49 = vpop.permute.xlu0 %622 }
 0x688   :  { %v628_v50 = vsel %vm358_vm5, %v623_v49, 0 }
 0x689   :  { %8020 = vmatpush3.bf16.msra.mxu1 %v628_v50 }
 0x68a   :  { %8031 = vmatprep.subr.bf16.mxu1 %v8656_v7 }
 0x68b   :  { %v671_v61 = vpop.permute.xlu0 %670 }
 0x68d   :  { %v8566_v51 = vpop.eup %8565 }
 0x68e   :  { %v570_v53 = vmul.f32 %v8566_v51, %v8562_v43 }
 0x690   :  { %v572_v54 = vpack.c.bf16 %v570_v53, %v570_v53 }
 0x691   :  { %v8568_v55 = vpop.eup %8567 }
 0x692   :  { %8016 = vmatmul.mubr.msk.bf16.vlgmr.msra.gmra.mxu0 %vm233_vm4, %v572_v54  ;;  %v571_v57 = vmul.f32 %v8568_v55, %v8564_v45 }
 0x693   :  { %8026 = vmatpush3.bf16.xpose.msra.mxu0 %v678_v56  ;;  %8027 = vmatprep.mubr.msk.bf16.mxu0 %vm8657_vm3, %v8656_v7 }
 0x694   :  { %v573_v59 = vpack.c.bf16 %v571_v57, %v571_v57  ;;  %8037 = vmatprep.subr.bf16.mxu0 %v8656_v7 }
 0x696   :  { %8022 = vmatmul.mubr.msk.bf16.vlgmr.msra.gmra.mxu1 %vm233_vm4, %v573_v59 }
 0x697   :  { %8032 = vmatpush3.bf16.xpose.msra.mxu1 %v728_v60  ;;  %8033 = vmatprep.mubr.msk.bf16.mxu1 %vm8657_vm3, %v8656_v7 }
 0x698   :  { %8043 = vmatprep.subr.bf16.mxu1 %v8656_v7 }
 0x69a   :  { %8028 = vmatmul.mubr.msk.bf16.vlgmr.msra.gmra.mxu0 %vm233_vm4, %v671_v61 }
 0x69b   :  { %8039 = vmatprep.mubr.msk.bf16.mxu0 %vm8657_vm3, %v8656_v7 }
 0x69e   :  { %8034 = vmatmul.mubr.msk.bf16.vlgmr.msra.gmra.mxu1 %vm233_vm4, %v721_v62 }
 0x69f   :  { %8045 = vmatprep.mubr.msk.bf16.mxu1 %vm8657_vm3, %v8656_v7 }
 0x752   :  { %v8916_v63 = vpop.f32.mrf.mxu0 }
 0x754   :  { %v8017_v0 = vpop.f32.mrf.mxu0 }
 0x756   :  { %v619_v1 = vpop.f32.mrf.mxu0  ;;  %v8918_v4 = vpop.f32.mrf.mxu1 }
 0x757   :  { %v8213_v5 = vpack.i.bf16 %v8918_v4, %v8916_v63 }
 0x758   :  { %v8018_v6 = vpop.f32.mrf.mxu0  ;;  %v8023_v8 = vpop.f32.mrf.mxu1 }
 0x75a   :  { %v667_v9 = vpop.f32.mrf.mxu1  ;;  %v714_v10 = vpop.f32.mrf.mxu0 }
 0x75b   :  { %v770_v11 = vsel %vm233_vm4, %v714_v10, -inf }
 0x75c   :  { %v8024_v12 = vpop.f32.mrf.mxu1  ;;  %771 = vmax.xlane.f32.xlu0 %v770_v11  ;;  %v8029_v14 = vpop.f32.mrf.mxu0 }
 0x75e   :  { %v717_v15 = vpop.f32.mrf.mxu0  ;;  %v764_v17 = vpop.f32.mrf.mxu1 }
 0x75f   :  { %v773_v18 = vsel %vm233_vm4, %v764_v17, -inf }
 0x760   :  { %774 = vmax.xlane.f32.xlu1 %v773_v18  ;;  %v8030_v19 = vpop.f32.mrf.mxu0  ;;  %v8035_v22 = vpop.f32.mrf.mxu1 }
 0x762   :  { %v767_v23 = vpop.f32.mrf.mxu1 }
 0x764   :  { %v8036_v24 = vpop.f32.mrf.mxu1 }
 0x771   :  { %794 = vrot.lane.b32.xlu1 %v8820_v27, %s10573_s10 }
 0x775   :  { %892 = vrot.lane.b32.xlu1 %v8820_v27, %s10571_s22 }
 0x779   :  { %942 = vrot.lane.b32.xlu1 %v8824_v31, %s10571_s22 }
 0x77d   :  { %940 = vrot.lane.b32.xlu1 %v8824_v31, %s10569_s23 }
 0x7e5   :  { %v772_v25 = vpop.xlane.xlu0 %771 }
 0x7e6   :  { %v776_v26 = vsub.f32 %v714_v10, %v772_v25 }
 0x7e8   :  { %v778_v28 = vmul.f32 1.442695, %v776_v26 }
 0x7e9   :  { %v775_v29 = vpop.xlane.xlu1 %774 }
 0x7ea   :  { %8569 = vpow2.f32 %v778_v28  ;;  %v777_v30 = vsub.f32 %v764_v17, %v775_v29 }
 0x7ec   :  { %v780_v32 = vmul.f32 1.442695, %v777_v30 }
 0x7ed   :  { %v795_v33 = vpop.permute.xlu1 %794 }
 0x7ee   :  { %8571 = vpow2.f32 %v780_v32  ;;  %v800_v34 = vsel %vm358_vm5, %v795_v33, 0 }
 0x7ef   :  { %8038 = vmatpush3.bf16.msra.mxu0 %v800_v34 }
 0x7f0   :  { %8049 = vmatprep.subr.bf16.mxu0 %v8656_v7 }
 0x7f1   :  { %v893_v44 = vpop.permute.xlu1 %892 }
 0x7f2   :  { %v898_v48 = vsel %vm233_vm4, %v893_v44, 0 }
 0x7f5   :  { %v943_v50 = vpop.permute.xlu1 %942 }
 0x7f6   :  { %v948_v52 = vsel %vm233_vm4, %v943_v50, 0 }
 0x7f7   :  { %v8570_v35 = vpop.eup %8569 }
 0x7f8   :  { %v782_v36 = vsel %vm233_vm4, %v8570_v35, 0.0 }
 0x7f9   :  { %783 = vadd.xlane.f32.xlu0 %v782_v36  ;;  %v941_v54 = vpop.permute.xlu1 %940 }
 0x7fb   :  { %v8572_v37 = vpop.eup %8571 }
 0x7fc   :  { %v785_v38 = vsel %vm233_vm4, %v8572_v37, 0.0 }
 0x7fd   :  { %786 = vadd.xlane.f32.xlu0 %v785_v38 }
 0x813   :  { %842 = vrot.lane.b32.xlu0 %v8824_v31, %s10573_s10 }
 0x817   :  { %890 = vrot.lane.b32.xlu0 %v8820_v27, %s10569_s23 }
 0x882   :  { %v784_v39 = vpop.xlane.xlu0 %783 }
 0x883   :  { %8573 = vrcp.f32 %v784_v39 }
 0x886   :  { %v787_v40 = vpop.xlane.xlu0 %786 }
 0x887   :  { %8575 = vrcp.f32 %v787_v40  ;;  %v8276_v40 = vld [vmem:[%s10548_s5] sm:$0xff]  }
 0x88a   :  { %v843_v41 = vpop.permute.xlu0 %842 }
 0x88b   :  { %v848_v42 = vsel %vm358_vm5, %v843_v41, 0 }
 0x88c   :  { %8044 = vmatpush3.bf16.msra.mxu1 %v848_v42 }
 0x88d   :  { %8055 = vmatprep.subr.bf16.mxu1 %v8656_v7 }
 0x88e   :  { %v891_v53 = vpop.permute.xlu0 %890 }
 0x890   :  { %v8574_v43 = vpop.eup %8573 }
 0x891   :  { %v790_v45 = vmul.f32 %v8574_v43, %v8570_v35 }
 0x893   :  { %v792_v46 = vpack.c.bf16 %v790_v45, %v790_v45 }
 0x894   :  { %v8576_v47 = vpop.eup %8575 }
 0x895   :  { %8040 = vmatmul.mubr.msk.bf16.vlgmr.msra.gmra.mxu0 %vm233_vm4, %v792_v46  ;;  %v791_v49 = vmul.f32 %v8576_v47, %v8572_v37 }
 0x896   :  { %8050 = vmatpush3.bf16.xpose.msra.mxu0 %v898_v48  ;;  %8051 = vmatprep.mubr.msk.bf16.mxu0 %vm8657_vm3, %v8656_v7 }
 0x897   :  { %v793_v51 = vpack.c.bf16 %v791_v49, %v791_v49  ;;  %8061 = vmatprep.subr.bf16.mxu0 %v8656_v7 }
 0x899   :  { %8046 = vmatmul.mubr.msk.bf16.vlgmr.msra.gmra.mxu1 %vm233_vm4, %v793_v51 }
 0x89a   :  { %8056 = vmatpush3.bf16.xpose.msra.mxu1 %v948_v52  ;;  %8057 = vmatprep.mubr.msk.bf16.mxu1 %vm8657_vm3, %v8656_v7 }
 0x89b   :  { %8067 = vmatprep.subr.bf16.mxu1 %v8656_v7 }
 0x89d   :  { %8052 = vmatmul.mubr.msk.bf16.vlgmr.msra.gmra.mxu0 %vm233_vm4, %v891_v53 }
 0x89e   :  { %8063 = vmatprep.mubr.msk.bf16.mxu0 %vm8657_vm3, %v8656_v7 }
 0x8a1   :  { %8058 = vmatmul.mubr.msk.bf16.vlgmr.msra.gmra.mxu1 %vm233_vm4, %v941_v54 }
 0x8a2   :  { %8069 = vmatprep.mubr.msk.bf16.mxu1 %vm8657_vm3, %v8656_v7 }
 0x955   :  { %v836_v55 = vpop.f32.mrf.mxu0 }
 0x957   :  { %v8041_v56 = vpop.f32.mrf.mxu0 }
 0x959   :  { %v839_v57 = vpop.f32.mrf.mxu0  ;;  %v884_v58 = vpop.f32.mrf.mxu1 }
 0x95a   :  { %v8218_v17 = vpack.i.bf16 %v884_v58, %v836_v55 }
 0x95b   :  { %v8042_v59 = vpop.f32.mrf.mxu0  ;;  %v8047_v60 = vpop.f32.mrf.mxu1 }
 0x95d   :  { %v887_v61 = vpop.f32.mrf.mxu1  ;;  %v934_v62 = vpop.f32.mrf.mxu0 }
 0x95e   :  { %v990_v0 = vsel %vm233_vm4, %v934_v62, -inf }
 0x95f   :  { %v8048_v1 = vpop.f32.mrf.mxu1  ;;  %991 = vmax.xlane.f32.xlu0 %v990_v0  ;;  %v8053_v6 = vpop.f32.mrf.mxu0 }
 0x961   :  { %v937_v8 = vpop.f32.mrf.mxu0  ;;  %v984_v9 = vpop.f32.mrf.mxu1 }
 0x962   :  { %v993_v10 = vsel %vm233_vm4, %v984_v9, -inf }
 0x963   :  { %994 = vmax.xlane.f32.xlu1 %v993_v10  ;;  %v8054_v11 = vpop.f32.mrf.mxu0  ;;  %v8059_v12 = vpop.f32.mrf.mxu1 }
 0x965   :  { %v987_v14 = vpop.f32.mrf.mxu1 }
 0x967   :  { %v8060_v15 = vpop.f32.mrf.mxu1 }
 0x974   :  { %1014 = vrot.lane.b32.xlu1 %v8820_v27, %s10567_s24 }
 0x978   :  { %8214 = vrot.lane.b32.xlu1 %v8213_v5, %s10566_s25  ;;  %s10580_s25 = sld [smem:[#allocation7_spill]] }
 0x97c   :  { %8219 = vrot.lane.b32.xlu1 %v8218_v17, %s10564_s26  ;;  %s10565_s26 = smov 24  }
 0x9e8   :  { %v992_v18 = vpop.xlane.xlu0 %991 }
 0x9e9   :  { %v996_v19 = vsub.f32 %v934_v62, %v992_v18 }
 0x9eb   :  { %v998_v22 = vmul.f32 1.442695, %v996_v19 }
 0x9ec   :  { %v995_v23 = vpop.xlane.xlu1 %994 }
 0x9ed   :  { %8577 = vpow2.f32 %v998_v22  ;;  %v997_v24 = vsub.f32 %v984_v9, %v995_v23 }
 0x9ef   :  { %v1000_v25 = vmul.f32 1.442695, %v997_v24 }
 0x9f0   :  { %v1015_v26 = vpop.permute.xlu1 %1014 }
 0x9f1   :  { %8579 = vpow2.f32 %v1000_v25  ;;  %v1020_v27 = vsel %vm358_vm5, %v1015_v26, 0 }
 0x9f2   :  { %8062 = vmatpush3.bf16.msra.mxu0 %v1020_v27 }
 0x9f3   :  { %8073 = vmatprep.subr.bf16.mxu0 %v8656_v7 }
 0x9f4   :  { %v8215_v50 = vpop.permute.xlu1 %8214 }
 0x9f5   :  { %v8217_v52 = vunpack.i.h.bf16 %v8215_v50  ;;  %v8216_v53 = vunpack.i.l.bf16 %v8215_v50 }
 0x9f7   :  { %v1135_v57 = vsel %vm233_vm4, %v8878_v16, %v8217_v52  ;;  %v1134_v58 = vsel %vm233_vm4, %v8876_v13, %v8216_v53  ;;  %v6806_v16 = vld [vmem:[%s10549_s6] ss:$0 sm:$0xff] }
 0x9f8   :  { %v8220_v51 = vpop.permute.xlu1 %8219 }
 0x9f9   :  { %v8222_v54 = vunpack.i.h.bf16 %v8220_v51  ;;  %v8221_v55 = vunpack.i.l.bf16 %v8220_v51 }
 0x9fa   :  { %v8578_v63 = vpop.eup %8577 }
 0x9fb   :  { %v1002_v4 = vsel %vm233_vm4, %v8578_v63, 0.0  ;;  %v1138_v61 = vsel %vm1136_vm6, %v1135_v57, %v8222_v54  ;;  %v1137_v62 = vsel %vm1136_vm6, %v1134_v58, %v8221_v55  ;;  %v6810_v58 = vld [vmem:[%s10554_s11] ss:$0 sm:$0xff] }
 0x9fc   :  { %1003 = vadd.xlane.f32.xlu0 %v1002_v4 }
 0x9fe   :  { %v8580_v5 = vpop.eup %8579 }
 0x9ff   :  { %v1005_v28 = vsel %vm233_vm4, %v8580_v5, 0.0 }
 0xa00   :  { %1006 = vadd.xlane.f32.xlu0 %v1005_v28  ;;  %v1275_v28 = vld [vmem:[%s10550_s7 + $0x88] sm:$0xff] }
 0xa16   :  { %1062 = vrot.lane.b32.xlu0 %v8824_v31, %s10567_s24  ;;  %v8275_v31 = vld [vmem:[%s10548_s5 + $0x8] sm:$0xff]  }
 0xa85   :  { %v1004_v29 = vpop.xlane.xlu0 %1003 }
 0xa86   :  { %8581 = vrcp.f32 %v1004_v29 }
 0xa89   :  { %v1007_v30 = vpop.xlane.xlu0 %1006 }
 0xa8a   :  { %8583 = vrcp.f32 %v1007_v30  ;;  %v1283_v30 = vld [vmem:[%s10550_s7 + $0xc8] sm:$0xff] }
 0xa8d   :  { %v1063_v32 = vpop.permute.xlu0 %1062 }
 0xa8e   :  { %v1068_v33 = vsel %vm358_vm5, %v1063_v32, 0 }
 0xa8f   :  { %8068 = vmatpush3.bf16.msra.mxu1 %v1068_v33  ;;  %v6830_v33 = vcombine.low %v1275_v28, %v1283_v30 }
 0xa93   :  { %v8582_v34 = vpop.eup %8581 }
 0xa94   :  { %v1010_v35 = vmul.f32 %v8582_v34, %v8578_v63  ;;  %v6831_v34 = vcombine.high %v1275_v28, %v1283_v30  ;;  %v1280_v28 = vld [vmem:[%s10550_s7 + $0xb0] sm:$0xff]  ;;  %v1281_v30 = vld [vmem:[%s10550_s7 + $0xb8] sm:$0xff] }
 0xa96   :  { %v1012_v36 = vpack.c.bf16 %v1010_v35, %v1010_v35  ;;  %v1258_v35 = vld [vmem:[%s10550_s7] sm:$0xff] }
 0xa97   :  { %v8584_v37 = vpop.eup %8583 }
 0xa98   :  { %8064 = vmatmul.mubr.msk.bf16.vlgmr.msra.gmra.mxu0 %vm233_vm4, %v1012_v36  ;;  %v1011_v38 = vmul.f32 %v8584_v37, %v8580_v5  ;;  %v1282_v5 = vld [vmem:[%s10550_s7 + $0xc0] sm:$0xff]  ;;  %v1259_v37 = vld [vmem:[%s10550_s7 + $0x8] sm:$0xff] }
 0xa99   :  { %8077 = vmatprep.mubr.msk.bf16.mxu0 %vm8657_vm3, %v8656_v7  ;;  %8074 = vmatpush3.bf16.msra.mxu0 %v8275_v31  ;;  %v1266_v36 = vld [vmem:[%s10550_s7 + $0x40] sm:$0xff] }
 0xa9a   :  { %v1013_v39 = vpack.c.bf16 %v1011_v38, %v1011_v38  ;;  %8075 = vmatprep.subr.bf16.mxu0 %v8656_v7  ;;  %v6813_v38 = vcombine.high %v1258_v35, %v1266_v36  ;;  %v6812_v31 = vcombine.low %v1258_v35, %v1266_v36 }
 0xa9c   :  { %8070 = vmatmul.mubr.msk.bf16.vlgmr.msra.gmra.mxu1 %vm233_vm4, %v1013_v39  ;;  %v1267_v39 = vld [vmem:[%s10550_s7 + $0x48] sm:$0xff] }
 0xa9d   :  { %1569 = vmatprep.mubr.bf16.mxu1 %v8655_v3  ;;  %8076 = vmatpush3.bf16.msra.mxu0 %v8276_v40  ;;  %v6814_v40 = vcombine.low %v1259_v37, %v1267_v39 }
 0xa9e   :  { %1592 = vmatprep.subr.bf16.mxu0 %v6831_v34 }
 0xb58   :  { %v1056_v41 = vpop.f32.mrf.mxu0 }
 0xb5a   :  { %v8065_v42 = vpop.f32.mrf.mxu0 }
 0xb5b   :  { %v1276_v42 = vld [vmem:[%s10550_s7 + $0x90] sm:$0xff] }
 0xb5c   :  { %v1059_v43 = vpop.f32.mrf.mxu0  ;;  %v1104_v44 = vpop.f32.mrf.mxu1 }
 0xb5d   :  { %v8223_v45 = vpack.i.bf16 %v1104_v44, %v1056_v41  ;;  %v6815_v41 = vcombine.high %v1259_v37, %v1267_v39  ;;  %v1284_v43 = vld [vmem:[%s10550_s7 + $0xd0] sm:$0xff]  ;;  %v1277_v44 = vld [vmem:[%s10550_s7 + $0x98] sm:$0xff] }
 0xb5e   :  { %v8066_v46 = vpop.f32.mrf.mxu0  ;;  %v8071_v47 = vpop.f32.mrf.mxu1  ;;  %v1264_v37 = vld [vmem:[%s10550_s7 + $0x30] sm:$0xff]  ;;  %v1265_v39 = vld [vmem:[%s10550_s7 + $0x38] sm:$0xff] }
 0xb5f   :  { %8224 = vrot.lane.b32.xlu0 %v8223_v45, %s10565_s26  ;;  %v6833_v45 = vcombine.high %v1276_v42, %v1284_v43  ;;  %v1285_v46 = vld [vmem:[%s10550_s7 + $0xd8] sm:$0xff]  ;;  %v6832_v47 = vcombine.low %v1276_v42, %v1284_v43 }
 0xb60   :  { %v1107_v48 = vpop.f32.mrf.mxu1 }
 0xb61   :  { %v6834_v48 = vcombine.low %v1277_v44, %v1285_v46 }
 0xb62   :  { %v8072_v49 = vpop.f32.mrf.mxu1 }
 0xb63   :  { %v6835_v49 = vcombine.high %v1277_v44, %v1285_v46  ;;  %v8277_v46 = vld [vmem:[%s10552_s9 + $0x78] sm:$0xff]  }
 0xbd1   :  { %v8225_v56 = vpop.permute.xlu0 %8224 }
 0xbd2   :  { %v8227_v59 = vunpack.i.h.bf16 %v8225_v56  ;;  %v8226_v60 = vunpack.i.l.bf16 %v8225_v56 }
 0xbd4   :  { %v1141_v0 = vsel %vm1139_vm7, %v1138_v61, %v8227_v59  ;;  %v1140_v1 = vsel %vm1139_vm7, %v1137_v62, %v8226_v60  ;;  %v6811_v62 = vld [vmem:[%s10555_s12] ss:$0 sm:$0xff] }
 0xbd5   :  { %v1142_v6 = vpack.c.bf16 %v1141_v0, %v1140_v1  ;;  %v1260_v1 = vld [vmem:[%s10550_s7 + $0x10] sm:$0xff] }
 0xbd7   :  { %8078 = vmatmul.mubr.msk.bf16.vlgmr.msra.gmra.mxu0 %vm78_vm0, %v1142_v6  ;;  %v1268_v6 = vld [vmem:[%s10550_s7 + $0x50] sm:$0xff] }
 0xbd8   :  { %1612 = vmatprep.mubr.bf16.mxu0 %v8655_v3  ;;  %1593 = vmatpush1.bf16.msra.mxu0 %v6830_v33 }
 0xbd9   :  { %1594 = vmatprep.subr.bf16.mxu0 %v6815_v41 }
 0xbdc   :  { %1595 = vmatpush1.bf16.msra.mxu0 %v6814_v40 }
 0xbdd   :  { %1678 = vmatprep.subr.bf16.mxu0 %v6835_v49  ;;  %v8280_v49 = vld [vmem:[%s10552_s9 + $0xb8] sm:$0xff]  }
 0xc97   :  { %v1203_v13 = vpop.f32.mrf.mxu0 }
 0xc98   :  { %v1204_v8 = vadd.f32 %v6806_v16, %v1203_v13  ;;  %v1269_v13 = vld [vmem:[%s10550_s7 + $0x58] sm:$0xff] }
 0xc99   :  { %v8079_v9 = vpop.f32.mrf.mxu0 }
 0xc9a   :  { %v1210_v10 = vadd.f32 %v1204_v8, %v8810_v21 }
 0xc9b   :  { %v1206_v11 = vpop.f32.mrf.mxu0 }
 0xc9c   :  { %v1207_v12 = vadd.f32 %v6806_v16, %v1206_v11  ;;  %v1214_v14 = vsel %vm78_vm0, %v1210_v10, 0.0  ;;  %v1261_v16 = vld [vmem:[%s10550_s7 + $0x18] sm:$0xff]  ;;  %v6817_v11 = vcombine.high %v1260_v1, %v1268_v6 }
 0xc9d   :  { %1215 = vadd.xlane.f32.xlu1 %v1214_v14  ;;  %v8080_v15 = vpop.f32.mrf.mxu0  ;;  %v1278_v14 = vld [vmem:[%s10550_s7 + $0xa0] sm:$0xff] }
 0xc9e   :  { %v1211_v17 = vadd.f32 %v1207_v12, %v8808_v20  ;;  %v1274_v20 = vld [vmem:[%s10550_s7 + $0x80] sm:$0xff]  ;;  %v6819_v12 = vcombine.high %v1261_v16, %v1269_v13 }
 0xc9f   :  { %v6829_v29 = vcombine.high %v1274_v20, %v1282_v5  ;;  %v6828_v32 = vcombine.low %v1274_v20, %v1282_v5  ;;  %v1286_v15 = vld [vmem:[%s10550_s7 + $0xe0] sm:$0xff] }
 0xca0   :  { %v1217_v18 = vsel %vm78_vm0, %v1211_v17, 0.0 }
 0xca1   :  { %1218 = vadd.xlane.f32.xlu0 %v1217_v18  ;;  %1549 = vmatprep.subr.bf16.mxu1 %v6829_v29  ;;  %v1287_v18 = vld [vmem:[%s10550_s7 + $0xe8] sm:$0xff]  ;;  %v1288_v29 = vld [vmem:[%s10550_s7 + $0xf0] sm:$0xff] }
 0xca2   :  { %1550 = vmatpush1.bf16.msra.mxu1 %v6828_v32  ;;  %v1289_v32 = vld [vmem:[%s10550_s7 + $0xf8] sm:$0xff]  ;;  %v6841_v35 = vcombine.high %v1280_v28, %v1288_v29  ;;  %v6840_v40 = vcombine.low %v1280_v28, %v1288_v29 }
 0xca3   :  { %1551 = vmatprep.subr.bf16.mxu1 %v6813_v38  ;;  %v6843_v36 = vcombine.high %v1281_v30, %v1289_v32  ;;  %v1272_v38 = vld [vmem:[%s10550_s7 + $0x70] sm:$0xff]  ;;  %v6842_v41 = vcombine.low %v1281_v30, %v1289_v32 }
 0xca4   :  { %v6825_v42 = vcombine.high %v1264_v37, %v1272_v38  ;;  %v6824_v44 = vcombine.low %v1264_v37, %v1272_v38 }
 0xca6   :  { %1552 = vmatpush1.bf16.msra.mxu1 %v6812_v31  ;;  %v1273_v31 = vld [vmem:[%s10550_s7 + $0x78] sm:$0xff] }
 0xca7   :  { %1635 = vmatprep.subr.bf16.mxu1 %v6833_v45  ;;  %v6827_v43 = vcombine.high %v1265_v39, %v1273_v31  ;;  %v6826_v45 = vcombine.low %v1265_v39, %v1273_v31 }
 0xd26   :  { %v1216_v19 = vpop.xlane.xlu1 %1215 }
 0xd27   :  { %v1221_v22 = vmul.f32 0.03125, %v1216_v19  ;;  %v6816_v19 = vcombine.low %v1260_v1, %v1268_v6  ;;  %v8295_v1 = vld [vmem:[%s10552_s9 + $0x18] sm:$0xff]  }
 0xd28   :  { %v8296_v6 = vld [vmem:[%s10552_s9 + $0x98] sm:$0xff]  }
 0xd29   :  { %v1223_v23 = vsub.f32 %v1210_v10, %v1221_v22  ;;  %v6818_v22 = vcombine.low %v1261_v16, %v1269_v13  ;;  %v8297_v16 = vld [vmem:[%s10552_s9 + $0x50] sm:$0xff]  }
 0xd2a   :  { %v1219_v24 = vpop.xlane.xlu0 %1218  ;;  %v8298_v13 = vld [vmem:[%s10552_s9 + $0xd0] sm:$0xff]  }
 0xd2b   :  { %v1222_v25 = vmul.f32 0.03125, %v1219_v24  ;;  %v1225_v26 = vmul.f32 %v1223_v23, %v1223_v23 }
 0xd2d   :  { %v1224_v27 = vsub.f32 %v1211_v17, %v1222_v25  ;;  %v1227_v21 = vsel %vm78_vm0, %v1225_v26, 0.0  ;;  %v1279_v17 = vld [vmem:[%s10550_s7 + $0xa8] sm:$0xff]  ;;  %v1262_v25 = vld [vmem:[%s10550_s7 + $0x20] sm:$0xff] }
 0xd2e   :  { %1228 = vadd.xlane.f32.xlu0 %v1227_v21  ;;  %v6839_v24 = vcombine.high %v1279_v17, %v1287_v18  ;;  %v1270_v26 = vld [vmem:[%s10550_s7 + $0x60] sm:$0xff]  ;;  %v1271_v21 = vld [vmem:[%s10550_s7 + $0x68] sm:$0xff] }
 0xd2f   :  { %v1226_v63 = vmul.f32 %v1224_v27, %v1224_v27  ;;  %v6821_v20 = vcombine.high %v1262_v25, %v1270_v26  ;;  %v6820_v33 = vcombine.low %v1262_v25, %v1270_v26  ;;  %v8310_v25 = vld [vmem:[%s10552_s9 + $0x1f8] sm:$0xff]   ;;  %v9241_v26 = vshrl.u32 %v60_v2, 7 }
 0xd31   :  { %v1230_v4 = vsel %vm78_vm0, %v1226_v63, 0.0  ;;  %v6836_v63 = vcombine.low %v1278_v14, %v1286_v15  ;;  %v9269_v37 = vsub.s32 5, %v9241_v26  ;;  %v9272_v38 = vsub.s32 7, %v9241_v26 }
 0xd32   :  { %1231 = vadd.xlane.f32.xlu1 %v1230_v4  ;;  %v6838_v4 = vcombine.low %v1279_v17, %v1287_v18  ;;  %v8304_v17 = vld [vmem:[%s10552_s9 + $0x88] sm:$0xff]   ;;  %v8305_v18 = vld [vmem:[%s10552_s9 + $0x40] sm:$0xff]  }
 0xdb7   :  { %v1229_v50 = vpop.xlane.xlu0 %1228 }
 0xdb8   :  { %v1233_v51 = vmul.f32 0.03125, %v1229_v50  ;;  %v8281_v50 = vld [vmem:[%s10552_s9 + $0x70] sm:$0xff]  }
 0xdba   :  { %v1235_v52 = vadd.f32 1e-05, %v1233_v51  ;;  %v8282_v51 = vld [vmem:[%s10552_s9 + $0xf0] sm:$0xff]  }
 0xdbb   :  { %v1232_v53 = vpop.xlane.xlu1 %1231 }
 0xdbc   :  { %8585 = vrsqrt.f32 %v1235_v52  ;;  %v1234_v54 = vmul.f32 0.03125, %v1232_v53  ;;  %v8283_v52 = vld [vmem:[%s10552_s9 + $0x30] sm:$0xff]  }
 0xdbd   :  { %v8284_v53 = vld [vmem:[%s10552_s9 + $0xb0] sm:$0xff]  }
 0xdbe   :  { %v1236_v55 = vadd.f32 1e-05, %v1234_v54  ;;  %v8285_v54 = vld [vmem:[%s10552_s9 + $0x68] sm:$0xff]  }
 0xdc0   :  { %8587 = vrsqrt.f32 %v1236_v55  ;;  %v8286_v55 = vld [vmem:[%s10552_s9 + $0xe8] sm:$0xff]  }
 0xdc9   :  { %v8586_v56 = vpop.eup %8585 }
 0xdca   :  { %v1239_v57 = vmul.f32 %v8586_v56, %v1223_v23  ;;  %v6837_v23 = vcombine.high %v1278_v14, %v1286_v15  ;;  %v8287_v56 = vld [vmem:[%s10552_s9 + $0x28] sm:$0xff]  }
 0xdcb   :  { %v8302_v14 = vld [vmem:[%s10552_s9 + $0xc8] sm:$0xff]  }
 0xdcc   :  { %v1247_v60 = vmul.f32 %v6810_v58, %v1239_v57  ;;  %v8288_v57 = vld [vmem:[%s10552_s9 + $0xa8] sm:$0xff]  }
 0xdcd   :  { %v8588_v59 = vpop.eup %8587  ;;  %v8303_v15 = vld [vmem:[%s10552_s9 + $0x8] sm:$0xff]  }
 0xdce   :  { %v1240_v61 = vmul.f32 %v8588_v59, %v1224_v27  ;;  %v9060_v8 = vadd.f32 %v6811_v62, %v1247_v60  ;;  %v1263_v27 = vld [vmem:[%s10550_s7 + $0x28] sm:$0xff]  ;;  %v8290_v59 = vld [vmem:[%s10552_s9 + $0xe0] sm:$0xff]  }
 0xdcf   :  { %v6823_v5 = vcombine.high %v1263_v27, %v1271_v21  ;;  %v6822_v34 = vcombine.low %v1263_v27, %v1271_v21  ;;  %v8291_v60 = vld [vmem:[%s10552_s9 + $0x20] sm:$0xff]   ;;  %v9244_v27 = vsub.s32 1, %v9241_v26  ;;  %v9247_v21 = vsub.s32 3, %v9241_v26 }
 0xdd0   :  { %v1248_v0 = vmul.f32 %v6810_v58, %v1240_v61  ;;  %v8289_v58 = vld [vmem:[%s10552_s9 + $0x60] sm:$0xff]  }
 0xdd1   :  { %v8292_v61 = vld [vmem:[%s10552_s9 + $0xa0] sm:$0xff]  }
 0xdd2   :  { %v9062_v9 = vadd.f32 %v6811_v62, %v1248_v0  ;;  %v8293_v62 = vld [vmem:[%s10552_s9 + $0x58] sm:$0xff]  }
 0xdd3   :  { %v8294_v0 = vld [vmem:[%s10552_s9 + $0xd8] sm:$0xff]  }
 0xdd4   :  { %v9066_v10 = vpack.c.bf16 %v9062_v9, %v9060_v8 }
 0xdd6   :  { %6844 = vmatmul.mubr.msk.bf16.vlgmr.msra.gmra.mxu1 %vm78_vm0, %v9066_v10  ;;  %6845 = vmatmul.mubr.msk.bf16.vlgmr.msra.gmra.mxu0 %vm78_vm0, %v9066_v10 }
 0xdd7   :  { %1636 = vmatpush1.bf16.msra.mxu1 %v6832_v47  ;;  %1679 = vmatpush1.bf16.msra.mxu0 %v6834_v48  ;;  %v8278_v47 = vld [vmem:[%s10552_s9 + $0xf8] sm:$0xff]  }
 0xdd8   :  { %1637 = vmatprep.subr.bf16.mxu1 %v6817_v11  ;;  %1680 = vmatprep.subr.bf16.mxu0 %v6819_v12  ;;  %v8279_v48 = vld [vmem:[%s10552_s9 + $0x38] sm:$0xff]   ;;  %v8300_v11 = vld [vmem:[%s10552_s9 + $0x90] sm:$0xff]   ;;  %v8301_v12 = vld [vmem:[%s10552_s9 + $0x48] sm:$0xff]  }
 0xdd9   :  { %1655 = vmatprep.mubr.bf16.mxu1 %v8655_v3  ;;  %1698 = vmatprep.mubr.bf16.mxu0 %v8655_v3 }
 0xddb   :  { %1638 = vmatpush1.bf16.msra.mxu1 %v6816_v19  ;;  %1681 = vmatpush1.bf16.msra.mxu0 %v6818_v22  ;;  %v8306_v19 = vld [vmem:[%s10552_s9 + $0xc0] sm:$0xff]  }
 0xddc   :  { %1721 = vmatprep.subr.bf16.mxu1 %v6837_v23  ;;  %1764 = vmatprep.subr.bf16.mxu0 %v6839_v24  ;;  %v8307_v22 = vld [vmem:[%s10552_s9] sm:$0xff]   ;;  %v8309_v24 = vld [vmem:[%s10552_s9 + $0x178] sm:$0xff]  }
 0xddd   :  { %v8308_v23 = vld [vmem:[%s10552_s9 + $0x80] sm:$0xff]  }
 0xdde   :  { %6846 = vmatmul.mubr.msk.bf16.vlgmr.msra.gmra.mxu1 %vm78_vm0, %v9066_v10  ;;  %6847 = vmatmul.mubr.msk.bf16.vlgmr.msra.gmra.mxu0 %vm78_vm0, %v9066_v10 }
 0xddf   :  { %1722 = vmatpush1.bf16.msra.mxu1 %v6836_v63  ;;  %1765 = vmatpush1.bf16.msra.mxu0 %v6838_v4  ;;  %v9250_v63 = vsub.s32 0, %v9241_v26  ;;  %v9253_v4 = vsub.s32 2, %v9241_v26 }
 0xde0   :  { %1723 = vmatprep.subr.bf16.mxu1 %v6821_v20  ;;  %1766 = vmatprep.subr.bf16.mxu0 %v6823_v5  ;;  %v9258_v20 = vld [vmem:[%s10551_s8] sm:$0xff] }
 0xde1   :  { %1741 = vmatprep.mubr.bf16.mxu1 %v8655_v3  ;;  %1784 = vmatprep.mubr.bf16.mxu0 %v8655_v3  ;;  %v1301_v28 = vrot.slane %v9258_v20, %v9244_v27  ;;  %v1309_v29 = vrot.slane %v9258_v20, %v9247_v21  ;;  %v1297_v30 = vrot.slane %v9258_v20, %v9250_v63 }
 0xde2   :  { %v1305_v32 = vrot.slane %v9258_v20, %v9253_v4 }
 0xde3   :  { %1724 = vmatpush1.bf16.msra.mxu1 %v6820_v33  ;;  %1767 = vmatpush1.bf16.msra.mxu0 %v6822_v34 }
 0xde4   :  { %1807 = vmatprep.subr.bf16.mxu1 %v6841_v35  ;;  %1850 = vmatprep.subr.bf16.mxu0 %v6843_v36 }
 0xde6   :  { %6848 = vmatmul.mubr.msk.bf16.vlgmr.msra.gmra.mxu1 %vm78_vm0, %v9066_v10  ;;  %6849 = vmatmul.mubr.msk.bf16.vlgmr.msra.gmra.mxu0 %vm78_vm0, %v9066_v10 }
 0xde7   :  { %1808 = vmatpush1.bf16.msra.mxu1 %v6840_v40  ;;  %1851 = vmatpush1.bf16.msra.mxu0 %v6842_v41 }
 0xde8   :  { %1809 = vmatprep.subr.bf16.mxu1 %v6825_v42  ;;  %1852 = vmatprep.subr.bf16.mxu0 %v6827_v43 }
 0xde9   :  { %1827 = vmatprep.mubr.bf16.mxu1 %v8655_v3  ;;  %1870 = vmatprep.mubr.bf16.mxu0 %v8655_v3 }
 0xdeb   :  { %1810 = vmatpush1.bf16.msra.mxu1 %v6824_v44  ;;  %1853 = vmatpush1.bf16.msra.mxu0 %v6826_v45 }
 0xdec   :  { %7546 = vmatprep.subr.bf16.mxu1 %v8277_v46  ;;  %7568 = vmatprep.subr.bf16.mxu0 %v8278_v47 }
 0xdee   :  { %6850 = vmatmul.mubr.msk.bf16.vlgmr.msra.gmra.mxu1 %vm78_vm0, %v9066_v10  ;;  %6851 = vmatmul.mubr.msk.bf16.vlgmr.msra.gmra.mxu0 %vm78_vm0, %v9066_v10  ;;  %v8299_v10 = vld [vmem:[%s10552_s9 + $0x10] sm:$0xff]  }
 0xdef   :  { %7547 = vmatpush3.bf16.msra.mxu1 %v8279_v48  ;;  %7569 = vmatpush3.bf16.msra.mxu0 %v8280_v49 }
 0xdf0   :  { %7548 = vmatprep.subr.bf16.mxu1 %v8281_v50  ;;  %7570 = vmatprep.subr.bf16.mxu0 %v8282_v51 }
 0xdf3   :  { %7549 = vmatpush3.bf16.msra.mxu1 %v8283_v52  ;;  %7571 = vmatpush3.bf16.msra.mxu0 %v8284_v53  ;;  %v1317_v52 = vrot.slane %v9258_v20, %v9269_v37  ;;  %v1325_v53 = vrot.slane %v9258_v20, %v9272_v38 }
 0xdf4   :  { %7550 = vmatprep.subr.bf16.mxu1 %v8285_v54  ;;  %7572 = vmatprep.subr.bf16.mxu0 %v8286_v55 }
 0xdf7   :  { %7551 = vmatpush3.bf16.msra.mxu1 %v8287_v56  ;;  %7573 = vmatpush3.bf16.msra.mxu0 %v8288_v57 }
 0xdf8   :  { %7552 = vmatprep.subr.bf16.mxu1 %v8289_v58  ;;  %7574 = vmatprep.subr.bf16.mxu0 %v8290_v59 }
 0xdfb   :  { %7553 = vmatpush3.bf16.msra.mxu1 %v8291_v60  ;;  %7575 = vmatpush3.bf16.msra.mxu0 %v8292_v61 }
 0xdfc   :  { %7554 = vmatprep.subr.bf16.mxu1 %v8293_v62  ;;  %7576 = vmatprep.subr.bf16.mxu0 %v8294_v0 }
 0xdff   :  { %7555 = vmatpush3.bf16.msra.mxu1 %v8295_v1  ;;  %7577 = vmatpush3.bf16.msra.mxu0 %v8296_v6  ;;  %v8311_v1 = vld [vmem:[%s10552_s9 + $0x138] sm:$0xff]  }
 0xe00   :  { %7556 = vmatprep.subr.bf16.mxu1 %v8297_v16  ;;  %7578 = vmatprep.subr.bf16.mxu0 %v8298_v13  ;;  %v8312_v6 = vld [vmem:[%s10552_s9 + $0x1b8] sm:$0xff]  }
 0xe03   :  { %7557 = vmatpush3.bf16.msra.mxu1 %v8299_v10  ;;  %7579 = vmatpush3.bf16.msra.mxu0 %v8300_v11 }
 0xe04   :  { %7558 = vmatprep.subr.bf16.mxu1 %v8301_v12  ;;  %7580 = vmatprep.subr.bf16.mxu0 %v8302_v14  ;;  %v8313_v12 = vld [vmem:[%s10552_s9 + $0x170] sm:$0xff]  }
 0xe05   :  { %v8314_v14 = vld [vmem:[%s10552_s9 + $0x1f0] sm:$0xff]  }
 0xe07   :  { %7559 = vmatpush3.bf16.msra.mxu1 %v8303_v15  ;;  %7581 = vmatpush3.bf16.msra.mxu0 %v8304_v17 }
 0xe08   :  { %7560 = vmatprep.subr.bf16.mxu1 %v8305_v18  ;;  %7582 = vmatprep.subr.bf16.mxu0 %v8306_v19 }
 0xe0b   :  { %7561 = vmatpush3.bf16.msra.mxu1 %v8307_v22  ;;  %7583 = vmatpush3.bf16.msra.mxu0 %v8308_v23 }
 0xe0c   :  { %7590 = vmatprep.subr.bf16.mxu1 %v8309_v24  ;;  %7612 = vmatprep.subr.bf16.mxu0 %v8310_v25  ;;  %v8315_v24 = vld [vmem:[%s10552_s9 + $0x130] sm:$0xff]  }
 0xe0d   :  { %v8316_v25 = vld [vmem:[%s10552_s9 + $0x1b0] sm:$0xff]  }
 0xe96   :  { %v1571_v5 = vpop.f32.mrf.mxu1  ;;  %v1614_v2 = vpop.f32.mrf.mxu0 }
 0xe97   :  { %v1572_v42 = vadd.f32 %v1571_v5, %v1297_v30  ;;  %v1615_v43 = vadd.f32 %v1614_v2, %v1305_v32  ;;  %v8317_v5 = vld [vmem:[%s10552_s9 + $0x168] sm:$0xff]  }
 0xe98   :  { %v1573_v33 = vpop.f32.mrf.mxu1  ;;  %v1616_v34 = vpop.f32.mrf.mxu0 }
 0xe99   :  { %v1574_v39 = vadd.f32 %v1573_v33, %v1301_v28  ;;  %v1617_v31 = vadd.f32 %v1616_v34, %v1309_v29  ;;  %v1881_v58 = vmax.f32 %v1572_v42, 0.0  ;;  %v1883_v59 = vmax.f32 %v1615_v43, 0.0  ;;  %v8324_v43 = vld [vmem:[%s10552_s9 + $0x1a0] sm:$0xff]  }
 0xe9a   :  { %v1575_v35 = vpop.f32.mrf.mxu1  ;;  %v1618_v36 = vpop.f32.mrf.mxu0 }
 0xe9b   :  { %v1576_v40 = vadd.f32 %v1575_v35, %v1297_v30  ;;  %v1619_v41 = vadd.f32 %v1618_v36, %v1305_v32  ;;  %v1882_v54 = vmax.f32 %v1574_v39, 0.0  ;;  %v1884_v55 = vmax.f32 %v1617_v31, 0.0  ;;  %v8318_v32 = vld [vmem:[%s10552_s9 + $0x1e8] sm:$0xff]   ;;  %v8321_v39 = vld [vmem:[%s10552_s9 + $0x160] sm:$0xff]  }
 0xe9c   :  { %v1577_v44 = vpop.f32.mrf.mxu1  ;;  %v1620_v45 = vpop.f32.mrf.mxu0  ;;  %v8319_v35 = vld [vmem:[%s10552_s9 + $0x128] sm:$0xff]   ;;  %v8322_v31 = vld [vmem:[%s10552_s9 + $0x1e0] sm:$0xff]  }
 0xe9d   :  { %v1578_v46 = vadd.f32 %v1577_v44, %v1301_v28  ;;  %v1621_v47 = vadd.f32 %v1620_v45, %v1309_v29  ;;  %v1897_v48 = vmax.f32 %v1576_v40, 0.0  ;;  %v1899_v49 = vmax.f32 %v1619_v41, 0.0  ;;  %v8320_v36 = vld [vmem:[%s10552_s9 + $0x1a8] sm:$0xff]   ;;  %v8323_v41 = vld [vmem:[%s10552_s9 + $0x120] sm:$0xff]   ;;  %v8325_v44 = vld [vmem:[%s10552_s9 + $0x158] sm:$0xff]  }
 0xe9e   :  { %v9274_v50 = vpop.f32.mrf.mxu1  ;;  %v9276_v51 = vpop.f32.mrf.mxu0  ;;  %v8326_v45 = vld [vmem:[%s10552_s9 + $0x1d8] sm:$0xff]  }
 0xe9f   :  { %v1898_v56 = vmax.f32 %v1578_v46, 0.0  ;;  %v1900_v57 = vmax.f32 %v1621_v47, 0.0  ;;  %v1913_v16 = vpack.c.bf16 %v1897_v48, %v1881_v58  ;;  %v1915_v13 = vpack.c.bf16 %v1899_v49, %v1883_v59  ;;  %v8327_v47 = vld [vmem:[%s10552_s9 + $0x118] sm:$0xff]   ;;  %v8332_v59 = vld [vmem:[%s10552_s9 + $0x190] sm:$0xff]  }
 0xea0   :  { %v1659_v60 = vpop.f32.mrf.mxu1  ;;  %v1702_v61 = vpop.f32.mrf.mxu0  ;;  %v8328_v49 = vld [vmem:[%s10552_s9 + $0x198] sm:$0xff]  }
 0xea1   :  { %v1914_v62 = vpack.c.bf16 %v1898_v56, %v1882_v54  ;;  %v1916_v0 = vpack.c.bf16 %v1900_v57, %v1884_v55  ;;  %v1660_v15 = vadd.f32 %v1659_v60, %v1317_v52  ;;  %v1703_v17 = vadd.f32 %v1702_v61, %v1325_v53  ;;  %v8331_v57 = vld [vmem:[%s10552_s9 + $0x110] sm:$0xff]   ;;  %v8334_v60 = vld [vmem:[%s10552_s9 + $0x1c8] sm:$0xff]  }
 0xea2   :  { %v9288_v10 = vpop.f32.mrf.mxu1  ;;  %v9290_v11 = vpop.f32.mrf.mxu0  ;;  %v9351_v54 = vsub.s32 4, %v9241_v26  ;;  %v9354_v55 = vsub.s32 6, %v9241_v26  ;;  %v8333_v26 = vld [vmem:[%s10552_s9 + $0x148] sm:$0xff]  }
 0xea3   :  { %2992 = vmatprep.mubr.bf16.mxu1 %v1914_v62  ;;  %3033 = vmatprep.mubr.bf16.mxu0 %v1916_v0  ;;  %v1886_v2 = vmax.f32 %v1660_v15, 0.0  ;;  %v1888_v28 = vmax.f32 %v1703_v17, 0.0  ;;  %v9379_v0 = vld [vmem:[%s10551_s8 + $0x8] sm:$0xff] }
 0xea4   :  { %v1663_v18 = vpop.f32.mrf.mxu1  ;;  %v1706_v19 = vpop.f32.mrf.mxu0  ;;  %2993 = vmatmul.mubr.bf16.vlgmr.msra.gmra.mxu1 %v1913_v16  ;;  %3034 = vmatmul.mubr.bf16.vlgmr.msra.gmra.mxu0 %v1915_v13  ;;  %v1313_v61 = vrot.slane %v9258_v20, %v9351_v54  ;;  %v1321_v62 = vrot.slane %v9258_v20, %v9354_v55  ;;  %v1333_v13 = vrot.slane %v9379_v0, %v9244_v27  ;;  %v8336_v20 = vld [vmem:[%s10552_s9 + $0x188] sm:$0xff]  }
 0xea5   :  { %v1664_v22 = vadd.f32 %v1663_v18, %v1317_v52  ;;  %v1707_v23 = vadd.f32 %v1706_v19, %v1325_v53  ;;  %7591 = vmatpush3.bf16.msra.mxu1 %v8311_v1  ;;  %7613 = vmatpush3.bf16.msra.mxu0 %v8312_v6  ;;  %v8329_v52 = vld [vmem:[%s10552_s9 + $0x150] sm:$0xff]   ;;  %v8335_v6 = vld [vmem:[%s10552_s9 + $0x108] sm:$0xff]   ;;  %v1341_v17 = vrot.slane %v9379_v0, %v9247_v21 }
 0xea6   :  { %7592 = vmatprep.subr.bf16.mxu1 %v8313_v12  ;;  %7614 = vmatprep.subr.bf16.mxu0 %v8314_v14  ;;  %v9322_v40 = vpop.f32.mrf.mxu1  ;;  %v9327_v42 = vpop.f32.mrf.mxu0  ;;  %v8330_v53 = vld [vmem:[%s10552_s9 + $0x1d0] sm:$0xff]   ;;  %v1662_v16 = vadd.f32 %v9288_v10, %v1313_v61  ;;  %v8337_v14 = vld [vmem:[%s10552_s9 + $0x140] sm:$0xff]   ;;  %v1705_v15 = vadd.f32 %v9290_v11, %v1321_v62  ;;  %v1658_v18 = vadd.f32 %v9274_v50, %v1313_v61  ;;  %v8341_v50 = vld [vmem:[%s10552_s9 + $0x278] sm:$0xff]  }
 0xea7   :  { %v1902_v29 = vmax.f32 %v1664_v22, 0.0  ;;  %v1904_v30 = vmax.f32 %v1707_v23, 0.0  ;;  %v8338_v10 = vld [vmem:[%s10552_s9 + $0x1c0] sm:$0xff]   ;;  %v1701_v22 = vadd.f32 %v9276_v51, %v1321_v62 }
 0xea8   :  { %v1745_v46 = vpop.f32.mrf.mxu1  ;;  %v1788_v48 = vpop.f32.mrf.mxu0  ;;  %v1901_v11 = vmax.f32 %v1662_v16, 0.0  ;;  %v8355_v61 = vld [vmem:[%s10552_s9 + $0x220] sm:$0xff]   ;;  %v8358_v16 = vld [vmem:[%s10552_s9 + $0x2d8] sm:$0xff]  }
 0xea9   :  { %v1918_v33 = vpack.c.bf16 %v1902_v29, %v1886_v2  ;;  %v1920_v34 = vpack.c.bf16 %v1904_v30, %v1888_v28  ;;  %7593 = vmatpush3.bf16.msra.mxu1 %v8315_v24  ;;  %7615 = vmatpush3.bf16.msra.mxu0 %v8316_v25  ;;  %v8339_v24 = vld [vmem:[%s10552_s9 + $0x100] sm:$0xff]   ;;  %v1746_v25 = vadd.f32 %v1745_v46, %v1333_v13  ;;  %v1903_v2 = vmax.f32 %v1705_v15, 0.0  ;;  %v8342_v28 = vld [vmem:[%s10552_s9 + $0x2f8] sm:$0xff]   ;;  %v8361_v15 = vld [vmem:[%s10552_s9 + $0x250] sm:$0xff]  }
 0xeaa   :  { %7594 = vmatprep.subr.bf16.mxu1 %v8317_v5  ;;  %7616 = vmatprep.subr.bf16.mxu0 %v8318_v32  ;;  %v9356_v56 = vpop.f32.mrf.mxu1  ;;  %v9361_v58 = vpop.f32.mrf.mxu0  ;;  %v8340_v5 = vld [vmem:[%s10552_s9 + $0x180] sm:$0xff]   ;;  %v1789_v51 = vadd.f32 %v1788_v48, %v1341_v17  ;;  %v1885_v29 = vmax.f32 %v1658_v18, 0.0  ;;  %v1887_v32 = vmax.f32 %v1701_v22, 0.0  ;;  %v8348_v48 = vld [vmem:[%s10552_s9 + $0x2b0] sm:$0xff]  }
 0xeab   :  { %3074 = vmatprep.mubr.bf16.mxu1 %v1918_v33  ;;  %3115 = vmatprep.mubr.bf16.mxu0 %v1920_v34  ;;  %v8343_v34 = vld [vmem:[%s10552_s9 + $0x238] sm:$0xff]   ;;  %v8363_v18 = vld [vmem:[%s10552_s9 + $0x210] sm:$0xff]  }
 0xeac   :  { %v1749_v1 = vpop.f32.mrf.mxu1  ;;  %v1792_v12 = vpop.f32.mrf.mxu0  ;;  %v8364_v22 = vld [vmem:[%s10552_s9 + $0x290] sm:$0xff]  }
 0xead   :  { %7595 = vmatpush3.bf16.msra.mxu1 %v8319_v35  ;;  %7617 = vmatpush3.bf16.msra.mxu0 %v8320_v36  ;;  %v1750_v19 = vadd.f32 %v1749_v1, %v1333_v13  ;;  %v1793_v23 = vadd.f32 %v1792_v12, %v1341_v17  ;;  %v1917_v35 = vpack.c.bf16 %v1901_v11, %v1885_v29  ;;  %v1890_v36 = vmax.f32 %v1746_v25, 0.0  ;;  %v8356_v1 = vld [vmem:[%s10552_s9 + $0x2a0] sm:$0xff]   ;;  %v8359_v12 = vld [vmem:[%s10552_s9 + $0x218] sm:$0xff]   ;;  %v8362_v17 = vld [vmem:[%s10552_s9 + $0x2d0] sm:$0xff]  }
 0xeae   :  { %7596 = vmatprep.subr.bf16.mxu1 %v8321_v39  ;;  %7618 = vmatprep.subr.bf16.mxu0 %v8322_v31  ;;  %v8344_v39 = vld [vmem:[%s10552_s9 + $0x2b8] sm:$0xff]   ;;  %v1919_v31 = vpack.c.bf16 %v1903_v2, %v1887_v32  ;;  %v9454_v62 = vpop.f32.mrf.mxu0  ;;  %v1329_v11 = vrot.slane %v9379_v0, %v9250_v63  ;;  %v1337_v25 = vrot.slane %v9379_v0, %v9253_v4  ;;  %v8368_v29 = vld [vmem:[%s10552_s9 + $0x288] sm:$0xff]  }
 0xeaf   :  { %v1906_v30 = vmax.f32 %v1750_v19, 0.0  ;;  %v1908_v33 = vmax.f32 %v1793_v23, 0.0  ;;  %v8365_v23 = vld [vmem:[%s10552_s9 + $0x248] sm:$0xff]  }
 0xeb0   :  { %v1748_v2 = vadd.f32 %v9356_v56, %v1329_v11  ;;  %v1791_v32 = vadd.f32 %v9361_v58, %v1337_v25  ;;  %v8370_v56 = vld [vmem:[%s10552_s9 + $0x2c0] sm:$0xff]  }
 0xeb1   :  { %7597 = vmatpush3.bf16.msra.mxu1 %v8323_v41  ;;  %7619 = vmatpush3.bf16.msra.mxu0 %v8324_v43  ;;  %v1892_v41 = vmax.f32 %v1789_v51, 0.0  ;;  %v8345_v43 = vld [vmem:[%s10552_s9 + $0x270] sm:$0xff]   ;;  %v1349_v51 = vrot.slane %v9379_v0, %v9269_v37 }
 0xeb2   :  { %7598 = vmatprep.subr.bf16.mxu1 %v8325_v44  ;;  %7620 = vmatprep.subr.bf16.mxu0 %v8326_v45  ;;  %v1922_v44 = vpack.c.bf16 %v1906_v30, %v1890_v36  ;;  %v8346_v45 = vld [vmem:[%s10552_s9 + $0x2f0] sm:$0xff]   ;;  %v8369_v30 = vld [vmem:[%s10552_s9 + $0x240] sm:$0xff]   ;;  %v1787_v36 = vadd.f32 %v9327_v42, %v1337_v25  ;;  %v1905_v58 = vmax.f32 %v1748_v2, 0.0  ;;  %v8389_v25 = vld [vmem:[%s10552_s9 + $0x358] sm:$0xff]  }
 0xeb3   :  { %v1924_v46 = vpack.c.bf16 %v1908_v33, %v1892_v41  ;;  %v1357_v33 = vrot.slane %v9379_v0, %v9272_v38  ;;  %v8392_v2 = vld [vmem:[%s10552_s9 + $0x398] sm:$0xff]  }
 0xeb5   :  { %7599 = vmatpush3.bf16.msra.mxu1 %v8327_v47  ;;  %7621 = vmatpush3.bf16.msra.mxu0 %v8328_v49  ;;  %v8347_v47 = vld [vmem:[%s10552_s9 + $0x230] sm:$0xff]   ;;  %v8349_v49 = vld [vmem:[%s10552_s9 + $0x268] sm:$0xff]  }
 0xeb6   :  { %7600 = vmatprep.subr.bf16.mxu1 %v8329_v52  ;;  %7622 = vmatprep.subr.bf16.mxu0 %v8330_v53  ;;  %v8350_v52 = vld [vmem:[%s10552_s9 + $0x2e8] sm:$0xff]  }
 0xeb7   :  { %v8351_v53 = vld [vmem:[%s10552_s9 + $0x228] sm:$0xff]  }
 0xeb9   :  { %7601 = vmatpush3.bf16.msra.mxu1 %v8331_v57  ;;  %7623 = vmatpush3.bf16.msra.mxu0 %v8332_v59  ;;  %v8352_v57 = vld [vmem:[%s10552_s9 + $0x2a8] sm:$0xff]   ;;  %v8353_v59 = vld [vmem:[%s10552_s9 + $0x260] sm:$0xff]  }
 0xeba   :  { %7602 = vmatprep.subr.bf16.mxu1 %v8333_v26  ;;  %7624 = vmatprep.subr.bf16.mxu0 %v8334_v60  ;;  %v8354_v26 = vld [vmem:[%s10552_s9 + $0x2e0] sm:$0xff]   ;;  %v9449_v60 = vpop.f32.mrf.mxu1 }
 0xebc   :  { %v1831_v13 = vpop.f32.mrf.mxu1 }
 0xebd   :  { %7603 = vmatpush3.bf16.msra.mxu1 %v8335_v6  ;;  %7625 = vmatpush3.bf16.msra.mxu0 %v8336_v20  ;;  %v8357_v6 = vld [vmem:[%s10552_s9 + $0x258] sm:$0xff]   ;;  %v1874_v20 = vpop.f32.mrf.mxu0  ;;  %v1832_v41 = vadd.f32 %v1831_v13, %v1349_v51 }
 0xebe   :  { %7604 = vmatprep.subr.bf16.mxu1 %v8337_v14  ;;  %7626 = vmatprep.subr.bf16.mxu0 %v8338_v10  ;;  %v8360_v14 = vld [vmem:[%s10552_s9 + $0x298] sm:$0xff]   ;;  %v9477_v10 = vpop.f32.mrf.mxu1  ;;  %v1875_v42 = vadd.f32 %v1874_v20, %v1357_v33  ;;  %v8380_v20 = vld [vmem:[%s10552_s9 + $0x3b0] sm:$0xff]  }
 0xebf   :  { %v9482_v19 = vpop.f32.mrf.mxu0 }
 0xec1   :  { %7605 = vmatpush3.bf16.msra.mxu1 %v8339_v24  ;;  %7627 = vmatpush3.bf16.msra.mxu0 %v8340_v5  ;;  %v8366_v24 = vld [vmem:[%s10552_s9 + $0x2c8] sm:$0xff]   ;;  %v1835_v5 = vpop.f32.mrf.mxu1 }
 0xec2   :  { %7634 = vmatprep.subr.bf16.mxu1 %v8341_v50  ;;  %7656 = vmatprep.subr.bf16.mxu0 %v8342_v28  ;;  %v8367_v50 = vld [vmem:[%s10552_s9 + $0x208] sm:$0xff]   ;;  %v1878_v28 = vpop.f32.mrf.mxu0 }
 0xec4   :  { %3075 = vmatmul.mubr.bf16.vlgmr.msra.gmra.mxu1 %v1917_v35  ;;  %3116 = vmatmul.mubr.bf16.vlgmr.msra.gmra.mxu0 %v1919_v31  ;;  %v1836_v35 = vadd.f32 %v1835_v5, %v1349_v51  ;;  %v8371_v31 = vld [vmem:[%s10552_s9 + $0x200] sm:$0xff]   ;;  %v8390_v5 = vld [vmem:[%s10552_s9 + $0x3d8] sm:$0xff]   ;;  %v8393_v51 = vld [vmem:[%s10552_s9 + $0x350] sm:$0xff]  }
 0xec5   :  { %7635 = vmatpush3.bf16.msra.mxu1 %v8343_v34  ;;  %3156 = vmatprep.mubr.bf16.mxu1 %v1922_v44  ;;  %v1744_v34 = vadd.f32 %v9322_v40, %v1329_v11  ;;  %v8373_v40 = vld [vmem:[%s10552_s9 + $0x378] sm:$0xff]   ;;  %v1907_v44 = vmax.f32 %v1791_v32, 0.0  ;;  %v8388_v11 = vld [vmem:[%s10552_s9 + $0x3a0] sm:$0xff]   ;;  %v8397_v32 = vld [vmem:[%s10552_s9 + $0x348] sm:$0xff]  }
 0xec6   :  { %7657 = vmatpush3.bf16.msra.mxu0 %v8344_v39  ;;  %3197 = vmatprep.mubr.bf16.mxu0 %v1924_v46  ;;  %v1879_v39 = vadd.f32 %v1878_v28, %v1357_v33  ;;  %v8394_v28 = vld [vmem:[%s10552_s9 + $0x3d0] sm:$0xff]   ;;  %v8398_v33 = vld [vmem:[%s10552_s9 + $0x3c8] sm:$0xff]  }
 0xec7   :  { %7636 = vmatprep.subr.bf16.mxu1 %v8345_v43  ;;  %7658 = vmatprep.subr.bf16.mxu0 %v8346_v45  ;;  %v8372_v43 = vld [vmem:[%s10552_s9 + $0x280] sm:$0xff]   ;;  %v8374_v45 = vld [vmem:[%s10552_s9 + $0x3f8] sm:$0xff]   ;;  %v1889_v46 = vmax.f32 %v1744_v34, 0.0  ;;  %v1353_v34 = vrot.slane %v9379_v0, %v9354_v55 }
 0xec9   :  { %7637 = vmatpush3.bf16.msra.mxu1 %v8347_v47  ;;  %v1910_v47 = vmax.f32 %v1836_v35, 0.0  ;;  %v8399_v35 = vld [vmem:[%s10552_s9 + $0x308] sm:$0xff]  }
 0xeca   :  { %7659 = vmatpush3.bf16.msra.mxu0 %v8348_v48  ;;  %7638 = vmatprep.subr.bf16.mxu1 %v8349_v49  ;;  %v1891_v48 = vmax.f32 %v1787_v36, 0.0  ;;  %v1912_v49 = vmax.f32 %v1879_v39, 0.0  ;;  %v8400_v39 = vld [vmem:[%s10552_s9 + $0x388] sm:$0xff]  }
 0xecb   :  { %7660 = vmatprep.subr.bf16.mxu0 %v8350_v52  ;;  %v8375_v52 = vld [vmem:[%s10552_s9 + $0x338] sm:$0xff]  }
 0xecd   :  { %7639 = vmatpush3.bf16.msra.mxu1 %v8351_v53  ;;  %v1921_v53 = vpack.c.bf16 %v1905_v58, %v1889_v46  ;;  %v1877_v58 = vadd.f32 %v9482_v19, %v1353_v34  ;;  %v8404_v19 = vld [vmem:[%s10552_s9 + $0x380] sm:$0xff]  }
 0xece   :  { %7661 = vmatpush3.bf16.msra.mxu0 %v8352_v57  ;;  %7640 = vmatprep.subr.bf16.mxu1 %v8353_v59  ;;  %v1894_v57 = vmax.f32 %v1832_v41, 0.0  ;;  %v8376_v59 = vld [vmem:[%s10552_s9 + $0x3b8] sm:$0xff]  }
 0xecf   :  { %7662 = vmatprep.subr.bf16.mxu0 %v8354_v26  ;;  %v1923_v26 = vpack.c.bf16 %v1907_v44, %v1891_v48  ;;  %v1911_v44 = vmax.f32 %v1877_v58, 0.0 }
 0xed1   :  { %7641 = vmatpush3.bf16.msra.mxu1 %v8355_v61  ;;  %v1896_v61 = vmax.f32 %v1875_v42, 0.0 }
 0xed2   :  { %7663 = vmatpush3.bf16.msra.mxu0 %v8356_v1  ;;  %7642 = vmatprep.subr.bf16.mxu1 %v8357_v6  ;;  %v8377_v1 = vld [vmem:[%s10552_s9 + $0x370] sm:$0xff]   ;;  %v1926_v6 = vpack.c.bf16 %v1910_v47, %v1894_v57 }
 0xed3   :  { %7664 = vmatprep.subr.bf16.mxu0 %v8358_v16  ;;  %v8378_v16 = vld [vmem:[%s10552_s9 + $0x3f0] sm:$0xff]   ;;  %v1928_v13 = vpack.c.bf16 %v1912_v49, %v1896_v61 }
 0xed5   :  { %7643 = vmatpush3.bf16.msra.mxu1 %v8359_v12  ;;  %v8379_v12 = vld [vmem:[%s10552_s9 + $0x330] sm:$0xff]  }
 0xed6   :  { %7665 = vmatpush3.bf16.msra.mxu0 %v8360_v14  ;;  %7644 = vmatprep.subr.bf16.mxu1 %v8361_v15  ;;  %v8381_v14 = vld [vmem:[%s10552_s9 + $0x368] sm:$0xff]  }
 0xed7   :  { %7666 = vmatprep.subr.bf16.mxu0 %v8362_v17  ;;  %v8382_v15 = vld [vmem:[%s10552_s9 + $0x3e8] sm:$0xff]  }
 0xed8   :  { %v8383_v17 = vld [vmem:[%s10552_s9 + $0x328] sm:$0xff]  }
 0xed9   :  { %7645 = vmatpush3.bf16.msra.mxu1 %v8363_v18  ;;  %v8384_v18 = vld [vmem:[%s10552_s9 + $0x3a8] sm:$0xff]  }
 0xeda   :  { %7667 = vmatpush3.bf16.msra.mxu0 %v8364_v22  ;;  %7646 = vmatprep.subr.bf16.mxu1 %v8365_v23  ;;  %v8385_v22 = vld [vmem:[%s10552_s9 + $0x360] sm:$0xff]  }
 0xedb   :  { %7668 = vmatprep.subr.bf16.mxu0 %v8366_v24  ;;  %v8386_v23 = vld [vmem:[%s10552_s9 + $0x3e0] sm:$0xff]  }
 0xedc   :  { %v8387_v24 = vld [vmem:[%s10552_s9 + $0x320] sm:$0xff]  }
 0xedd   :  { %7647 = vmatpush3.bf16.msra.mxu1 %v8367_v50  ;;  %v8391_v50 = vld [vmem:[%s10552_s9 + $0x318] sm:$0xff]  }
 0xede   :  { %7669 = vmatpush3.bf16.msra.mxu0 %v8368_v29  ;;  %7648 = vmatprep.subr.bf16.mxu1 %v8369_v30  ;;  %v8395_v29 = vld [vmem:[%s10552_s9 + $0x310] sm:$0xff]  }
 0xedf   :  { %7670 = vmatprep.subr.bf16.mxu0 %v8370_v56  ;;  %v8396_v30 = vld [vmem:[%s10552_s9 + $0x390] sm:$0xff]   ;;  %v1345_v56 = vrot.slane %v9379_v0, %v9351_v54  ;;  %v8402_v0 = vld [vmem:[%s10552_s9 + $0x3c0] sm:$0xff]  }
 0xee1   :  { %7649 = vmatpush3.bf16.msra.mxu1 %v8371_v31  ;;  %v1834_v36 = vadd.f32 %v9477_v10, %v1345_v56  ;;  %v8401_v31 = vld [vmem:[%s10552_s9 + $0x340] sm:$0xff]   ;;  %v1830_v41 = vadd.f32 %v9449_v60, %v1345_v56  ;;  %v1873_v10 = vadd.f32 %v9454_v62, %v1353_v34 }
 0xee2   :  { %7671 = vmatpush3.bf16.msra.mxu0 %v8372_v43  ;;  %7678 = vmatprep.subr.bf16.mxu1 %v8373_v40  ;;  %v8403_v43 = vld [vmem:[%s10552_s9 + $0x300] sm:$0xff]  }
 0xee3   :  { %7700 = vmatprep.subr.bf16.mxu0 %v8374_v45  ;;  %v1909_v40 = vmax.f32 %v1834_v36, 0.0  ;;  %v1893_v42 = vmax.f32 %v1830_v41, 0.0  ;;  %v1895_v45 = vmax.f32 %v1873_v10, 0.0 }
 0xee4   :  { %3157 = vmatmul.mubr.bf16.vlgmr.msra.gmra.mxu1 %v1921_v53 }
 0xee5   :  { %3198 = vmatmul.mubr.bf16.vlgmr.msra.gmra.mxu0 %v1923_v26  ;;  %7679 = vmatpush3.bf16.msra.mxu1 %v8375_v52  ;;  %v1925_v60 = vpack.c.bf16 %v1909_v40, %v1893_v42  ;;  %v1927_v62 = vpack.c.bf16 %v1911_v44, %v1895_v45 }
 0xee6   :  { %3238 = vmatprep.mubr.bf16.mxu1 %v1926_v6  ;;  %7701 = vmatpush3.bf16.msra.mxu0 %v8376_v59 }
 0xee7   :  { %3279 = vmatprep.mubr.bf16.mxu0 %v1928_v13  ;;  %7680 = vmatprep.subr.bf16.mxu1 %v8377_v1 }
 0xee8   :  { %7702 = vmatprep.subr.bf16.mxu0 %v8378_v16 }
 0xee9   :  { %7681 = vmatpush3.bf16.msra.mxu1 %v8379_v12 }
 0xeea   :  { %7703 = vmatpush3.bf16.msra.mxu0 %v8380_v20  ;;  %7682 = vmatprep.subr.bf16.mxu1 %v8381_v14  ;;  %v6852_v14 = vld [vmem:[%s10580_s25] ss:$0 sm:$0xff] }
 0xeeb   :  { %7704 = vmatprep.subr.bf16.mxu0 %v8382_v15 }
 0xeed   :  { %7683 = vmatpush3.bf16.msra.mxu1 %v8383_v17 }
 0xeee   :  { %7705 = vmatpush3.bf16.msra.mxu0 %v8384_v18  ;;  %7684 = vmatprep.subr.bf16.mxu1 %v8385_v22 }
 0xeef   :  { %7706 = vmatprep.subr.bf16.mxu0 %v8386_v23 }
 0xef1   :  { %7685 = vmatpush3.bf16.msra.mxu1 %v8387_v24 }
 0xef2   :  { %7707 = vmatpush3.bf16.msra.mxu0 %v8388_v11  ;;  %7686 = vmatprep.subr.bf16.mxu1 %v8389_v25 }
 0xef3   :  { %7708 = vmatprep.subr.bf16.mxu0 %v8390_v5 }
 0xef5   :  { %7687 = vmatpush3.bf16.msra.mxu1 %v8391_v50 }
 0xef6   :  { %7709 = vmatpush3.bf16.msra.mxu0 %v8392_v2  ;;  %7688 = vmatprep.subr.bf16.mxu1 %v8393_v51 }
 0xef7   :  { %7710 = vmatprep.subr.bf16.mxu0 %v8394_v28 }
 0xef9   :  { %7689 = vmatpush3.bf16.msra.mxu1 %v8395_v29 }
 0xefa   :  { %7711 = vmatpush3.bf16.msra.mxu0 %v8396_v30  ;;  %7690 = vmatprep.subr.bf16.mxu1 %v8397_v32 }
 0xefb   :  { %7712 = vmatprep.subr.bf16.mxu0 %v8398_v33 }
 0xefd   :  { %7691 = vmatpush3.bf16.msra.mxu1 %v8399_v35 }
 0xefe   :  { %7713 = vmatpush3.bf16.msra.mxu0 %v8400_v39  ;;  %7692 = vmatprep.subr.bf16.mxu1 %v8401_v31 }
 0xeff   :  { %7714 = vmatprep.subr.bf16.mxu0 %v8402_v0 }
 0xf01   :  { %7693 = vmatpush3.bf16.msra.mxu1 %v8403_v43 }
 0xf02   :  { %7715 = vmatpush3.bf16.msra.mxu0 %v8404_v19  ;;  %8081 = vmatprep.subr.bf16.mxu1 %v8656_v7 }
 0xf03   :  { %8089 = vmatprep.subr.bf16.mxu0 %v8656_v7 }
 0xf04   :  { %3239 = vmatmul.mubr.bf16.vlgmr.msra.gmra.mxu1 %v1925_v60 }
 0xf05   :  { %3280 = vmatmul.mubr.bf16.vlgmr.msra.gmra.mxu0 %v1927_v62  ;;  %8085 = vmatprep.mubr.msk.bf16.mxu1 %vm8657_vm3, %v8656_v7 }
 0xf06   :  { %8091 = vmatprep.mubr.msk.bf16.mxu0 %vm8657_vm3, %v8656_v7 }
 0xf64   :  { %v7562_v46 = vpop.f32.mrf.mxu1  ;;  %v7584_v47 = vpop.f32.mrf.mxu0 }
 0xf66   :  { %v7563_v48 = vpop.f32.mrf.mxu1  ;;  %v7585_v49 = vpop.f32.mrf.mxu0 }
 0xf67   :  { %v7564_v20 = vadd.f32 %v7563_v48, %v7562_v46  ;;  %v7586_v11 = vadd.f32 %v7585_v49, %v7584_v47 }
 0xf68   :  { %v7565_v52 = vpop.f32.mrf.mxu1  ;;  %v7587_v53 = vpop.f32.mrf.mxu0 }
 0xf69   :  { %v2995_v18 = vadd.f32 %v7564_v20, %v6852_v14 }
 0xf6a   :  { %v7566_v57 = vpop.f32.mrf.mxu1  ;;  %v7588_v26 = vpop.f32.mrf.mxu0 }
 0xf6b   :  { %v7567_v22 = vadd.f32 %v7566_v57, %v7565_v52  ;;  %v3036_v5 = vadd.f32 %v7586_v11, %v2995_v18  ;;  %v7589_v28 = vadd.f32 %v7588_v26, %v7587_v53 }
 0xf6d   :  { %v2998_v50 = vadd.f32 %v7567_v22, %v6852_v14 }
 0xf6f   :  { %v3039_v32 = vadd.f32 %v7589_v28, %v2998_v50  ;;  %v8406_v50 = vld [vmem:[%s10546_s3 + $0x10] sm:$0xff]  }
 0xf84   :  { %v7606_v59 = vpop.f32.mrf.mxu1  ;;  %v7628_v61 = vpop.f32.mrf.mxu0 }
 0xf86   :  { %v7607_v1 = vpop.f32.mrf.mxu1  ;;  %v7629_v6 = vpop.f32.mrf.mxu0 }
 0xf87   :  { %v7608_v25 = vadd.f32 %v7607_v1, %v7606_v59  ;;  %v7630_v33 = vadd.f32 %v7629_v6, %v7628_v61 }
 0xf88   :  { %v7609_v16 = vpop.f32.mrf.mxu1  ;;  %v7631_v13 = vpop.f32.mrf.mxu0 }
 0xf89   :  { %v3077_v29 = vadd.f32 %v7608_v25, %v3036_v5 }
 0xf8a   :  { %v7610_v12 = vpop.f32.mrf.mxu1  ;;  %v7632_v17 = vpop.f32.mrf.mxu0 }
 0xf8b   :  { %v7611_v30 = vadd.f32 %v7610_v12, %v7609_v16  ;;  %v3118_v36 = vadd.f32 %v7630_v33, %v3077_v29  ;;  %v7633_v31 = vadd.f32 %v7632_v17, %v7631_v13 }
 0xf8d   :  { %v3080_v39 = vadd.f32 %v7611_v30, %v3039_v32 }
 0xf8f   :  { %v3121_v43 = vadd.f32 %v7633_v31, %v3080_v39  ;;  %v6982_v31 = vld [vmem:[%s10557_s14] ss:$0 sm:$0xff] }
 0xfa4   :  { %v7650_v15 = vpop.f32.mrf.mxu1 }
 0xfa5   :  { %v7672_v23 = vpop.f32.mrf.mxu0 }
 0xfa6   :  { %v7651_v24 = vpop.f32.mrf.mxu1 }
 0xfa7   :  { %v7673_v2 = vpop.f32.mrf.mxu0  ;;  %v7652_v56 = vadd.f32 %v7651_v24, %v7650_v15 }
 0xfa8   :  { %v7653_v51 = vpop.f32.mrf.mxu1  ;;  %v7674_v40 = vadd.f32 %v7673_v2, %v7672_v23 }
 0xfa9   :  { %v7675_v34 = vpop.f32.mrf.mxu0  ;;  %v3159_v58 = vadd.f32 %v7652_v56, %v3118_v36 }
 0xfaa   :  { %v7654_v35 = vpop.f32.mrf.mxu1 }
 0xfab   :  { %v7655_v0 = vadd.f32 %v7654_v35, %v7653_v51  ;;  %v7676_v41 = vpop.f32.mrf.mxu0  ;;  %v3200_v42 = vadd.f32 %v7674_v40, %v3159_v58 }
 0xfac   :  { %v7677_v47 = vadd.f32 %v7676_v41, %v7675_v34  ;;  %v6981_v34 = vld [vmem:[%s10556_s13] ss:$0 sm:$0xff] }
 0xfad   :  { %v3162_v45 = vadd.f32 %v7655_v0, %v3121_v43  ;;  %v6988_v43 = vld [vmem:[%s10547_s4 + $0x1] ss:$0 sm:$0xff]  ;;  %s10581_s4 = smov 48  }
 0xfaf   :  { %v3203_v57 = vadd.f32 %v7677_v47, %v3162_v45 }
 0xfc4   :  { %v7694_v10 = vpop.f32.mrf.mxu1 }
 0xfc5   :  { %v7716_v19 = vpop.f32.mrf.mxu0 }
 0xfc6   :  { %v7695_v44 = vpop.f32.mrf.mxu1 }
 0xfc7   :  { %v7696_v60 = vadd.f32 %v7695_v44, %v7694_v10  ;;  %v7717_v62 = vpop.f32.mrf.mxu0 }
 0xfc8   :  { %v7697_v46 = vpop.f32.mrf.mxu1  ;;  %v7718_v49 = vadd.f32 %v7717_v62, %v7716_v19 }
 0xfc9   :  { %v3241_v48 = vadd.f32 %v7696_v60, %v3200_v42  ;;  %v7719_v52 = vpop.f32.mrf.mxu0 }
 0xfca   :  { %v7698_v53 = vpop.f32.mrf.mxu1 }
 0xfcb   :  { %v3282_v59 = vadd.f32 %v7718_v49, %v3241_v48  ;;  %v7699_v26 = vadd.f32 %v7698_v53, %v7697_v46  ;;  %v7720_v61 = vpop.f32.mrf.mxu0 }
 0xfcc   :  { %v7721_v6 = vadd.f32 %v7720_v61, %v7719_v52 }
 0xfcd   :  { %v3244_v1 = vadd.f32 %v7699_v26, %v3203_v57  ;;  %v3288_v16 = vadd.f32 %v3282_v59, %v9060_v8 }
 0xfcf   :  { %v3285_v13 = vadd.f32 %v7721_v6, %v3244_v1  ;;  %v3292_v12 = vsel %vm78_vm0, %v3288_v16, 0.0 }
 0xfd0   :  { %3293 = vadd.xlane.f32.xlu0 %v3292_v12 }
 0xfd1   :  { %v3289_v20 = vadd.f32 %v3285_v13, %v9062_v9  ;;  %v8405_v9 = vld [vmem:[%s10546_s3 + $0x18] sm:$0xff]  }
 0xfd2   :  { %8082 = vmatpush3.bf16.msra.mxu1 %v8405_v9 }
 0xfd3   :  { %v3295_v14 = vsel %vm78_vm0, %v3289_v20, 0.0  ;;  %8083 = vmatprep.subr.bf16.mxu1 %v8656_v7 }
 0xfd4   :  { %3296 = vadd.xlane.f32.xlu1 %v3295_v14 }
 0xfd6   :  { %8084 = vmatpush3.bf16.msra.mxu1 %v8406_v50 }
 0xfd7   :  { %8095 = vmatprep.subr.bf16.mxu1 %v8656_v7 }
0x1059   :  { %v3294_v15 = vpop.xlane.xlu0 %3293 }
0x105a   :  { %v3298_v17 = vmul.f32 0.03125, %v3294_v15 }
0x105c   :  { %v3300_v18 = vsub.f32 %v3288_v16, %v3298_v17 }
0x105d   :  { %v3297_v22 = vpop.xlane.xlu1 %3296 }
0x105e   :  { %v3299_v23 = vmul.f32 0.03125, %v3297_v22  ;;  %v3302_v24 = vmul.f32 %v3300_v18, %v3300_v18 }
0x1060   :  { %v3301_v11 = vsub.f32 %v3289_v20, %v3299_v23  ;;  %v3304_v25 = vsel %vm78_vm0, %v3302_v24, 0.0 }
0x1061   :  { %3305 = vadd.xlane.f32.xlu0 %v3304_v25 }
0x1062   :  { %v3303_v8 = vmul.f32 %v3301_v11, %v3301_v11 }
0x1064   :  { %v3307_v5 = vsel %vm78_vm0, %v3303_v8, 0.0 }
0x1065   :  { %3308 = vadd.xlane.f32.xlu1 %v3307_v5 }
0x10ea   :  { %v3306_v2 = vpop.xlane.xlu0 %3305 }
0x10eb   :  { %v3310_v51 = vmul.f32 0.03125, %v3306_v2 }
0x10ed   :  { %v3312_v28 = vadd.f32 1e-05, %v3310_v51 }
0x10ee   :  { %v3309_v29 = vpop.xlane.xlu1 %3308 }
0x10ef   :  { %8589 = vrsqrt.f32 %v3312_v28  ;;  %v3311_v30 = vmul.f32 0.03125, %v3309_v29 }
0x10f1   :  { %v3313_v32 = vadd.f32 1e-05, %v3311_v30 }
0x10f3   :  { %8591 = vrsqrt.f32 %v3313_v32 }
0x10fc   :  { %v8590_v33 = vpop.eup %8589 }
0x10fd   :  { %v3316_v56 = vmul.f32 %v8590_v33, %v3300_v18 }
0x10ff   :  { %v3324_v39 = vmul.f32 %v6981_v34, %v3316_v56 }
0x1100   :  { %v8592_v35 = vpop.eup %8591 }
0x1101   :  { %v3317_v36 = vmul.f32 %v8592_v35, %v3301_v11  ;;  %v9656_v0 = vadd.f32 %v6982_v31, %v3324_v39 }
0x1103   :  { %v3325_v58 = vmul.f32 %v6981_v34, %v3317_v36 }
0x1105   :  { %v9658_v41 = vadd.f32 %v6982_v31, %v3325_v58 }
0x1107   :  { %v3334_v10 = vpack.c.bf16 %v9658_v41, %v9656_v0 }
0x1109   :  { %8086 = vmatmul.mubr.msk.bf16.vlgmr.msra.gmra.mxu1 %vm78_vm0, %v3334_v10 }
0x110a   :  { %8097 = vmatprep.mubr.msk.bf16.mxu1 %vm8657_vm3, %v8656_v7 }
0x11c9   :  { %v3397_v40 = vpop.f32.mrf.mxu1 }
0x11ca   :  { %v3398_v19 = vadd.f32 %v6988_v43, %v3397_v40 }
0x11cb   :  { %v8087_v44 = vpop.f32.mrf.mxu1 }
0x11cc   :  { %v9668_v42 = vpack.c.bf16 %v3398_v19, %v3398_v19 }
0x11cd   :  { %v3400_v45 = vpop.f32.mrf.mxu1 }
0x11ce   :  { %v3401_v60 = vadd.f32 %v6988_v43, %v3400_v45  ;;  %3407 = vrot.lane.b32.xlu0 %v9668_v42, %s8658_s2 }
0x11cf   :  { %v8088_v62 = vpop.f32.mrf.mxu1 }
0x11d0   :  { %v9672_v46 = vpack.c.bf16 %v3401_v60, %v3401_v60 }
0x11d2   :  { %3456 = vrot.lane.b32.xlu1 %v9672_v46, %s8658_s2 }
0x1240   :  { %v3408_v47 = vpop.permute.xlu0 %3407 }
0x1241   :  { %v3413_v48 = vsel %vm233_vm4, %v3408_v47, 0 }
0x1242   :  { %8090 = vmatpush3.bf16.xpose.msra.mxu0 %v3413_v48 }
0x1243   :  { %8101 = vmatprep.subr.bf16.mxu0 %v8656_v7 }
0x1244   :  { %v3457_v49 = vpop.permute.xlu1 %3456 }
0x1245   :  { %v3462_v52 = vsel %vm233_vm4, %v3457_v49, 0 }
0x1246   :  { %8096 = vmatpush3.bf16.xpose.msra.mxu1 %v3462_v52 }
0x1247   :  { %8107 = vmatprep.subr.bf16.mxu1 %v8656_v7 }
0x1249   :  { %8092 = vmatmul.mubr.msk.bf16.vlgmr.msra.gmra.mxu0 %vm233_vm4, %v9668_v42 }
0x124a   :  { %8103 = vmatprep.mubr.msk.bf16.mxu0 %vm8657_vm3, %v8656_v7 }
0x124d   :  { %8098 = vmatmul.mubr.msk.bf16.vlgmr.msra.gmra.mxu1 %vm233_vm4, %v9672_v46 }
0x124e   :  { %8109 = vmatprep.mubr.msk.bf16.mxu1 %vm8657_vm3, %v8656_v7 }
0x1309   :  { %v3449_v53 = vpop.f32.mrf.mxu0 }
0x130a   :  { %v3504_v57 = vsel %vm233_vm4, %v3449_v53, -inf }
0x130b   :  { %v8093_v59 = vpop.f32.mrf.mxu0  ;;  %3505 = vmax.xlane.f32.xlu1 %v3504_v57 }
0x130d   :  { %v3452_v26 = vpop.f32.mrf.mxu0  ;;  %v3498_v61 = vpop.f32.mrf.mxu1 }
0x130e   :  { %v3507_v1 = vsel %vm233_vm4, %v3498_v61, -inf }
0x130f   :  { %v8094_v6 = vpop.f32.mrf.mxu0  ;;  %3508 = vmax.xlane.f32.xlu0 %v3507_v1  ;;  %v8099_v16 = vpop.f32.mrf.mxu1 }
0x1311   :  { %v3501_v13 = vpop.f32.mrf.mxu1 }
0x1313   :  { %v8100_v12 = vpop.f32.mrf.mxu1 }
0x131c   :  { %3576 = vrot.lane.b32.xlu1 %v9672_v46, %s8659_s30 }
0x1325   :  { %3528 = vrot.lane.b32.xlu0 %v9668_v42, %s8659_s30 }
0x1394   :  { %v3506_v20 = vpop.xlane.xlu1 %3505 }
0x1395   :  { %v3510_v14 = vsub.f32 %v3449_v53, %v3506_v20 }
0x1397   :  { %v3512_v15 = vmul.f32 1.442695, %v3510_v14 }
0x1398   :  { %v3577_v17 = vpop.permute.xlu1 %3576  ;;  %v3509_v18 = vpop.xlane.xlu0 %3508 }
0x1399   :  { %8593 = vpow2.f32 %v3512_v15  ;;  %v3582_v22 = vsel %vm358_vm5, %v3577_v17, 0  ;;  %v3511_v23 = vsub.f32 %v3498_v61, %v3509_v18 }
0x139a   :  { %8108 = vmatpush3.bf16.msra.mxu1 %v3582_v22 }
0x139b   :  { %v3514_v24 = vmul.f32 1.442695, %v3511_v23  ;;  %8119 = vmatprep.subr.bf16.mxu1 %v8656_v7 }
0x139c   :  { %v3529_v11 = vpop.permute.xlu0 %3528 }
0x139d   :  { %8595 = vpow2.f32 %v3514_v24  ;;  %v3534_v25 = vsel %vm358_vm5, %v3529_v11, 0 }
0x139e   :  { %8102 = vmatpush3.bf16.msra.mxu0 %v3534_v25 }
0x139f   :  { %8113 = vmatprep.subr.bf16.mxu0 %v8656_v7 }
0x13a6   :  { %v8594_v8 = vpop.eup %8593 }
0x13a7   :  { %v3516_v5 = vsel %vm233_vm4, %v8594_v8, 0.0 }
0x13a8   :  { %3517 = vadd.xlane.f32.xlu0 %v3516_v5 }
0x13aa   :  { %v8596_v9 = vpop.eup %8595 }
0x13ab   :  { %v3519_v50 = vsel %vm233_vm4, %v8596_v9, 0.0 }
0x13ac   :  { %3520 = vadd.xlane.f32.xlu1 %v3519_v50 }
0x13bd   :  { %3626 = vrot.lane.b32.xlu1 %v9668_v42, %s8660_s18 }
0x13be   :  { %3676 = vrot.lane.b32.xlu0 %v9672_v46, %s8660_s18  ;;  %s10582_s18 = smov 72  }
0x13c1   :  { %3624 = vrot.lane.b32.xlu1 %v9668_v42, %s8661_s19 }
0x13c2   :  { %3674 = vrot.lane.b32.xlu0 %v9672_v46, %s8661_s19  ;;  %s10583_s19 = smov 104  }
0x1431   :  { %v3518_v2 = vpop.xlane.xlu0 %3517 }
0x1432   :  { %8597 = vrcp.f32 %v3518_v2 }
0x1435   :  { %v3521_v51 = vpop.xlane.xlu1 %3520  ;;  %v3677_v35 = vpop.permute.xlu0 %3676 }
0x1436   :  { %8599 = vrcp.f32 %v3521_v51  ;;  %v3682_v39 = vsel %vm233_vm4, %v3677_v35, 0 }
0x1439   :  { %v3627_v30 = vpop.permute.xlu1 %3626  ;;  %v3675_v58 = vpop.permute.xlu0 %3674 }
0x143a   :  { %v3632_v56 = vsel %vm233_vm4, %v3627_v30, 0 }
0x143d   :  { %v3625_v31 = vpop.permute.xlu1 %3624 }
0x143f   :  { %v8598_v28 = vpop.eup %8597 }
0x1440   :  { %v3524_v29 = vmul.f32 %v8598_v28, %v8594_v8 }
0x1442   :  { %v3526_v32 = vpack.c.bf16 %v3524_v29, %v3524_v29 }
0x1443   :  { %v8600_v33 = vpop.eup %8599 }
0x1444   :  { %8104 = vmatmul.mubr.msk.bf16.vlgmr.msra.gmra.mxu0 %vm233_vm4, %v3526_v32  ;;  %v3525_v34 = vmul.f32 %v8600_v33, %v8596_v9 }
0x1445   :  { %8114 = vmatpush3.bf16.xpose.msra.mxu0 %v3632_v56  ;;  %8115 = vmatprep.mubr.msk.bf16.mxu0 %vm8657_vm3, %v8656_v7 }
0x1446   :  { %v3527_v36 = vpack.c.bf16 %v3525_v34, %v3525_v34  ;;  %8125 = vmatprep.subr.bf16.mxu0 %v8656_v7 }
0x1448   :  { %8110 = vmatmul.mubr.msk.bf16.vlgmr.msra.gmra.mxu1 %vm233_vm4, %v3527_v36 }
0x1449   :  { %8120 = vmatpush3.bf16.xpose.msra.mxu1 %v3682_v39  ;;  %8121 = vmatprep.mubr.msk.bf16.mxu1 %vm8657_vm3, %v8656_v7 }
0x144a   :  { %8131 = vmatprep.subr.bf16.mxu1 %v8656_v7 }
0x144c   :  { %8116 = vmatmul.mubr.msk.bf16.vlgmr.msra.gmra.mxu0 %vm233_vm4, %v3625_v31 }
0x144d   :  { %8127 = vmatprep.mubr.msk.bf16.mxu0 %vm8657_vm3, %v8656_v7 }
0x1450   :  { %8122 = vmatmul.mubr.msk.bf16.vlgmr.msra.gmra.mxu1 %vm233_vm4, %v3675_v58 }
0x1451   :  { %8133 = vmatprep.mubr.msk.bf16.mxu1 %vm8657_vm3, %v8656_v7 }
0x1504   :  { %v9724_v10 = vpop.f32.mrf.mxu0 }
0x1506   :  { %v8105_v43 = vpop.f32.mrf.mxu0 }
0x1508   :  { %v3573_v40 = vpop.f32.mrf.mxu0  ;;  %v9726_v19 = vpop.f32.mrf.mxu1 }
0x150a   :  { %v8106_v44 = vpop.f32.mrf.mxu0  ;;  %v8111_v45 = vpop.f32.mrf.mxu1 }
0x150c   :  { %v3621_v60 = vpop.f32.mrf.mxu1  ;;  %v3668_v62 = vpop.f32.mrf.mxu0 }
0x150d   :  { %v3724_v47 = vsel %vm233_vm4, %v3668_v62, -inf }
0x150e   :  { %3725 = vmax.xlane.f32.xlu1 %v3724_v47  ;;  %v8112_v48 = vpop.f32.mrf.mxu1  ;;  %v8117_v49 = vpop.f32.mrf.mxu0 }
0x1510   :  { %v3671_v52 = vpop.f32.mrf.mxu0  ;;  %v3718_v53 = vpop.f32.mrf.mxu1 }
0x1511   :  { %v3727_v57 = vsel %vm233_vm4, %v3718_v53, -inf }
0x1512   :  { %v8118_v59 = vpop.f32.mrf.mxu0  ;;  %3728 = vmax.xlane.f32.xlu0 %v3727_v57  ;;  %v8123_v26 = vpop.f32.mrf.mxu1 }
0x1514   :  { %v3721_v61 = vpop.f32.mrf.mxu1 }
0x1516   :  { %v8124_v1 = vpop.f32.mrf.mxu1 }
0x151f   :  { %3796 = vrot.lane.b32.xlu1 %v9672_v46, %s8662_s1 }
0x1528   :  { %3748 = vrot.lane.b32.xlu0 %v9668_v42, %s8662_s1  ;;  %s10584_s1 = smov 40  }
0x1597   :  { %v3726_v6 = vpop.xlane.xlu1 %3725 }
0x1598   :  { %v3730_v16 = vsub.f32 %v3668_v62, %v3726_v6 }
0x159a   :  { %v3732_v13 = vmul.f32 1.442695, %v3730_v16 }
0x159b   :  { %v3797_v12 = vpop.permute.xlu1 %3796  ;;  %v3729_v20 = vpop.xlane.xlu0 %3728 }
0x159c   :  { %8601 = vpow2.f32 %v3732_v13  ;;  %v3802_v14 = vsel %vm358_vm5, %v3797_v12, 0  ;;  %v3731_v15 = vsub.f32 %v3718_v53, %v3729_v20 }
0x159d   :  { %8132 = vmatpush3.bf16.msra.mxu1 %v3802_v14 }
0x159e   :  { %v3734_v17 = vmul.f32 1.442695, %v3731_v15  ;;  %8143 = vmatprep.subr.bf16.mxu1 %v8656_v7 }
0x159f   :  { %v3749_v18 = vpop.permute.xlu0 %3748 }
0x15a0   :  { %8603 = vpow2.f32 %v3734_v17  ;;  %v3754_v22 = vsel %vm358_vm5, %v3749_v18, 0 }
0x15a1   :  { %8126 = vmatpush3.bf16.msra.mxu0 %v3754_v22 }
0x15a2   :  { %8137 = vmatprep.subr.bf16.mxu0 %v8656_v7 }
0x15a9   :  { %v8602_v23 = vpop.eup %8601 }
0x15aa   :  { %v3736_v24 = vsel %vm233_vm4, %v8602_v23, 0.0 }
0x15ab   :  { %3737 = vadd.xlane.f32.xlu0 %v3736_v24 }
0x15ad   :  { %v8604_v11 = vpop.eup %8603 }
0x15ae   :  { %v3739_v25 = vsel %vm233_vm4, %v8604_v11, 0.0 }
0x15af   :  { %3740 = vadd.xlane.f32.xlu1 %v3739_v25 }
0x15c0   :  { %3846 = vrot.lane.b32.xlu1 %v9668_v42, %s8663_s20 }
0x15c1   :  { %3896 = vrot.lane.b32.xlu0 %v9672_v46, %s8663_s20  ;;  %s10585_s20 = smov 8  }
0x15c4   :  { %3844 = vrot.lane.b32.xlu1 %v9668_v42, %s8664_s21 }
0x15c5   :  { %3894 = vrot.lane.b32.xlu0 %v9672_v46, %s8664_s21  ;;  %s10586_s21 = smov 16  }
0x1634   :  { %v3738_v8 = vpop.xlane.xlu0 %3737 }
0x1635   :  { %8605 = vrcp.f32 %v3738_v8 }
0x1638   :  { %v3741_v5 = vpop.xlane.xlu1 %3740  ;;  %v3897_v32 = vpop.permute.xlu0 %3896 }
0x1639   :  { %8607 = vrcp.f32 %v3741_v5  ;;  %v3902_v56 = vsel %vm233_vm4, %v3897_v32, 0 }
0x163c   :  { %v3847_v2 = vpop.permute.xlu1 %3846  ;;  %v3895_v35 = vpop.permute.xlu0 %3894 }
0x163d   :  { %v3852_v29 = vsel %vm233_vm4, %v3847_v2, 0 }
0x1640   :  { %v3845_v34 = vpop.permute.xlu1 %3844 }
0x1642   :  { %v8606_v9 = vpop.eup %8605 }
0x1643   :  { %v3744_v50 = vmul.f32 %v8606_v9, %v8602_v23 }
0x1645   :  { %v3746_v51 = vpack.c.bf16 %v3744_v50, %v3744_v50 }
0x1646   :  { %v8608_v28 = vpop.eup %8607 }
0x1647   :  { %8128 = vmatmul.mubr.msk.bf16.vlgmr.msra.gmra.mxu0 %vm233_vm4, %v3746_v51  ;;  %v3745_v30 = vmul.f32 %v8608_v28, %v8604_v11 }
0x1648   :  { %8138 = vmatpush3.bf16.xpose.msra.mxu0 %v3852_v29  ;;  %8139 = vmatprep.mubr.msk.bf16.mxu0 %vm8657_vm3, %v8656_v7 }
0x1649   :  { %v3747_v33 = vpack.c.bf16 %v3745_v30, %v3745_v30  ;;  %8149 = vmatprep.subr.bf16.mxu0 %v8656_v7 }
0x164b   :  { %8134 = vmatmul.mubr.msk.bf16.vlgmr.msra.gmra.mxu1 %vm233_vm4, %v3747_v33 }
0x164c   :  { %8144 = vmatpush3.bf16.xpose.msra.mxu1 %v3902_v56  ;;  %8145 = vmatprep.mubr.msk.bf16.mxu1 %vm8657_vm3, %v8656_v7 }
0x164d   :  { %8155 = vmatprep.subr.bf16.mxu1 %v8656_v7 }
0x164f   :  { %8140 = vmatmul.mubr.msk.bf16.vlgmr.msra.gmra.mxu0 %vm233_vm4, %v3845_v34 }
0x1650   :  { %8151 = vmatprep.mubr.msk.bf16.mxu0 %vm8657_vm3, %v8656_v7 }
0x1653   :  { %8146 = vmatmul.mubr.msk.bf16.vlgmr.msra.gmra.mxu1 %vm233_vm4, %v3895_v35 }
0x1654   :  { %8157 = vmatprep.mubr.msk.bf16.mxu1 %vm8657_vm3, %v8656_v7 }
0x1707   :  { %v9764_v36 = vpop.f32.mrf.mxu0 }
0x1709   :  { %v8129_v39 = vpop.f32.mrf.mxu0 }
0x170b   :  { %v3793_v31 = vpop.f32.mrf.mxu0  ;;  %v9766_v58 = vpop.f32.mrf.mxu1 }
0x170c   :  { %v8228_v43 = vpack.i.bf16 %v9766_v58, %v9764_v36 }
0x170d   :  { %v8130_v40 = vpop.f32.mrf.mxu0  ;;  %v8135_v44 = vpop.f32.mrf.mxu1 }
0x170f   :  { %v3841_v45 = vpop.f32.mrf.mxu1  ;;  %v3888_v60 = vpop.f32.mrf.mxu0 }
0x1710   :  { %v3944_v62 = vsel %vm233_vm4, %v3888_v60, -inf }
0x1711   :  { %3945 = vmax.xlane.f32.xlu1 %v3944_v62  ;;  %v8136_v47 = vpop.f32.mrf.mxu1  ;;  %v8141_v48 = vpop.f32.mrf.mxu0 }
0x1713   :  { %v3891_v49 = vpop.f32.mrf.mxu0  ;;  %v3938_v52 = vpop.f32.mrf.mxu1 }
0x1714   :  { %v3947_v53 = vsel %vm233_vm4, %v3938_v52, -inf }
0x1715   :  { %v8142_v57 = vpop.f32.mrf.mxu0  ;;  %3948 = vmax.xlane.f32.xlu0 %v3947_v53  ;;  %v8147_v59 = vpop.f32.mrf.mxu1 }
0x1717   :  { %v3941_v26 = vpop.f32.mrf.mxu1 }
0x1719   :  { %v8148_v61 = vpop.f32.mrf.mxu1 }
0x1722   :  { %4016 = vrot.lane.b32.xlu1 %v9672_v46, %s10581_s4 }
0x172b   :  { %3968 = vrot.lane.b32.xlu0 %v9668_v42, %s10581_s4 }
0x179a   :  { %v3946_v1 = vpop.xlane.xlu1 %3945 }
0x179b   :  { %v3950_v6 = vsub.f32 %v3888_v60, %v3946_v1 }
0x179d   :  { %v3952_v16 = vmul.f32 1.442695, %v3950_v6 }
0x179e   :  { %v4017_v13 = vpop.permute.xlu1 %4016  ;;  %v3949_v12 = vpop.xlane.xlu0 %3948 }
0x179f   :  { %8609 = vpow2.f32 %v3952_v16  ;;  %v4022_v20 = vsel %vm358_vm5, %v4017_v13, 0  ;;  %v3951_v14 = vsub.f32 %v3938_v52, %v3949_v12 }
0x17a0   :  { %8156 = vmatpush3.bf16.msra.mxu1 %v4022_v20 }
0x17a1   :  { %v3954_v15 = vmul.f32 1.442695, %v3951_v14  ;;  %8167 = vmatprep.subr.bf16.mxu1 %v8656_v7 }
0x17a2   :  { %v3969_v17 = vpop.permute.xlu0 %3968 }
0x17a3   :  { %8611 = vpow2.f32 %v3954_v15  ;;  %v3974_v18 = vsel %vm358_vm5, %v3969_v17, 0 }
0x17a4   :  { %8150 = vmatpush3.bf16.msra.mxu0 %v3974_v18 }
0x17a5   :  { %8161 = vmatprep.subr.bf16.mxu0 %v8656_v7 }
0x17ac   :  { %v8610_v22 = vpop.eup %8609 }
0x17ad   :  { %v3956_v23 = vsel %vm233_vm4, %v8610_v22, 0.0 }
0x17ae   :  { %3957 = vadd.xlane.f32.xlu0 %v3956_v23 }
0x17b0   :  { %v8612_v24 = vpop.eup %8611 }
0x17b1   :  { %v3959_v11 = vsel %vm233_vm4, %v8612_v24, 0.0 }
0x17b2   :  { %3960 = vadd.xlane.f32.xlu1 %v3959_v11 }
0x17c3   :  { %4066 = vrot.lane.b32.xlu1 %v9668_v42, %s10582_s18 }
0x17c4   :  { %4116 = vrot.lane.b32.xlu0 %v9672_v46, %s10582_s18 }
0x17c7   :  { %4064 = vrot.lane.b32.xlu1 %v9668_v42, %s10583_s19 }
0x17c8   :  { %4114 = vrot.lane.b32.xlu0 %v9672_v46, %s10583_s19 }
0x1837   :  { %v3958_v25 = vpop.xlane.xlu0 %3957 }
0x1838   :  { %8613 = vrcp.f32 %v3958_v25 }
0x183b   :  { %v3961_v8 = vpop.xlane.xlu1 %3960  ;;  %v4117_v30 = vpop.permute.xlu0 %4116 }
0x183c   :  { %8615 = vrcp.f32 %v3961_v8  ;;  %v4122_v33 = vsel %vm233_vm4, %v4117_v30, 0 }
0x183f   :  { %v4067_v50 = vpop.permute.xlu1 %4066  ;;  %v4115_v34 = vpop.permute.xlu0 %4114 }
0x1840   :  { %v4072_v28 = vsel %vm233_vm4, %v4067_v50, 0 }
0x1843   :  { %v4065_v56 = vpop.permute.xlu1 %4064 }
0x1845   :  { %v8614_v5 = vpop.eup %8613 }
0x1846   :  { %v3964_v9 = vmul.f32 %v8614_v5, %v8610_v22 }
0x1848   :  { %v3966_v2 = vpack.c.bf16 %v3964_v9, %v3964_v9 }
0x1849   :  { %v8616_v51 = vpop.eup %8615 }
0x184a   :  { %8152 = vmatmul.mubr.msk.bf16.vlgmr.msra.gmra.mxu0 %vm233_vm4, %v3966_v2  ;;  %v3965_v29 = vmul.f32 %v8616_v51, %v8612_v24  ;;  %v8407_v2 = vld [vmem:[%s10548_s5 + $0x18] sm:$0xff]   ;;  %v8408_v51 = vld [vmem:[%s10548_s5 + $0x10] sm:$0xff]  }
0x184b   :  { %8162 = vmatpush3.bf16.xpose.msra.mxu0 %v4072_v28  ;;  %8163 = vmatprep.mubr.msk.bf16.mxu0 %vm8657_vm3, %v8656_v7 }
0x184c   :  { %v3967_v32 = vpack.c.bf16 %v3965_v29, %v3965_v29  ;;  %8173 = vmatprep.subr.bf16.mxu0 %v8656_v7 }
0x184e   :  { %8158 = vmatmul.mubr.msk.bf16.vlgmr.msra.gmra.mxu1 %vm233_vm4, %v3967_v32 }
0x184f   :  { %8168 = vmatpush3.bf16.xpose.msra.mxu1 %v4122_v33  ;;  %8169 = vmatprep.mubr.msk.bf16.mxu1 %vm8657_vm3, %v8656_v7 }
0x1850   :  { %8179 = vmatprep.subr.bf16.mxu1 %v8656_v7 }
0x1852   :  { %8164 = vmatmul.mubr.msk.bf16.vlgmr.msra.gmra.mxu0 %vm233_vm4, %v4065_v56 }
0x1853   :  { %8175 = vmatprep.mubr.msk.bf16.mxu0 %vm8657_vm3, %v8656_v7 }
0x1856   :  { %8170 = vmatmul.mubr.msk.bf16.vlgmr.msra.gmra.mxu1 %vm233_vm4, %v4115_v34 }
0x1857   :  { %8181 = vmatprep.mubr.msk.bf16.mxu1 %vm8657_vm3, %v8656_v7 }
0x190a   :  { %v4010_v35 = vpop.f32.mrf.mxu0 }
0x190c   :  { %v8153_v39 = vpop.f32.mrf.mxu0 }
0x190e   :  { %v4013_v31 = vpop.f32.mrf.mxu0  ;;  %v4058_v40 = vpop.f32.mrf.mxu1 }
0x190f   :  { %v8233_v44 = vpack.i.bf16 %v4058_v40, %v4010_v35 }
0x1910   :  { %v8154_v45 = vpop.f32.mrf.mxu0  ;;  %v8159_v60 = vpop.f32.mrf.mxu1 }
0x1912   :  { %v4061_v62 = vpop.f32.mrf.mxu1  ;;  %v4108_v47 = vpop.f32.mrf.mxu0 }
0x1913   :  { %v4164_v48 = vsel %vm233_vm4, %v4108_v47, -inf }
0x1914   :  { %4165 = vmax.xlane.f32.xlu1 %v4164_v48  ;;  %v8160_v49 = vpop.f32.mrf.mxu1  ;;  %v8165_v52 = vpop.f32.mrf.mxu0 }
0x1916   :  { %v4111_v53 = vpop.f32.mrf.mxu0  ;;  %v4158_v57 = vpop.f32.mrf.mxu1 }
0x1917   :  { %v4167_v59 = vsel %vm233_vm4, %v4158_v57, -inf }
0x1918   :  { %v8166_v26 = vpop.f32.mrf.mxu0  ;;  %4168 = vmax.xlane.f32.xlu0 %v4167_v59  ;;  %v8171_v61 = vpop.f32.mrf.mxu1 }
0x191a   :  { %v4161_v1 = vpop.f32.mrf.mxu1 }
0x191c   :  { %v8172_v6 = vpop.f32.mrf.mxu1 }
0x199d   :  { %v4166_v16 = vpop.xlane.xlu1 %4165 }
0x199e   :  { %v4170_v13 = vsub.f32 %v4108_v47, %v4166_v16 }
0x19a0   :  { %v4172_v12 = vmul.f32 1.442695, %v4170_v13 }
0x19a1   :  { %v4169_v20 = vpop.xlane.xlu0 %4168 }
0x19a2   :  { %8617 = vpow2.f32 %v4172_v12  ;;  %v4171_v14 = vsub.f32 %v4158_v57, %v4169_v20 }
0x19a4   :  { %v4174_v15 = vmul.f32 1.442695, %v4171_v14 }
0x19a6   :  { %8619 = vpow2.f32 %v4174_v15 }
0x19af   :  { %v8618_v17 = vpop.eup %8617 }
0x19b0   :  { %v4176_v18 = vsel %vm233_vm4, %v8618_v17, 0.0 }
0x19b1   :  { %4177 = vadd.xlane.f32.xlu0 %v4176_v18 }
0x19b3   :  { %v8620_v22 = vpop.eup %8619 }
0x19b4   :  { %v4179_v23 = vsel %vm233_vm4, %v8620_v22, 0.0 }
0x19b5   :  { %4180 = vadd.xlane.f32.xlu1 %v4179_v23 }
0x19c6   :  { %4236 = vrot.lane.b32.xlu1 %v9672_v46, %s10584_s1 }
0x19c7   :  { %4188 = vrot.lane.b32.xlu0 %v9668_v42, %s10584_s1 }
0x19ca   :  { %8229 = vrot.lane.b32.xlu1 %v8228_v43, %s10585_s20 }
0x19cb   :  { %8234 = vrot.lane.b32.xlu0 %v8233_v44, %s10586_s21 }
0x1a3a   :  { %v4178_v24 = vpop.xlane.xlu0 %4177 }
0x1a3b   :  { %8621 = vrcp.f32 %v4178_v24 }
0x1a3e   :  { %v4181_v11 = vpop.xlane.xlu1 %4180  ;;  %v4189_v25 = vpop.permute.xlu0 %4188 }
0x1a3f   :  { %8623 = vrcp.f32 %v4181_v11  ;;  %v4194_v8 = vsel %vm358_vm5, %v4189_v25, 0 }
0x1a40   :  { %8174 = vmatpush3.bf16.msra.mxu0 %v4194_v8 }
0x1a41   :  { %8185 = vmatprep.subr.bf16.mxu0 %v8656_v7 }
0x1a42   :  { %v4237_v46 = vpop.permute.xlu1 %4236 }
0x1a43   :  { %v4242_v42 = vsel %vm358_vm5, %v4237_v46, 0 }
0x1a44   :  { %8180 = vmatpush3.bf16.msra.mxu1 %v4242_v42 }
0x1a46   :  { %v8230_v31 = vpop.permute.xlu1 %8229 }
0x1a47   :  { %v8232_v40 = vunpack.i.h.bf16 %v8230_v31  ;;  %v8231_v44 = vunpack.i.l.bf16 %v8230_v31  ;;  %v7040_v31 = vld [vmem:[%s10550_s7 + $0x198] sm:$0xff] }
0x1a48   :  { %v8622_v5 = vpop.eup %8621 }
0x1a49   :  { %v4184_v9 = vmul.f32 %v8622_v5, %v8618_v17  ;;  %v4309_v45 = vsel %vm233_vm4, %v9726_v19, %v8232_v40  ;;  %v4308_v60 = vsel %vm233_vm4, %v9724_v10, %v8231_v44  ;;  %v7013_v10 = vld [vmem:[%s10549_s6 + $0x1] ss:$0 sm:$0xff] }
0x1a4a   :  { %v7045_v5 = vld [vmem:[%s10550_s7 + $0x1c0] sm:$0xff] }
0x1a4b   :  { %v4186_v36 = vpack.c.bf16 %v4184_v9, %v4184_v9  ;;  %v7038_v9 = vld [vmem:[%s10550_s7 + $0x188] sm:$0xff] }
0x1a4c   :  { %v8624_v58 = vpop.eup %8623 }
0x1a4d   :  { %8176 = vmatmul.mubr.msk.bf16.vlgmr.msra.gmra.mxu0 %vm233_vm4, %v4186_v36  ;;  %v4185_v43 = vmul.f32 %v8624_v58, %v8620_v22  ;;  %v7046_v58 = vld [vmem:[%s10550_s7 + $0x1c8] sm:$0xff] }
0x1a4e   :  { %8189 = vmatprep.mubr.msk.bf16.mxu0 %vm8657_vm3, %v8656_v7  ;;  %8186 = vmatpush3.bf16.msra.mxu0 %v8407_v2  ;;  %v7074_v2 = vcombine.high %v7038_v9, %v7046_v58 }
0x1a4f   :  { %v4187_v50 = vpack.c.bf16 %v4185_v43, %v4185_v43  ;;  %8187 = vmatprep.subr.bf16.mxu0 %v8656_v7  ;;  %v8235_v7 = vpop.permute.xlu0 %8234 }
0x1a50   :  { %v8237_v62 = vunpack.i.h.bf16 %v8235_v7  ;;  %v8236_v47 = vunpack.i.l.bf16 %v8235_v7  ;;  %v7048_v7 = vld [vmem:[%s10550_s7 + $0x1d8] sm:$0xff] }
0x1a51   :  { %8182 = vmatmul.mubr.msk.bf16.vlgmr.msra.gmra.mxu1 %vm233_vm4, %v4187_v50  ;;  %v7073_v50 = vcombine.low %v7038_v9, %v7046_v58  ;;  %v7026_v9 = vld [vmem:[%s10550_s7 + $0x128] sm:$0xff] }
0x1a52   :  { %4746 = vmatprep.mubr.bf16.mxu1 %v8655_v3  ;;  %8188 = vmatpush3.bf16.msra.mxu0 %v8408_v51  ;;  %v4310_v53 = vsel %vm1136_vm6, %v4308_v60, %v8236_v47  ;;  %v4311_v57 = vsel %vm1136_vm6, %v4309_v45, %v8237_v62  ;;  %v7021_v51 = vld [vmem:[%s10550_s7 + $0x100] sm:$0xff]  ;;  %v7077_v45 = vcombine.low %v7040_v31, %v7048_v7 }
0x1a53   :  { %4769 = vmatprep.subr.bf16.mxu0 %v7074_v2  ;;  %v7078_v60 = vcombine.high %v7040_v31, %v7048_v7  ;;  %v7028_v31 = vld [vmem:[%s10550_s7 + $0x138] sm:$0xff] }
0x1b0d   :  { %v4230_v28 = vpop.f32.mrf.mxu0 }
0x1b0f   :  { %v8177_v29 = vpop.f32.mrf.mxu0 }
0x1b10   :  { %v7022_v29 = vld [vmem:[%s10550_s7 + $0x108] sm:$0xff] }
0x1b11   :  { %v4233_v30 = vpop.f32.mrf.mxu0  ;;  %v4278_v32 = vpop.f32.mrf.mxu1 }
0x1b12   :  { %v8238_v33 = vpack.i.bf16 %v4278_v32, %v4230_v28  ;;  %v7029_v28 = vld [vmem:[%s10550_s7 + $0x140] sm:$0xff]  ;;  %v7030_v32 = vld [vmem:[%s10550_s7 + $0x148] sm:$0xff] }
0x1b13   :  { %v8178_v56 = vpop.f32.mrf.mxu0  ;;  %v8183_v34 = vpop.f32.mrf.mxu1  ;;  %v7056_v30 = vcombine.high %v7021_v51, %v7029_v28 }
0x1b14   :  { %8239 = vrot.lane.b32.xlu1 %v8238_v33, %s10587_s0  ;;  %v7055_v33 = vcombine.low %v7021_v51, %v7029_v28  ;;  %v7057_v56 = vcombine.low %v7022_v29, %v7030_v32  ;;  %v7058_v34 = vcombine.high %v7022_v29, %v7030_v32  ;;  %v7043_v51 = vld [vmem:[%s10550_s7 + $0x1b0] sm:$0xff]  ;;  %v7044_v29 = vld [vmem:[%s10550_s7 + $0x1b8] sm:$0xff] }
0x1b15   :  { %v4281_v35 = vpop.f32.mrf.mxu1  ;;  %v7051_v28 = vld [vmem:[%s10550_s7 + $0x1f0] sm:$0xff] }
0x1b16   :  { %v7039_v35 = vld [vmem:[%s10550_s7 + $0x190] sm:$0xff] }
0x1b17   :  { %v8184_v39 = vpop.f32.mrf.mxu1 }
0x1b18   :  { %v7047_v39 = vld [vmem:[%s10550_s7 + $0x1d0] sm:$0xff] }
0x1b19   :  { %v7075_v40 = vcombine.low %v7039_v35, %v7047_v39  ;;  %v7076_v44 = vcombine.high %v7039_v35, %v7047_v39  ;;  %v7027_v35 = vld [vmem:[%s10550_s7 + $0x130] sm:$0xff] }
0x1b1a   :  { %v7035_v39 = vld [vmem:[%s10550_s7 + $0x170] sm:$0xff] }
0x1b86   :  { %v8240_v48 = vpop.permute.xlu1 %8239 }
0x1b87   :  { %v8242_v49 = vunpack.i.h.bf16 %v8240_v48  ;;  %v8241_v52 = vunpack.i.l.bf16 %v8240_v48 }
0x1b89   :  { %v4313_v59 = vsel %vm1139_vm7, %v4311_v57, %v8242_v49  ;;  %v4312_v26 = vsel %vm1139_vm7, %v4310_v53, %v8241_v52 }
0x1b8a   :  { %v4314_v61 = vpack.c.bf16 %v4313_v59, %v4312_v26  ;;  %v7019_v26 = vld [vmem:[%s10554_s11 + $0x1] ss:$0 sm:$0xff]  ;;  %s8672_s11 = smov 32  }
0x1b8c   :  { %8190 = vmatmul.mubr.msk.bf16.vlgmr.msra.gmra.mxu0 %vm78_vm0, %v4314_v61 }
0x1b8d   :  { %4789 = vmatprep.mubr.bf16.mxu0 %v8655_v3  ;;  %4770 = vmatpush1.bf16.msra.mxu0 %v7073_v50 }
0x1b8e   :  { %4771 = vmatprep.subr.bf16.mxu0 %v7058_v34 }
0x1b91   :  { %4772 = vmatpush1.bf16.msra.mxu0 %v7057_v56  ;;  %v7084_v56 = vcombine.high %v7043_v51, %v7051_v28 }
0x1b92   :  { %4855 = vmatprep.subr.bf16.mxu0 %v7078_v60 }
0x1c4c   :  { %v4377_v19 = vpop.f32.mrf.mxu0 }
0x1c4d   :  { %v4378_v1 = vadd.f32 %v7013_v10, %v4377_v19 }
0x1c4e   :  { %v8191_v6 = vpop.f32.mrf.mxu0 }
0x1c4f   :  { %v4384_v16 = vadd.f32 %v4378_v1, %v9656_v0  ;;  %v7020_v1 = vld [vmem:[%s10555_s12 + $0x1] ss:$0 sm:$0xff] }
0x1c50   :  { %v4380_v13 = vpop.f32.mrf.mxu0 }
0x1c51   :  { %v4381_v12 = vadd.f32 %v7013_v10, %v4380_v13  ;;  %v4390_v20 = vsel %vm78_vm0, %v4384_v16, 0.0  ;;  %v7031_v13 = vld [vmem:[%s10550_s7 + $0x150] sm:$0xff] }
0x1c52   :  { %4391 = vadd.xlane.f32.xlu0 %v4390_v20  ;;  %v8192_v14 = vpop.f32.mrf.mxu0  ;;  %v7032_v20 = vld [vmem:[%s10550_s7 + $0x158] sm:$0xff] }
0x1c53   :  { %v4385_v15 = vadd.f32 %v4381_v12, %v9658_v41  ;;  %v7037_v41 = vld [vmem:[%s10550_s7 + $0x180] sm:$0xff]  ;;  %v7024_v12 = vld [vmem:[%s10550_s7 + $0x118] sm:$0xff] }
0x1c54   :  { %v7072_v36 = vcombine.high %v7037_v41, %v7045_v5  ;;  %v7071_v43 = vcombine.low %v7037_v41, %v7045_v5  ;;  %v7025_v41 = vld [vmem:[%s10550_s7 + $0x120] sm:$0xff] }
0x1c55   :  { %v4393_v17 = vsel %vm78_vm0, %v4385_v15, 0.0  ;;  %v7033_v5 = vld [vmem:[%s10550_s7 + $0x160] sm:$0xff] }
0x1c56   :  { %4394 = vadd.xlane.f32.xlu1 %v4393_v17  ;;  %4726 = vmatprep.subr.bf16.mxu1 %v7072_v36  ;;  %v7034_v36 = vld [vmem:[%s10550_s7 + $0x168] sm:$0xff]  ;;  %v7064_v50 = vcombine.high %v7025_v41, %v7033_v5  ;;  %v7063_v32 = vcombine.low %v7025_v41, %v7033_v5  ;;  %v8437_v41 = vld [vmem:[%s10552_s9 + $0x440] sm:$0xff]  }
0x1c57   :  { %4727 = vmatpush1.bf16.msra.mxu1 %v7071_v43  ;;  %v7066_v2 = vcombine.high %v7026_v9, %v7034_v36  ;;  %v8438_v5 = vld [vmem:[%s10552_s9 + $0x4c0] sm:$0xff]  }
0x1c58   :  { %4728 = vmatprep.subr.bf16.mxu1 %v7056_v30  ;;  %v7052_v30 = vld [vmem:[%s10550_s7 + $0x1f8] sm:$0xff] }
0x1c59   :  { %v7086_v34 = vcombine.high %v7044_v29, %v7052_v30  ;;  %v7085_v7 = vcombine.low %v7044_v29, %v7052_v30 }
0x1c5b   :  { %4729 = vmatpush1.bf16.msra.mxu1 %v7055_v33  ;;  %v7065_v33 = vcombine.low %v7026_v9, %v7034_v36  ;;  %v8439_v9 = vld [vmem:[%s10552_s9 + $0x400] sm:$0xff]  }
0x1c5c   :  { %4812 = vmatprep.subr.bf16.mxu1 %v7076_v44  ;;  %v7083_v44 = vcombine.low %v7043_v51, %v7051_v28  ;;  %v8440_v36 = vld [vmem:[%s10552_s9 + $0x480] sm:$0xff]  }
0x1cdb   :  { %v4392_v18 = vpop.xlane.xlu0 %4391 }
0x1cdc   :  { %v4396_v22 = vmul.f32 0.03125, %v4392_v18 }
0x1cde   :  { %v4398_v23 = vsub.f32 %v4384_v16, %v4396_v22  ;;  %v7023_v16 = vld [vmem:[%s10550_s7 + $0x110] sm:$0xff]  ;;  %v7062_v22 = vcombine.high %v7024_v12, %v7032_v20 }
0x1cdf   :  { %v4395_v24 = vpop.xlane.xlu1 %4394  ;;  %v7060_v18 = vcombine.high %v7023_v16, %v7031_v13 }
0x1ce0   :  { %v4397_v11 = vmul.f32 0.03125, %v4395_v24  ;;  %v4400_v25 = vmul.f32 %v4398_v23, %v4398_v23  ;;  %v7049_v24 = vld [vmem:[%s10550_s7 + $0x1e0] sm:$0xff] }
0x1ce2   :  { %v4399_v8 = vsub.f32 %v4385_v15, %v4397_v11  ;;  %v4402_v0 = vsel %vm78_vm0, %v4400_v25, 0.0  ;;  %v7042_v11 = vld [vmem:[%s10550_s7 + $0x1a8] sm:$0xff] }
0x1ce3   :  { %4403 = vadd.xlane.f32.xlu0 %v4402_v0  ;;  %v7050_v25 = vld [vmem:[%s10550_s7 + $0x1e8] sm:$0xff]  ;;  %v7061_v0 = vcombine.low %v7024_v12, %v7032_v20  ;;  %v8424_v12 = vld [vmem:[%s10552_s9 + $0x4a0] sm:$0xff]   ;;  %v8425_v20 = vld [vmem:[%s10552_s9 + $0x458] sm:$0xff]  }
0x1ce4   :  { %v4401_v46 = vmul.f32 %v4399_v8, %v4399_v8  ;;  %v7081_v43 = vcombine.low %v7042_v11, %v7050_v25 }
0x1ce6   :  { %v4405_v42 = vsel %vm78_vm0, %v4401_v46, 0.0 }
0x1ce7   :  { %4406 = vadd.xlane.f32.xlu0 %v4405_v42  ;;  %v7082_v42 = vcombine.high %v7042_v11, %v7050_v25  ;;  %v8431_v11 = vld [vmem:[%s10552_s9 + $0x410] sm:$0xff]  }
0x1ce8   :  { %v8432_v25 = vld [vmem:[%s10552_s9 + $0x490] sm:$0xff]  }
0x1d6c   :  { %v4404_v62 = vpop.xlane.xlu0 %4403 }
0x1d6d   :  { %v4408_v47 = vmul.f32 0.03125, %v4404_v62  ;;  %v7067_v62 = vcombine.low %v7027_v35, %v7035_v39 }
0x1d6f   :  { %v4410_v48 = vadd.f32 1e-05, %v4408_v47 }
0x1d70   :  { %v4407_v49 = vpop.xlane.xlu0 %4406 }
0x1d71   :  { %8625 = vrsqrt.f32 %v4410_v48  ;;  %v4409_v52 = vmul.f32 0.03125, %v4407_v49  ;;  %v8409_v48 = vld [vmem:[%s10552_s9 + $0x478] sm:$0xff]  }
0x1d72   :  { %v8410_v49 = vld [vmem:[%s10552_s9 + $0x4f8] sm:$0xff]  }
0x1d73   :  { %v4411_v53 = vadd.f32 1e-05, %v4409_v52  ;;  %v8411_v52 = vld [vmem:[%s10552_s9 + $0x438] sm:$0xff]  }
0x1d75   :  { %8627 = vrsqrt.f32 %v4411_v53  ;;  %v8412_v53 = vld [vmem:[%s10552_s9 + $0x4b8] sm:$0xff]  }
0x1d7e   :  { %v8626_v57 = vpop.eup %8625 }
0x1d7f   :  { %v4414_v59 = vmul.f32 %v8626_v57, %v4398_v23  ;;  %v7041_v23 = vld [vmem:[%s10550_s7 + $0x1a0] sm:$0xff]  ;;  %v8413_v57 = vld [vmem:[%s10552_s9 + $0x470] sm:$0xff]  }
0x1d80   :  { %v7080_v46 = vcombine.high %v7041_v23, %v7049_v24  ;;  %v7079_v58 = vcombine.low %v7041_v23, %v7049_v24  ;;  %v8429_v23 = vld [vmem:[%s10552_s9 + $0x450] sm:$0xff]  }
0x1d81   :  { %v4422_v10 = vmul.f32 %v7019_v26, %v4414_v59  ;;  %v8415_v59 = vld [vmem:[%s10552_s9 + $0x430] sm:$0xff]  }
0x1d82   :  { %v8628_v61 = vpop.eup %8627  ;;  %v8430_v24 = vld [vmem:[%s10552_s9 + $0x4d0] sm:$0xff]  }
0x1d83   :  { %v4415_v19 = vmul.f32 %v8628_v61, %v4399_v8  ;;  %v9908_v14 = vadd.f32 %v7020_v1, %v4422_v10  ;;  %v7059_v8 = vcombine.low %v7023_v16, %v7031_v13  ;;  %v8417_v61 = vld [vmem:[%s10552_s9 + $0x468] sm:$0xff]   ;;  %v8422_v16 = vld [vmem:[%s10552_s9 + $0x4e0] sm:$0xff]  }
0x1d84   :  { %v8418_v10 = vld [vmem:[%s10552_s9 + $0x4e8] sm:$0xff]   ;;  %v8423_v13 = vld [vmem:[%s10552_s9 + $0x420] sm:$0xff]  }
0x1d85   :  { %v4423_v6 = vmul.f32 %v7019_v26, %v4415_v19  ;;  %v8416_v26 = vld [vmem:[%s10552_s9 + $0x4b0] sm:$0xff]   ;;  %v8419_v19 = vld [vmem:[%s10552_s9 + $0x428] sm:$0xff]  }
0x1d87   :  { %v9910_v15 = vadd.f32 %v7020_v1, %v4423_v6  ;;  %v8420_v1 = vld [vmem:[%s10552_s9 + $0x4a8] sm:$0xff]   ;;  %v8421_v6 = vld [vmem:[%s10552_s9 + $0x460] sm:$0xff]  }
0x1d89   :  { %v9914_v17 = vpack.c.bf16 %v9910_v15, %v9908_v14 }
0x1d8b   :  { %7087 = vmatmul.mubr.msk.bf16.vlgmr.msra.gmra.mxu1 %vm78_vm0, %v9914_v17  ;;  %7088 = vmatmul.mubr.msk.bf16.vlgmr.msra.gmra.mxu0 %vm78_vm0, %v9914_v17 }
0x1d8c   :  { %4813 = vmatpush1.bf16.msra.mxu1 %v7075_v40  ;;  %4856 = vmatpush1.bf16.msra.mxu0 %v7077_v45  ;;  %v7036_v40 = vld [vmem:[%s10550_s7 + $0x178] sm:$0xff]  ;;  %v7068_v45 = vcombine.high %v7027_v35, %v7035_v39 }
0x1d8d   :  { %4814 = vmatprep.subr.bf16.mxu1 %v7060_v18  ;;  %4857 = vmatprep.subr.bf16.mxu0 %v7062_v22  ;;  %v7070_v60 = vcombine.high %v7028_v31, %v7036_v40  ;;  %v7069_v47 = vcombine.low %v7028_v31, %v7036_v40  ;;  %v8427_v18 = vld [vmem:[%s10552_s9 + $0x418] sm:$0xff]  }
0x1d8e   :  { %4832 = vmatprep.mubr.bf16.mxu1 %v8655_v3  ;;  %4875 = vmatprep.mubr.bf16.mxu0 %v8655_v3  ;;  %v8428_v22 = vld [vmem:[%s10552_s9 + $0x498] sm:$0xff]  }
0x1d90   :  { %4815 = vmatpush1.bf16.msra.mxu1 %v7059_v8  ;;  %4858 = vmatpush1.bf16.msra.mxu0 %v7061_v0  ;;  %v8433_v8 = vld [vmem:[%s10552_s9 + $0x448] sm:$0xff]  }
0x1d91   :  { %4898 = vmatprep.subr.bf16.mxu1 %v7080_v46  ;;  %4941 = vmatprep.subr.bf16.mxu0 %v7082_v42  ;;  %v8434_v0 = vld [vmem:[%s10552_s9 + $0x4c8] sm:$0xff]  }
0x1d92   :  { %v8435_v46 = vld [vmem:[%s10552_s9 + $0x408] sm:$0xff]  }
0x1d93   :  { %7089 = vmatmul.mubr.msk.bf16.vlgmr.msra.gmra.mxu1 %vm78_vm0, %v9914_v17  ;;  %7090 = vmatmul.mubr.msk.bf16.vlgmr.msra.gmra.mxu0 %vm78_vm0, %v9914_v17  ;;  %v8436_v42 = vld [vmem:[%s10552_s9 + $0x488] sm:$0xff]  }
0x1d94   :  { %4899 = vmatpush1.bf16.msra.mxu1 %v7079_v58  ;;  %4942 = vmatpush1.bf16.msra.mxu0 %v7081_v43  ;;  %v8441_v58 = vld [vmem:[%s10552_s9 + $0x578] sm:$0xff]  }
0x1d95   :  { %4900 = vmatprep.subr.bf16.mxu1 %v7064_v50  ;;  %4943 = vmatprep.subr.bf16.mxu0 %v7066_v2  ;;  %v8442_v43 = vld [vmem:[%s10552_s9 + $0x5f8] sm:$0xff]   ;;  %v10091_v50 = vld [vmem:[%s10551_s8 + $0x10] sm:$0xff] }
0x1d96   :  { %4918 = vmatprep.mubr.bf16.mxu1 %v8655_v3  ;;  %4961 = vmatprep.mubr.bf16.mxu0 %v8655_v3  ;;  %v4478_v28 = vrot.slane %v10091_v50, %v9244_v27  ;;  %v4486_v29 = vrot.slane %v10091_v50, %v9247_v21  ;;  %v4474_v30 = vrot.slane %v10091_v50, %v9250_v63 }
0x1d98   :  { %4901 = vmatpush1.bf16.msra.mxu1 %v7063_v32  ;;  %4944 = vmatpush1.bf16.msra.mxu0 %v7065_v33  ;;  %v4482_v32 = vrot.slane %v10091_v50, %v9253_v4 }
0x1d99   :  { %4984 = vmatprep.subr.bf16.mxu1 %v7084_v56  ;;  %5027 = vmatprep.subr.bf16.mxu0 %v7086_v34 }
0x1d9b   :  { %7091 = vmatmul.mubr.msk.bf16.vlgmr.msra.gmra.mxu1 %vm78_vm0, %v9914_v17  ;;  %7092 = vmatmul.mubr.msk.bf16.vlgmr.msra.gmra.mxu0 %vm78_vm0, %v9914_v17 }
0x1d9c   :  { %4985 = vmatpush1.bf16.msra.mxu1 %v7083_v44  ;;  %5028 = vmatpush1.bf16.msra.mxu0 %v7085_v7 }
0x1d9d   :  { %4986 = vmatprep.subr.bf16.mxu1 %v7068_v45  ;;  %5029 = vmatprep.subr.bf16.mxu0 %v7070_v60 }
0x1d9e   :  { %5004 = vmatprep.mubr.bf16.mxu1 %v8655_v3  ;;  %5047 = vmatprep.mubr.bf16.mxu0 %v8655_v3  ;;  %v8414_v3 = vld [vmem:[%s10552_s9 + $0x4f0] sm:$0xff]  }
0x1da0   :  { %4987 = vmatpush1.bf16.msra.mxu1 %v7067_v62  ;;  %5030 = vmatpush1.bf16.msra.mxu0 %v7069_v47 }
0x1da1   :  { %7760 = vmatprep.subr.bf16.mxu1 %v8409_v48  ;;  %7782 = vmatprep.subr.bf16.mxu0 %v8410_v49 }
0x1da3   :  { %7093 = vmatmul.mubr.msk.bf16.vlgmr.msra.gmra.mxu1 %vm78_vm0, %v9914_v17  ;;  %7094 = vmatmul.mubr.msk.bf16.vlgmr.msra.gmra.mxu0 %vm78_vm0, %v9914_v17  ;;  %v8426_v17 = vld [vmem:[%s10552_s9 + $0x4d8] sm:$0xff]  }
0x1da4   :  { %7761 = vmatpush3.bf16.msra.mxu1 %v8411_v52  ;;  %7783 = vmatpush3.bf16.msra.mxu0 %v8412_v53 }
0x1da5   :  { %7762 = vmatprep.subr.bf16.mxu1 %v8413_v57  ;;  %7784 = vmatprep.subr.bf16.mxu0 %v8414_v3  ;;  %v4494_v3 = vrot.slane %v10091_v50, %v9269_v37 }
0x1da8   :  { %7763 = vmatpush3.bf16.msra.mxu1 %v8415_v59  ;;  %7785 = vmatpush3.bf16.msra.mxu0 %v8416_v26  ;;  %v4502_v59 = vrot.slane %v10091_v50, %v9272_v38 }
0x1da9   :  { %7764 = vmatprep.subr.bf16.mxu1 %v8417_v61  ;;  %7786 = vmatprep.subr.bf16.mxu0 %v8418_v10 }
0x1dac   :  { %7765 = vmatpush3.bf16.msra.mxu1 %v8419_v19  ;;  %7787 = vmatpush3.bf16.msra.mxu0 %v8420_v1 }
0x1dad   :  { %7766 = vmatprep.subr.bf16.mxu1 %v8421_v6  ;;  %7788 = vmatprep.subr.bf16.mxu0 %v8422_v16 }
0x1db0   :  { %7767 = vmatpush3.bf16.msra.mxu1 %v8423_v13  ;;  %7789 = vmatpush3.bf16.msra.mxu0 %v8424_v12 }
0x1db1   :  { %7768 = vmatprep.subr.bf16.mxu1 %v8425_v20  ;;  %7790 = vmatprep.subr.bf16.mxu0 %v8426_v17  ;;  %v8443_v17 = vld [vmem:[%s10552_s9 + $0x538] sm:$0xff]  }
0x1db4   :  { %7769 = vmatpush3.bf16.msra.mxu1 %v8427_v18  ;;  %7791 = vmatpush3.bf16.msra.mxu0 %v8428_v22  ;;  %v8444_v18 = vld [vmem:[%s10552_s9 + $0x5b8] sm:$0xff]  }
0x1db5   :  { %7770 = vmatprep.subr.bf16.mxu1 %v8429_v23  ;;  %7792 = vmatprep.subr.bf16.mxu0 %v8430_v24 }
0x1db8   :  { %7771 = vmatpush3.bf16.msra.mxu1 %v8431_v11  ;;  %7793 = vmatpush3.bf16.msra.mxu0 %v8432_v25  ;;  %v8445_v25 = vld [vmem:[%s10552_s9 + $0x570] sm:$0xff]  }
0x1db9   :  { %7772 = vmatprep.subr.bf16.mxu1 %v8433_v8  ;;  %7794 = vmatprep.subr.bf16.mxu0 %v8434_v0  ;;  %v8446_v8 = vld [vmem:[%s10552_s9 + $0x5f0] sm:$0xff]  }
0x1dbc   :  { %7773 = vmatpush3.bf16.msra.mxu1 %v8435_v46  ;;  %7795 = vmatpush3.bf16.msra.mxu0 %v8436_v42 }
0x1dbd   :  { %7774 = vmatprep.subr.bf16.mxu1 %v8437_v41  ;;  %7796 = vmatprep.subr.bf16.mxu0 %v8438_v5 }
0x1dc0   :  { %7775 = vmatpush3.bf16.msra.mxu1 %v8439_v9  ;;  %7797 = vmatpush3.bf16.msra.mxu0 %v8440_v36  ;;  %v8447_v36 = vld [vmem:[%s10552_s9 + $0x530] sm:$0xff]  }
0x1dc1   :  { %7804 = vmatprep.subr.bf16.mxu1 %v8441_v58  ;;  %7826 = vmatprep.subr.bf16.mxu0 %v8442_v43  ;;  %v8448_v58 = vld [vmem:[%s10552_s9 + $0x5b0] sm:$0xff]   ;;  %v8449_v43 = vld [vmem:[%s10552_s9 + $0x568] sm:$0xff]  }
0x1e4b   :  { %v4748_v2 = vpop.f32.mrf.mxu1  ;;  %v4791_v51 = vpop.f32.mrf.mxu0 }
0x1e4c   :  { %v4749_v7 = vadd.f32 %v4748_v2, %v4474_v30  ;;  %v4792_v45 = vadd.f32 %v4791_v51, %v4482_v32 }
0x1e4d   :  { %v4750_v33 = vpop.f32.mrf.mxu1  ;;  %v4793_v56 = vpop.f32.mrf.mxu0 }
0x1e4e   :  { %v4751_v39 = vadd.f32 %v4750_v33, %v4478_v28  ;;  %v4794_v31 = vadd.f32 %v4793_v56, %v4486_v29  ;;  %v5058_v1 = vmax.f32 %v4749_v7, 0.0  ;;  %v5060_v6 = vmax.f32 %v4792_v45, 0.0  ;;  %v8451_v56 = vld [vmem:[%s10552_s9 + $0x528] sm:$0xff]   ;;  %v8456_v7 = vld [vmem:[%s10552_s9 + $0x5a0] sm:$0xff]   ;;  %v8457_v45 = vld [vmem:[%s10552_s9 + $0x558] sm:$0xff]  }
0x1e4f   :  { %v4752_v34 = vpop.f32.mrf.mxu1  ;;  %v4795_v35 = vpop.f32.mrf.mxu0 }
0x1e50   :  { %v4753_v40 = vadd.f32 %v4752_v34, %v4474_v30  ;;  %v4796_v44 = vadd.f32 %v4795_v35, %v4482_v32  ;;  %v5059_v26 = vmax.f32 %v4751_v39, 0.0  ;;  %v5061_v61 = vmax.f32 %v4794_v31, 0.0  ;;  %v8450_v30 = vld [vmem:[%s10552_s9 + $0x5e8] sm:$0xff]   ;;  %v8453_v35 = vld [vmem:[%s10552_s9 + $0x560] sm:$0xff]  }
0x1e51   :  { %v4754_v60 = vpop.f32.mrf.mxu1  ;;  %v4797_v62 = vpop.f32.mrf.mxu0  ;;  %v8452_v34 = vld [vmem:[%s10552_s9 + $0x5a8] sm:$0xff]   ;;  %v8454_v39 = vld [vmem:[%s10552_s9 + $0x5e0] sm:$0xff]  }
0x1e52   :  { %v4755_v47 = vadd.f32 %v4754_v60, %v4478_v28  ;;  %v4798_v48 = vadd.f32 %v4797_v62, %v4486_v29  ;;  %v5074_v49 = vmax.f32 %v4753_v40, 0.0  ;;  %v5076_v52 = vmax.f32 %v4796_v44, 0.0  ;;  %v8455_v40 = vld [vmem:[%s10552_s9 + $0x520] sm:$0xff]   ;;  %v8458_v60 = vld [vmem:[%s10552_s9 + $0x5d8] sm:$0xff]  }
0x1e53   :  { %v10101_v53 = vpop.f32.mrf.mxu1  ;;  %v10103_v57 = vpop.f32.mrf.mxu0 }
0x1e54   :  { %v5075_v10 = vmax.f32 %v4755_v47, 0.0  ;;  %v5077_v19 = vmax.f32 %v4798_v48, 0.0  ;;  %v5090_v22 = vpack.c.bf16 %v5074_v49, %v5058_v1  ;;  %v5092_v23 = vpack.c.bf16 %v5076_v52, %v5060_v6  ;;  %v8459_v47 = vld [vmem:[%s10552_s9 + $0x518] sm:$0xff]   ;;  %v8461_v52 = vld [vmem:[%s10552_s9 + $0x550] sm:$0xff]   ;;  %v8466_v1 = vld [vmem:[%s10552_s9 + $0x5c8] sm:$0xff]  }
0x1e55   :  { %v4836_v16 = vpop.f32.mrf.mxu1  ;;  %v4879_v13 = vpop.f32.mrf.mxu0  ;;  %v8460_v49 = vld [vmem:[%s10552_s9 + $0x598] sm:$0xff]   ;;  %v4490_v6 = vrot.slane %v10091_v50, %v9351_v54 }
0x1e56   :  { %v5091_v12 = vpack.c.bf16 %v5075_v10, %v5059_v26  ;;  %v5093_v20 = vpack.c.bf16 %v5077_v19, %v5061_v61  ;;  %v4837_v0 = vadd.f32 %v4836_v16, %v4494_v3  ;;  %v4880_v46 = vadd.f32 %v4879_v13, %v4502_v59  ;;  %v8463_v26 = vld [vmem:[%s10552_s9 + $0x510] sm:$0xff]   ;;  %v8465_v19 = vld [vmem:[%s10552_s9 + $0x548] sm:$0xff]   ;;  %v10200_v13 = vld [vmem:[%s10551_s8 + $0x18] sm:$0xff] }
0x1e57   :  { %v10115_v24 = vpop.f32.mrf.mxu1  ;;  %v10117_v11 = vpop.f32.mrf.mxu0  ;;  %v8464_v10 = vld [vmem:[%s10552_s9 + $0x590] sm:$0xff]   ;;  %v4498_v16 = vrot.slane %v10091_v50, %v9354_v55  ;;  %v8468_v50 = vld [vmem:[%s10552_s9 + $0x588] sm:$0xff]  }
0x1e58   :  { %6171 = vmatprep.mubr.bf16.mxu1 %v5091_v12  ;;  %6212 = vmatprep.mubr.bf16.mxu0 %v5093_v20  ;;  %v5063_v2 = vmax.f32 %v4837_v0, 0.0  ;;  %v5065_v51 = vmax.f32 %v4880_v46, 0.0  ;;  %v8467_v20 = vld [vmem:[%s10552_s9 + $0x508] sm:$0xff]  }
0x1e59   :  { %v4840_v42 = vpop.f32.mrf.mxu1  ;;  %v4883_v41 = vpop.f32.mrf.mxu0  ;;  %6172 = vmatmul.mubr.bf16.vlgmr.msra.gmra.mxu1 %v5090_v22  ;;  %6213 = vmatmul.mubr.bf16.vlgmr.msra.gmra.mxu0 %v5092_v23  ;;  %v8469_v23 = vld [vmem:[%s10552_s9 + $0x540] sm:$0xff]   ;;  %v4878_v46 = vadd.f32 %v10103_v57, %v4498_v16 }
0x1e5a   :  { %v4841_v5 = vadd.f32 %v4840_v42, %v4494_v3  ;;  %v4884_v9 = vadd.f32 %v4883_v41, %v4502_v59  ;;  %7805 = vmatpush3.bf16.msra.mxu1 %v8443_v17  ;;  %7827 = vmatpush3.bf16.msra.mxu0 %v8444_v18  ;;  %v8462_v3 = vld [vmem:[%s10552_s9 + $0x5d0] sm:$0xff]   ;;  %v4839_v17 = vadd.f32 %v10115_v24, %v4490_v6  ;;  %v8471_v41 = vld [vmem:[%s10552_s9 + $0x500] sm:$0xff]  }
0x1e5b   :  { %7806 = vmatprep.subr.bf16.mxu1 %v8445_v25  ;;  %7828 = vmatprep.subr.bf16.mxu0 %v8446_v8  ;;  %v10149_v31 = vpop.f32.mrf.mxu1  ;;  %v10154_v44 = vpop.f32.mrf.mxu0  ;;  %v4510_v18 = vrot.slane %v10200_v13, %v9244_v27  ;;  %v4882_v25 = vadd.f32 %v10117_v11, %v4498_v16  ;;  %v4518_v8 = vrot.slane %v10200_v13, %v9247_v21  ;;  %v8470_v27 = vld [vmem:[%s10552_s9 + $0x5c0] sm:$0xff]  }
0x1e5c   :  { %v5079_v28 = vmax.f32 %v4841_v5, 0.0  ;;  %v5081_v29 = vmax.f32 %v4884_v9, 0.0  ;;  %v4835_v24 = vadd.f32 %v10101_v53, %v4490_v6  ;;  %v5078_v11 = vmax.f32 %v4839_v17, 0.0  ;;  %v8472_v21 = vld [vmem:[%s10552_s9 + $0x580] sm:$0xff]   ;;  %v8473_v53 = vld [vmem:[%s10552_s9 + $0x678] sm:$0xff]  }
0x1e5d   :  { %v4922_v62 = vpop.f32.mrf.mxu1  ;;  %v4965_v48 = vpop.f32.mrf.mxu0  ;;  %v5080_v9 = vmax.f32 %v4882_v25, 0.0  ;;  %v8490_v6 = vld [vmem:[%s10552_s9 + $0x6d8] sm:$0xff]  }
0x1e5e   :  { %v5095_v32 = vpack.c.bf16 %v5079_v28, %v5063_v2  ;;  %v5097_v33 = vpack.c.bf16 %v5081_v29, %v5065_v51  ;;  %7807 = vmatpush3.bf16.msra.mxu1 %v8447_v36  ;;  %7829 = vmatpush3.bf16.msra.mxu0 %v8448_v58  ;;  %v4923_v5 = vadd.f32 %v4922_v62, %v4510_v18  ;;  %v8474_v36 = vld [vmem:[%s10552_s9 + $0x6f8] sm:$0xff]   ;;  %v5062_v58 = vmax.f32 %v4835_v24, 0.0  ;;  %v8482_v62 = vld [vmem:[%s10552_s9 + $0x6e8] sm:$0xff]  }
0x1e5f   :  { %7808 = vmatprep.subr.bf16.mxu1 %v8449_v43  ;;  %7830 = vmatprep.subr.bf16.mxu0 %v8450_v30  ;;  %v10177_v59 = vpop.f32.mrf.mxu1  ;;  %v10182_v61 = vpop.f32.mrf.mxu0  ;;  %v4966_v57 = vadd.f32 %v4965_v48, %v4518_v8  ;;  %v5064_v2 = vmax.f32 %v4878_v46, 0.0  ;;  %v8475_v28 = vld [vmem:[%s10552_s9 + $0x638] sm:$0xff]   ;;  %v8484_v48 = vld [vmem:[%s10552_s9 + $0x6a8] sm:$0xff]   ;;  %v4514_v46 = vrot.slane %v10200_v13, %v9253_v4  ;;  %v8501_v4 = vld [vmem:[%s10552_s9 + $0x640] sm:$0xff]  }
0x1e60   :  { %6253 = vmatprep.mubr.bf16.mxu1 %v5095_v32  ;;  %6294 = vmatprep.mubr.bf16.mxu0 %v5097_v33  ;;  %v5094_v29 = vpack.c.bf16 %v5078_v11, %v5062_v58  ;;  %v5067_v30 = vmax.f32 %v4923_v5, 0.0  ;;  %v8476_v32 = vld [vmem:[%s10552_s9 + $0x6b8] sm:$0xff]   ;;  %v8498_v24 = vld [vmem:[%s10552_s9 + $0x6c8] sm:$0xff]   ;;  %v4526_v5 = vrot.slane %v10200_v13, %v9269_v37  ;;  %v8502_v37 = vld [vmem:[%s10552_s9 + $0x6c0] sm:$0xff]  }
0x1e61   :  { %v4926_v12 = vpop.f32.mrf.mxu1  ;;  %v4969_v22 = vpop.f32.mrf.mxu0  ;;  %v5096_v33 = vpack.c.bf16 %v5080_v9, %v5064_v2  ;;  %v8492_v17 = vld [vmem:[%s10552_s9 + $0x698] sm:$0xff]   ;;  %v4534_v9 = vrot.slane %v10200_v13, %v9272_v38  ;;  %v8504_v38 = vld [vmem:[%s10552_s9 + $0x680] sm:$0xff]  }
0x1e62   :  { %7809 = vmatpush3.bf16.msra.mxu1 %v8451_v56  ;;  %7831 = vmatpush3.bf16.msra.mxu0 %v8452_v34  ;;  %v4927_v0 = vadd.f32 %v4926_v12, %v4510_v18  ;;  %v4970_v42 = vadd.f32 %v4969_v22, %v4518_v8  ;;  %v5069_v56 = vmax.f32 %v4966_v57, 0.0  ;;  %v8477_v34 = vld [vmem:[%s10552_s9 + $0x670] sm:$0xff]   ;;  %v8491_v12 = vld [vmem:[%s10552_s9 + $0x618] sm:$0xff]  }
0x1e63   :  { %7810 = vmatprep.subr.bf16.mxu1 %v8453_v35  ;;  %7832 = vmatprep.subr.bf16.mxu0 %v8454_v39  ;;  %v8478_v39 = vld [vmem:[%s10552_s9 + $0x6f0] sm:$0xff]  }
0x1e64   :  { %v5083_v43 = vmax.f32 %v4927_v0, 0.0  ;;  %v5085_v51 = vmax.f32 %v4970_v42, 0.0  ;;  %v8493_v18 = vld [vmem:[%s10552_s9 + $0x650] sm:$0xff]   ;;  %v4506_v0 = vrot.slane %v10200_v13, %v9250_v63  ;;  %v8500_v63 = vld [vmem:[%s10552_s9 + $0x688] sm:$0xff]  }
0x1e65   :  { %v8494_v22 = vld [vmem:[%s10552_s9 + $0x6d0] sm:$0xff]  }
0x1e66   :  { %7811 = vmatpush3.bf16.msra.mxu1 %v8455_v40  ;;  %7833 = vmatpush3.bf16.msra.mxu0 %v8456_v7  ;;  %v5099_v35 = vpack.c.bf16 %v5083_v43, %v5067_v30  ;;  %v5101_v40 = vpack.c.bf16 %v5085_v51, %v5069_v56  ;;  %v8479_v7 = vld [vmem:[%s10552_s9 + $0x630] sm:$0xff]   ;;  %v4925_v11 = vadd.f32 %v10177_v59, %v4506_v0  ;;  %v8503_v43 = vld [vmem:[%s10552_s9 + $0x600] sm:$0xff]   ;;  %v8507_v56 = vld [vmem:[%s10552_s9 + $0x738] sm:$0xff]  }
0x1e67   :  { %7812 = vmatprep.subr.bf16.mxu1 %v8457_v45  ;;  %7834 = vmatprep.subr.bf16.mxu0 %v8458_v60  ;;  %v8480_v45 = vld [vmem:[%s10552_s9 + $0x6b0] sm:$0xff]   ;;  %v8481_v60 = vld [vmem:[%s10552_s9 + $0x668] sm:$0xff]   ;;  %v4921_v59 = vadd.f32 %v10149_v31, %v4506_v0  ;;  %v8505_v31 = vld [vmem:[%s10552_s9 + $0x778] sm:$0xff]  }
0x1e68   :  { %v8496_v8 = vld [vmem:[%s10552_s9 + $0x690] sm:$0xff]  }
0x1e69   :  { %v8528_v0 = vld [vmem:[%s10552_s9 + $0x790] sm:$0xff]  }
0x1e6a   :  { %7813 = vmatpush3.bf16.msra.mxu1 %v8459_v47  ;;  %7835 = vmatpush3.bf16.msra.mxu0 %v8460_v49  ;;  %v8483_v47 = vld [vmem:[%s10552_s9 + $0x628] sm:$0xff]   ;;  %v8485_v49 = vld [vmem:[%s10552_s9 + $0x660] sm:$0xff]  }
0x1e6b   :  { %7814 = vmatprep.subr.bf16.mxu1 %v8461_v52  ;;  %7836 = vmatprep.subr.bf16.mxu0 %v8462_v3  ;;  %v8486_v52 = vld [vmem:[%s10552_s9 + $0x6e0] sm:$0xff]   ;;  %v10270_v3 = vpop.f32.mrf.mxu1 }
0x1e6d   :  { %v5008_v16 = vpop.f32.mrf.mxu1 }
0x1e6e   :  { %7815 = vmatpush3.bf16.msra.mxu1 %v8463_v26  ;;  %7837 = vmatpush3.bf16.msra.mxu0 %v8464_v10  ;;  %v8487_v26 = vld [vmem:[%s10552_s9 + $0x620] sm:$0xff]   ;;  %v10275_v10 = vpop.f32.mrf.mxu0  ;;  %v5009_v2 = vadd.f32 %v5008_v16, %v4526_v5 }
0x1e6f   :  { %7816 = vmatprep.subr.bf16.mxu1 %v8465_v19  ;;  %7838 = vmatprep.subr.bf16.mxu0 %v8466_v1  ;;  %v8488_v19 = vld [vmem:[%s10552_s9 + $0x6a0] sm:$0xff]   ;;  %v8489_v1 = vld [vmem:[%s10552_s9 + $0x658] sm:$0xff]  }
0x1e70   :  { %v8518_v16 = vld [vmem:[%s10552_s9 + $0x7e0] sm:$0xff]  }
0x1e72   :  { %7817 = vmatpush3.bf16.msra.mxu1 %v8467_v20  ;;  %7839 = vmatpush3.bf16.msra.mxu0 %v8468_v50  ;;  %v5051_v20 = vpop.f32.mrf.mxu0  ;;  %v10298_v50 = vpop.f32.mrf.mxu1 }
0x1e73   :  { %7818 = vmatprep.subr.bf16.mxu1 %v8469_v23  ;;  %7840 = vmatprep.subr.bf16.mxu0 %v8470_v27  ;;  %v8495_v23 = vld [vmem:[%s10552_s9 + $0x610] sm:$0xff]   ;;  %v8497_v27 = vld [vmem:[%s10552_s9 + $0x648] sm:$0xff]  }
0x1e74   :  { %v10303_v25 = vpop.f32.mrf.mxu0  ;;  %v5012_v42 = vpop.f32.mrf.mxu1 }
0x1e75   :  { %v5013_v57 = vadd.f32 %v5012_v42, %v4526_v5  ;;  %v8530_v42 = vld [vmem:[%s10552_s9 + $0x7c8] sm:$0xff]  }
0x1e76   :  { %7819 = vmatpush3.bf16.msra.mxu1 %v8471_v41  ;;  %7841 = vmatpush3.bf16.msra.mxu0 %v8472_v21  ;;  %v8499_v41 = vld [vmem:[%s10552_s9 + $0x608] sm:$0xff]   ;;  %v5055_v21 = vpop.f32.mrf.mxu0 }
0x1e77   :  { %7848 = vmatprep.subr.bf16.mxu1 %v8473_v53  ;;  %7870 = vmatprep.subr.bf16.mxu0 %v8474_v36  ;;  %v4968_v53 = vadd.f32 %v10182_v61, %v4514_v46  ;;  %v4964_v36 = vadd.f32 %v10154_v44, %v4514_v46  ;;  %v5056_v58 = vadd.f32 %v5055_v21, %v4534_v9  ;;  %v5082_v61 = vmax.f32 %v4925_v11, 0.0  ;;  %v8529_v46 = vld [vmem:[%s10552_s9 + $0x748] sm:$0xff]  }
0x1e78   :  { %v5052_v44 = vadd.f32 %v5051_v20, %v4534_v9  ;;  %v5087_v30 = vmax.f32 %v5013_v57, 0.0  ;;  %v8520_v20 = vld [vmem:[%s10552_s9 + $0x7a0] sm:$0xff]   ;;  %v4530_v11 = vrot.slane %v10200_v13, %v9354_v55  ;;  %v8531_v5 = vld [vmem:[%s10552_s9 + $0x708] sm:$0xff]  }
0x1e79   :  { %6254 = vmatmul.mubr.bf16.vlgmr.msra.gmra.mxu1 %v5094_v29  ;;  %6295 = vmatmul.mubr.bf16.vlgmr.msra.gmra.mxu0 %v5096_v33  ;;  %v5084_v51 = vmax.f32 %v4968_v53, 0.0  ;;  %v5066_v29 = vmax.f32 %v4921_v59, 0.0  ;;  %v5089_v33 = vmax.f32 %v5056_v58, 0.0  ;;  %v8534_v55 = vld [vmem:[%s10552_s9 + $0x7c0] sm:$0xff]  }
0x1e7a   :  { %7849 = vmatpush3.bf16.msra.mxu1 %v8475_v28  ;;  %6335 = vmatprep.mubr.bf16.mxu1 %v5099_v35  ;;  %v8506_v28 = vld [vmem:[%s10552_s9 + $0x7f8] sm:$0xff]   ;;  %v5071_v35 = vmax.f32 %v5009_v2, 0.0  ;;  %v8535_v53 = vld [vmem:[%s10552_s9 + $0x700] sm:$0xff]  }
0x1e7b   :  { %7871 = vmatpush3.bf16.msra.mxu0 %v8476_v32  ;;  %6376 = vmatprep.mubr.bf16.mxu0 %v5101_v40  ;;  %v5068_v32 = vmax.f32 %v4964_v36, 0.0 }
0x1e7c   :  { %7850 = vmatprep.subr.bf16.mxu1 %v8477_v34  ;;  %7872 = vmatprep.subr.bf16.mxu0 %v8478_v39  ;;  %v5098_v34 = vpack.c.bf16 %v5082_v61, %v5066_v29  ;;  %v8508_v39 = vld [vmem:[%s10552_s9 + $0x7b8] sm:$0xff]  }
0x1e7d   :  { %v5100_v40 = vpack.c.bf16 %v5084_v51, %v5068_v32 }
0x1e7e   :  { %7851 = vmatpush3.bf16.msra.mxu1 %v8479_v7  ;;  %v5073_v7 = vmax.f32 %v5052_v44, 0.0 }
0x1e7f   :  { %7873 = vmatpush3.bf16.msra.mxu0 %v8480_v45  ;;  %7852 = vmatprep.subr.bf16.mxu1 %v8481_v60  ;;  %v8509_v45 = vld [vmem:[%s10552_s9 + $0x770] sm:$0xff]   ;;  %v5103_v60 = vpack.c.bf16 %v5087_v30, %v5071_v35  ;;  %v7352_v35 = vld [vmem:[%s10580_s25 + $0x1] ss:$0 sm:$0xff] }
0x1e80   :  { %7874 = vmatprep.subr.bf16.mxu0 %v8482_v62  ;;  %v8510_v62 = vld [vmem:[%s10552_s9 + $0x7f0] sm:$0xff]  }
0x1e82   :  { %7853 = vmatpush3.bf16.msra.mxu1 %v8483_v47  ;;  %v5105_v47 = vpack.c.bf16 %v5089_v33, %v5073_v7 }
0x1e83   :  { %7875 = vmatpush3.bf16.msra.mxu0 %v8484_v48  ;;  %7854 = vmatprep.subr.bf16.mxu1 %v8485_v49  ;;  %v8511_v48 = vld [vmem:[%s10552_s9 + $0x730] sm:$0xff]  }
0x1e84   :  { %7876 = vmatprep.subr.bf16.mxu0 %v8486_v52  ;;  %v8512_v49 = vld [vmem:[%s10552_s9 + $0x7b0] sm:$0xff]   ;;  %v8513_v52 = vld [vmem:[%s10552_s9 + $0x768] sm:$0xff]  }
0x1e86   :  { %7855 = vmatpush3.bf16.msra.mxu1 %v8487_v26  ;;  %v8514_v26 = vld [vmem:[%s10552_s9 + $0x7e8] sm:$0xff]  }
0x1e87   :  { %7877 = vmatpush3.bf16.msra.mxu0 %v8488_v19  ;;  %7856 = vmatprep.subr.bf16.mxu1 %v8489_v1  ;;  %v8515_v19 = vld [vmem:[%s10552_s9 + $0x728] sm:$0xff]  }
0x1e88   :  { %7878 = vmatprep.subr.bf16.mxu0 %v8490_v6  ;;  %v8516_v1 = vld [vmem:[%s10552_s9 + $0x7a8] sm:$0xff]   ;;  %v8517_v6 = vld [vmem:[%s10552_s9 + $0x760] sm:$0xff]  }
0x1e8a   :  { %7857 = vmatpush3.bf16.msra.mxu1 %v8491_v12  ;;  %v8519_v12 = vld [vmem:[%s10552_s9 + $0x720] sm:$0xff]  }
0x1e8b   :  { %7879 = vmatpush3.bf16.msra.mxu0 %v8492_v17  ;;  %7858 = vmatprep.subr.bf16.mxu1 %v8493_v18  ;;  %v8521_v17 = vld [vmem:[%s10552_s9 + $0x758] sm:$0xff]  }
0x1e8c   :  { %7880 = vmatprep.subr.bf16.mxu0 %v8494_v22  ;;  %v8522_v18 = vld [vmem:[%s10552_s9 + $0x7d8] sm:$0xff]  }
0x1e8d   :  { %v8523_v22 = vld [vmem:[%s10552_s9 + $0x718] sm:$0xff]  }
0x1e8e   :  { %7859 = vmatpush3.bf16.msra.mxu1 %v8495_v23  ;;  %v8524_v23 = vld [vmem:[%s10552_s9 + $0x798] sm:$0xff]  }
0x1e8f   :  { %7881 = vmatpush3.bf16.msra.mxu0 %v8496_v8  ;;  %7860 = vmatprep.subr.bf16.mxu1 %v8497_v27  ;;  %v8525_v8 = vld [vmem:[%s10552_s9 + $0x750] sm:$0xff]  }
0x1e90   :  { %7882 = vmatprep.subr.bf16.mxu0 %v8498_v24  ;;  %v8526_v27 = vld [vmem:[%s10552_s9 + $0x7d0] sm:$0xff]  }
0x1e91   :  { %v8527_v24 = vld [vmem:[%s10552_s9 + $0x710] sm:$0xff]  }
0x1e92   :  { %7861 = vmatpush3.bf16.msra.mxu1 %v8499_v41  ;;  %v4522_v41 = vrot.slane %v10200_v13, %v9351_v54  ;;  %v8533_v54 = vld [vmem:[%s10552_s9 + $0x740] sm:$0xff]  }
0x1e93   :  { %7883 = vmatpush3.bf16.msra.mxu0 %v8500_v63  ;;  %7862 = vmatprep.subr.bf16.mxu1 %v8501_v4  ;;  %v8532_v63 = vld [vmem:[%s10552_s9 + $0x788] sm:$0xff]   ;;  %v5054_v4 = vadd.f32 %v10303_v25, %v4530_v11  ;;  %v8536_v25 = vld [vmem:[%s10552_s9 + $0x780] sm:$0xff]  }
0x1e94   :  { %7884 = vmatprep.subr.bf16.mxu0 %v8502_v37  ;;  %v5011_v21 = vadd.f32 %v10298_v50, %v4522_v41  ;;  %v5007_v13 = vadd.f32 %v10270_v3, %v4522_v41  ;;  %v5050_v50 = vadd.f32 %v10275_v10, %v4530_v11 }
0x1e95   :  { %v5088_v37 = vmax.f32 %v5054_v4, 0.0 }
0x1e96   :  { %7863 = vmatpush3.bf16.msra.mxu1 %v8503_v43  ;;  %v5086_v9 = vmax.f32 %v5011_v21, 0.0  ;;  %v5070_v59 = vmax.f32 %v5007_v13, 0.0  ;;  %v5072_v57 = vmax.f32 %v5050_v50, 0.0 }
0x1e97   :  { %7885 = vmatpush3.bf16.msra.mxu0 %v8504_v38  ;;  %7892 = vmatprep.subr.bf16.mxu1 %v8505_v31 }
0x1e98   :  { %7914 = vmatprep.subr.bf16.mxu0 %v8506_v28  ;;  %v5102_v3 = vpack.c.bf16 %v5086_v9, %v5070_v59  ;;  %v5104_v10 = vpack.c.bf16 %v5088_v37, %v5072_v57 }
0x1e99   :  { %6336 = vmatmul.mubr.bf16.vlgmr.msra.gmra.mxu1 %v5098_v34 }
0x1e9a   :  { %6377 = vmatmul.mubr.bf16.vlgmr.msra.gmra.mxu0 %v5100_v40  ;;  %7893 = vmatpush3.bf16.msra.mxu1 %v8507_v56 }
0x1e9b   :  { %6417 = vmatprep.mubr.bf16.mxu1 %v5103_v60  ;;  %7915 = vmatpush3.bf16.msra.mxu0 %v8508_v39 }
0x1e9c   :  { %6458 = vmatprep.mubr.bf16.mxu0 %v5105_v47  ;;  %7894 = vmatprep.subr.bf16.mxu1 %v8509_v45 }
0x1e9d   :  { %7916 = vmatprep.subr.bf16.mxu0 %v8510_v62 }
0x1e9e   :  { %7895 = vmatpush3.bf16.msra.mxu1 %v8511_v48 }
0x1e9f   :  { %7917 = vmatpush3.bf16.msra.mxu0 %v8512_v49  ;;  %7896 = vmatprep.subr.bf16.mxu1 %v8513_v52 }
0x1ea0   :  { %7918 = vmatprep.subr.bf16.mxu0 %v8514_v26 }
0x1ea2   :  { %7897 = vmatpush3.bf16.msra.mxu1 %v8515_v19 }
0x1ea3   :  { %7919 = vmatpush3.bf16.msra.mxu0 %v8516_v1  ;;  %7898 = vmatprep.subr.bf16.mxu1 %v8517_v6 }
0x1ea4   :  { %7920 = vmatprep.subr.bf16.mxu0 %v8518_v16 }
0x1ea6   :  { %7899 = vmatpush3.bf16.msra.mxu1 %v8519_v12 }
0x1ea7   :  { %7921 = vmatpush3.bf16.msra.mxu0 %v8520_v20  ;;  %7900 = vmatprep.subr.bf16.mxu1 %v8521_v17 }
0x1ea8   :  { %7922 = vmatprep.subr.bf16.mxu0 %v8522_v18 }
0x1eaa   :  { %7901 = vmatpush3.bf16.msra.mxu1 %v8523_v22 }
0x1eab   :  { %7923 = vmatpush3.bf16.msra.mxu0 %v8524_v23  ;;  %7902 = vmatprep.subr.bf16.mxu1 %v8525_v8 }
0x1eac   :  { %7924 = vmatprep.subr.bf16.mxu0 %v8526_v27 }
0x1eae   :  { %7903 = vmatpush3.bf16.msra.mxu1 %v8527_v24 }
0x1eaf   :  { %7925 = vmatpush3.bf16.msra.mxu0 %v8528_v0  ;;  %7904 = vmatprep.subr.bf16.mxu1 %v8529_v46 }
0x1eb0   :  { %7926 = vmatprep.subr.bf16.mxu0 %v8530_v42 }
0x1eb2   :  { %7905 = vmatpush3.bf16.msra.mxu1 %v8531_v5 }
0x1eb3   :  { %7927 = vmatpush3.bf16.msra.mxu0 %v8532_v63  ;;  %7906 = vmatprep.subr.bf16.mxu1 %v8533_v54 }
0x1eb4   :  { %7928 = vmatprep.subr.bf16.mxu0 %v8534_v55 }
0x1eb6   :  { %7907 = vmatpush3.bf16.msra.mxu1 %v8535_v53 }
0x1eb7   :  { %7929 = vmatpush3.bf16.msra.mxu0 %v8536_v25 }
0x1eb9   :  { %6418 = vmatmul.mubr.bf16.vlgmr.msra.gmra.mxu1 %v5102_v3 }
0x1eba   :  { %6459 = vmatmul.mubr.bf16.vlgmr.msra.gmra.mxu0 %v5104_v10 }
0x1f19   :  { %v7776_v36 = vpop.f32.mrf.mxu1  ;;  %v7798_v58 = vpop.f32.mrf.mxu0 }
0x1f1b   :  { %v7777_v43 = vpop.f32.mrf.mxu1  ;;  %v7799_v61 = vpop.f32.mrf.mxu0 }
0x1f1c   :  { %v7778_v34 = vadd.f32 %v7777_v43, %v7776_v36  ;;  %v7800_v47 = vadd.f32 %v7799_v61, %v7798_v58 }
0x1f1d   :  { %v7779_v2 = vpop.f32.mrf.mxu1  ;;  %v7801_v38 = vpop.f32.mrf.mxu0 }
0x1f1e   :  { %v6174_v7 = vadd.f32 %v7778_v34, %v7352_v35 }
0x1f1f   :  { %v7780_v31 = vpop.f32.mrf.mxu1  ;;  %v7802_v44 = vpop.f32.mrf.mxu0 }
0x1f20   :  { %v7781_v45 = vadd.f32 %v7780_v31, %v7779_v2  ;;  %v6215_v49 = vadd.f32 %v7800_v47, %v6174_v7  ;;  %v7803_v1 = vadd.f32 %v7802_v44, %v7801_v38  ;;  %v8541_v7 = vld [vmem:[%s10558_s15 + $0x68] sm:$0xff]  }
0x1f22   :  { %v6177_v52 = vadd.f32 %v7781_v45, %v7352_v35  ;;  %v8538_v35 = vld [vmem:[%s10558_s15 + $0x38] sm:$0xff]   ;;  %v8542_v45 = vld [vmem:[%s10558_s15 + $0x28] sm:$0xff]  }
0x1f24   :  { %v6218_v12 = vadd.f32 %v7803_v1, %v6177_v52 }
0x1f39   :  { %v7820_v51 = vpop.f32.mrf.mxu1  ;;  %v7842_v28 = vpop.f32.mrf.mxu0 }
0x1f3b   :  { %v7821_v29 = vpop.f32.mrf.mxu1  ;;  %v7843_v30 = vpop.f32.mrf.mxu0 }
0x1f3c   :  { %v7822_v48 = vadd.f32 %v7821_v29, %v7820_v51  ;;  %v7844_v20 = vadd.f32 %v7843_v30, %v7842_v28 }
0x1f3d   :  { %v7823_v32 = vpop.f32.mrf.mxu1  ;;  %v7845_v33 = vpop.f32.mrf.mxu0 }
0x1f3e   :  { %v6256_v6 = vadd.f32 %v7822_v48, %v6215_v49 }
0x1f3f   :  { %v7824_v56 = vpop.f32.mrf.mxu1  ;;  %v7846_v40 = vpop.f32.mrf.mxu0 }
0x1f40   :  { %v7825_v16 = vadd.f32 %v7824_v56, %v7823_v32  ;;  %v6297_v23 = vadd.f32 %v7844_v20, %v6256_v6  ;;  %v7847_v27 = vadd.f32 %v7846_v40, %v7845_v33  ;;  %v8540_v40 = vld [vmem:[%s10558_s15 + $0x30] sm:$0xff]   ;;  %v7483_v6 = vld [vmem:[%s10556_s13 + $0x1] ss:$0 sm:$0xff] }
0x1f41   :  { %v7484_v20 = vld [vmem:[%s10557_s14 + $0x1] ss:$0 sm:$0xff] }
0x1f42   :  { %v6259_v8 = vadd.f32 %v7825_v16, %v6218_v12  ;;  %v8545_v16 = vld [vmem:[%s10558_s15 + $0x58] sm:$0xff]  }
0x1f44   :  { %v6300_v41 = vadd.f32 %v7847_v27, %v6259_v8  ;;  %v8547_v27 = vld [vmem:[%s10558_s15 + $0x50] sm:$0xff]  }
0x1f59   :  { %v7864_v39 = vpop.f32.mrf.mxu1 }
0x1f5a   :  { %v7886_v60 = vpop.f32.mrf.mxu0 }
0x1f5b   :  { %v7865_v62 = vpop.f32.mrf.mxu1 }
0x1f5c   :  { %v7887_v26 = vpop.f32.mrf.mxu0  ;;  %v7866_v17 = vadd.f32 %v7865_v62, %v7864_v39  ;;  %v8539_v39 = vld [vmem:[%s10558_s15 + $0x70] sm:$0xff]  }
0x1f5d   :  { %v7867_v19 = vpop.f32.mrf.mxu1  ;;  %v7888_v11 = vadd.f32 %v7887_v26, %v7886_v60  ;;  %v8543_v60 = vld [vmem:[%s10558_s15 + $0x60] sm:$0xff]  }
0x1f5e   :  { %v7889_v18 = vpop.f32.mrf.mxu0  ;;  %v6338_v24 = vadd.f32 %v7866_v17, %v6297_v23  ;;  %v8546_v17 = vld [vmem:[%s10558_s15 + $0x18] sm:$0xff]  }
0x1f5f   :  { %v7868_v22 = vpop.f32.mrf.mxu1 }
0x1f60   :  { %v7869_v0 = vadd.f32 %v7868_v22, %v7867_v19  ;;  %v7890_v46 = vpop.f32.mrf.mxu0  ;;  %v6379_v63 = vadd.f32 %v7888_v11, %v6338_v24  ;;  %v8544_v19 = vld [vmem:[%s10558_s15 + $0x20] sm:$0xff]   ;;  %v8548_v24 = vld [vmem:[%s10558_s15 + $0x10] sm:$0xff]  }
0x1f61   :  { %v7891_v50 = vadd.f32 %v7890_v46, %v7889_v18 }
0x1f62   :  { %v6341_v54 = vadd.f32 %v7869_v0, %v6300_v41 }
0x1f64   :  { %v6382_v59 = vadd.f32 %v7891_v50, %v6341_v54 }
0x1f79   :  { %v7908_v42 = vpop.f32.mrf.mxu1 }
0x1f7a   :  { %v7930_v5 = vpop.f32.mrf.mxu0 }
0x1f7b   :  { %v7909_v21 = vpop.f32.mrf.mxu1 }
0x1f7c   :  { %v7910_v4 = vadd.f32 %v7909_v21, %v7908_v42  ;;  %v7931_v55 = vpop.f32.mrf.mxu0  ;;  %v8550_v21 = vld [vmem:[%s10558_s15 + $0x8] sm:$0xff]  }
0x1f7d   :  { %v7911_v13 = vpop.f32.mrf.mxu1  ;;  %v7932_v9 = vadd.f32 %v7931_v55, %v7930_v5  ;;  %v8549_v5 = vld [vmem:[%s10558_s15 + $0x48] sm:$0xff]  }
0x1f7e   :  { %v6420_v53 = vadd.f32 %v7910_v4, %v6379_v63  ;;  %v7933_v25 = vpop.f32.mrf.mxu0 }
0x1f7f   :  { %v7912_v37 = vpop.f32.mrf.mxu1 }
0x1f80   :  { %v6461_v57 = vadd.f32 %v7932_v9, %v6420_v53  ;;  %v7913_v3 = vadd.f32 %v7912_v37, %v7911_v13  ;;  %v7934_v10 = vpop.f32.mrf.mxu0  ;;  %v8551_v53 = vld [vmem:[%s10558_s15 + $0x40] sm:$0xff]  }
0x1f81   :  { %v7935_v58 = vadd.f32 %v7934_v10, %v7933_v25  ;;  %v8552_v9 = vld [vmem:[%s10558_s15] sm:$0xff]  }
0x1f82   :  { %v6423_v36 = vadd.f32 %v7913_v3, %v6382_v59  ;;  %v6467_v43 = vadd.f32 %v6461_v57, %v9908_v14 }
0x1f84   :  { %v6464_v61 = vadd.f32 %v7935_v58, %v6423_v36  ;;  %v6473_v2 = vsel %vm78_vm0, %v6467_v43, 0.0 }
0x1f85   :  { %6474 = vadd.xlane.f32.xlu0 %v6473_v2 }
0x1f86   :  { %v6468_v38 = vadd.f32 %v6464_v61, %v9910_v15  ;;  %v8537_v15 = vld [vmem:[%s10558_s15 + $0x78] sm:$0xff]  }
0x1f87   :  { %7936 = vmatprep.subr.bf16.mxu1 %v8537_v15 }
0x1f88   :  { %v6476_v31 = vsel %vm78_vm0, %v6468_v38, 0.0  ;;  %7937 = vmatpush3.bf16.msra.mxu1 %v8538_v35 }
0x1f89   :  { %6477 = vadd.xlane.f32.xlu1 %v6476_v31  ;;  %7938 = vmatprep.subr.bf16.mxu1 %v8539_v39 }
0x1f8c   :  { %7939 = vmatpush3.bf16.msra.mxu1 %v8540_v40 }
0x1f8d   :  { %7940 = vmatprep.subr.bf16.mxu1 %v8541_v7 }
0x1f90   :  { %7941 = vmatpush3.bf16.msra.mxu1 %v8542_v45 }
0x1f91   :  { %7942 = vmatprep.subr.bf16.mxu1 %v8543_v60 }
0x1f94   :  { %7943 = vmatpush3.bf16.msra.mxu1 %v8544_v19 }
0x1f95   :  { %7944 = vmatprep.subr.bf16.mxu1 %v8545_v16 }
0x1f98   :  { %7945 = vmatpush3.bf16.msra.mxu1 %v8546_v17 }
0x1f99   :  { %7946 = vmatprep.subr.bf16.mxu1 %v8547_v27 }
0x1f9c   :  { %7947 = vmatpush3.bf16.msra.mxu1 %v8548_v24 }
0x1f9d   :  { %7948 = vmatprep.subr.bf16.mxu1 %v8549_v5 }
0x1fa0   :  { %7949 = vmatpush3.bf16.msra.mxu1 %v8550_v21 }
0x1fa1   :  { %7950 = vmatprep.subr.bf16.mxu1 %v8551_v53 }
0x1fa4   :  { %7951 = vmatpush3.bf16.msra.mxu1 %v8552_v9 }
0x200e   :  { %v6475_v51 = vpop.xlane.xlu0 %6474 }
0x200f   :  { %v6479_v44 = vmul.f32 0.03125, %v6475_v51 }
0x2011   :  { %v6481_v28 = vsub.f32 %v6467_v43, %v6479_v44 }
0x2012   :  { %v6478_v29 = vpop.xlane.xlu1 %6477 }
0x2013   :  { %v6480_v30 = vmul.f32 0.03125, %v6478_v29  ;;  %v6483_v32 = vmul.f32 %v6481_v28, %v6481_v28 }
0x2015   :  { %v6482_v33 = vsub.f32 %v6468_v38, %v6480_v30  ;;  %v6485_v56 = vsel %vm78_vm0, %v6483_v32, 0.0 }
0x2016   :  { %6486 = vadd.xlane.f32.xlu0 %v6485_v56 }
0x2017   :  { %v6484_v14 = vmul.f32 %v6482_v33, %v6482_v33 }
0x2019   :  { %v6488_v34 = vsel %vm78_vm0, %v6484_v14, 0.0 }
0x201a   :  { %6489 = vadd.xlane.f32.xlu1 %v6488_v34 }
0x209f   :  { %v6487_v62 = vpop.xlane.xlu0 %6486 }
0x20a0   :  { %v6491_v47 = vmul.f32 0.03125, %v6487_v62 }
0x20a2   :  { %v6493_v48 = vadd.f32 1e-05, %v6491_v47 }
0x20a3   :  { %v6490_v49 = vpop.xlane.xlu1 %6489 }
0x20a4   :  { %8629 = vrsqrt.f32 %v6493_v48  ;;  %v6492_v52 = vmul.f32 0.03125, %v6490_v49 }
0x20a6   :  { %v6494_v26 = vadd.f32 1e-05, %v6492_v52 }
0x20a8   :  { %8631 = vrsqrt.f32 %v6494_v26 }
0x20b1   :  { %v8630_v1 = vpop.eup %8629 }
0x20b2   :  { %v6497_v12 = vmul.f32 %v8630_v1, %v6481_v28 }
0x20b4   :  { %v6505_v18 = vmul.f32 %v7483_v6, %v6497_v12 }
0x20b5   :  { %v8632_v22 = vpop.eup %8631 }
0x20b6   :  { %v10493_v23 = vadd.f32 %v7484_v20, %v6505_v18  ;;  %v6498_v8 = vmul.f32 %v8632_v22, %v6482_v33 }
0x20b8   :  { %v6506_v0 = vmul.f32 %v7483_v6, %v6498_v8  ;;  %v6516_v46 = vrot.slane %v10493_v23, 1  ;;  %v6530_v42 = vrot.slane %v10493_v23, 5  ;;  %v6520_v13 = vrot.slane %v10493_v23, 2 }
0x20b9   :  { %v6534_v50 = vrot.slane %v10493_v23, 6  ;;  %v6524_v36 = vrot.slane %v10493_v23, 3  ;;  %v6538_v58 = vrot.slane %v10493_v23, 7  ;;  %v6528_v60 = vrot.slane %v10493_v23, 4 }
0x20ba   :  { %v6514_v41 = vadd.f32 %v7484_v20, %v6506_v0  ;;  %v8243_v11 = vpack.i.bf16 %v6516_v46, %v6530_v42  ;;  %v7485_v0 = vld [vmem:[%s10559_s16] ss:$0 sm:$0xff] }
0x20bb   :  { %v8263_v3 = vpack.i.bf16 %v6520_v13, %v6534_v50  ;;  %v8268_v43 = vpack.i.bf16 %v6524_v36, %v6538_v58 }
0x20bc   :  { %8244 = vrot.lane.b32.xlu1 %v8243_v11, %s8672_s11  ;;  %v6555_v63 = vrot.slane %v6514_v41, 2  ;;  %v6569_v54 = vrot.slane %v6514_v41, 6  ;;  %v6551_v4 = vrot.slane %v6514_v41, 1  ;;  %v6565_v55 = vrot.slane %v6514_v41, 5 }
0x20bd   :  { %v6559_v59 = vrot.slane %v6514_v41, 3  ;;  %v6573_v57 = vrot.slane %v6514_v41, 7  ;;  %v6563_v31 = vrot.slane %v6514_v41, 4 }
0x20be   :  { %v8253_v25 = vpack.i.bf16 %v6555_v63, %v6569_v54  ;;  %v8248_v37 = vpack.i.bf16 %v6551_v4, %v6565_v55 }
0x20bf   :  { %v8258_v10 = vpack.i.bf16 %v6559_v59, %v6573_v57 }
0x20c0   :  { %8254 = vrot.lane.b32.xlu0 %v8253_v25, %s8659_s30  ;;  %8249 = vrot.lane.b32.xlu1 %v8248_v37, %s8672_s11 }
0x20c4   :  { %8264 = vrot.lane.b32.xlu0 %v8263_v3, %s8659_s30  ;;  %8259 = vrot.lane.b32.xlu1 %v8258_v10, %s8658_s2  ;;  %s8673_s30 = smov [#allocation2]  }
0x20c5   :  { %s6776_s3 = sshll.u32 %s8673_s30, 4  ;;  %s6777_s3 = int_to_ptr.vmem [resolvable:$true] %s6776_s3 }
0x20c6   :  { %s8633_s28 = scalar_lea.vmem %s6777_s3, 32  ;;  %p8638_p1 = scmp.lt.s32.totalorder %s6777_s3, %s6777_s3 }
0x20c7   :  { %p8634_p0 = scmp.ne.s32.totalorder %s6777_s3, %s8633_s28  ;;  %p8639_p2 = scmp.lt.s32.totalorder %s8633_s28, %s8633_s28 }
0x20c8   :  { %8269 = vrot.lane.b32.xlu1 %v8268_v43, %s8658_s2 }
0x20c9   :  { %p8640_p3 = por %p8639_p2, %p8638_p1 }
0x20cb   :  { %p8641_p4 = pnand %p8640_p3, %p8634_p0 }
0x212e   :  { %v8245_v61 = vpop.permute.xlu1 %8244 }
0x212f   :  { %v8247_v14 = vunpack.i.h.bf16 %v8245_v61  ;;  %v8246_v34 = vunpack.i.l.bf16 %v8245_v61 }
0x2131   :  { %v6542_v49 = vsel %vm78_vm0, %v10493_v23, %v8247_v14  ;;  %v6547_v52 = vsel %vm78_vm0, %v6528_v60, %v8246_v34 }
0x2132   :  { %v8250_v2 = vpop.permute.xlu1 %8249  ;;  %v8255_v38 = vpop.permute.xlu0 %8254 }
0x2133   :  { %v8252_v51 = vunpack.i.h.bf16 %v8250_v2  ;;  %v8251_v44 = vunpack.i.l.bf16 %v8250_v2  ;;  %v8257_v28 = vunpack.i.h.bf16 %v8255_v38  ;;  %v8256_v29 = vunpack.i.l.bf16 %v8255_v38 }
0x2135   :  { %v6577_v30 = vsel %vm78_vm0, %v6514_v41, %v8252_v51  ;;  %v6580_v32 = vsel %vm78_vm0, %v6563_v31, %v8251_v44 }
0x2136   :  { %v8260_v33 = vpop.permute.xlu1 %8259  ;;  %v8265_v56 = vpop.permute.xlu0 %8264  ;;  %v6578_v39 = vsel %vm6543_vm8, %v6577_v30, %v8257_v28  ;;  %v6581_v40 = vsel %vm6543_vm8, %v6580_v32, %v8256_v29 }
0x2137   :  { %v8262_v15 = vunpack.i.h.bf16 %v8260_v33  ;;  %v8261_v35 = vunpack.i.l.bf16 %v8260_v33  ;;  %v8267_v7 = vunpack.i.h.bf16 %v8265_v56  ;;  %v8266_v45 = vunpack.i.l.bf16 %v8265_v56 }
0x2139   :  { %v6579_v62 = vsel %vm6545_vm9, %v6578_v39, %v8262_v15  ;;  %v6582_v47 = vsel %vm6545_vm9, %v6581_v40, %v8261_v35  ;;  %v6544_v16 = vsel %vm6543_vm8, %v6542_v49, %v8267_v7  ;;  %v6548_v12 = vsel %vm6543_vm8, %v6547_v52, %v8266_v45 }
0x213a   :  { %v8270_v48 = vpop.permute.xlu1 %8269  ;;  %v6585_v1 = vrot.slane %v6579_v62, 7  ;;  %v6586_v6 = vrot.slane %v6582_v47, 7 }
0x213b   :  { %v8272_v26 = vunpack.i.h.bf16 %v8270_v48  ;;  %v8271_v19 = vunpack.i.l.bf16 %v8270_v48 }
0x213d   :  { %v6546_v20 = vsel %vm6545_vm9, %v6544_v16, %v8272_v26  ;;  %v6549_v17 = vsel %vm6545_vm9, %v6548_v12, %v8271_v19 }
0x213e   :  { %v6590_v18 = vsel %vm6589_vm10, %v6546_v20, %v6585_v1  ;;  %v6591_v22 = vsel %vm6589_vm10, %v6549_v17, %v6586_v6 }
0x213f   :  { %v6592_v8 = vpack.c.bf16 %v6590_v18, %v6590_v18  ;;  %v6593_v27 = vpack.c.bf16 %v6591_v22, %v6591_v22 }
0x2141   :  { %6761 = vmatprep.mubr.bf16.mxu1 %v6593_v27 }
0x2142   :  { %6762 = vmatmul.mubr.bf16.vlgmr.msra.gmra.mxu1 %v6592_v8 }
0x2202   :  { %v7952_v23 = vpop.f32.mrf.mxu1 }
0x2204   :  { %v7953_v24 = vpop.f32.mrf.mxu1 }
0x2205   :  { %v7954_v46 = vadd.f32 %v7953_v24, %v7952_v23 }
0x2206   :  { %v7955_v42 = vpop.f32.mrf.mxu1 }
0x2207   :  { %v6764_v41 = vadd.f32 %v7954_v46, %v7485_v0 }
0x2208   :  { %v7956_v11 = vpop.f32.mrf.mxu1 }
0x2209   :  { %6769 = vst [vmem:[#allocation2] sm:$0x3] %v6764_v41 }
0x220a   :  { %8644 = shalt.err (!%p8641_p4)
}
0x220b   :  { %6779 = dma.vmem_to_hbm [thread:$0]  %s6777_s3, 32, %s10560_s17, [#allocation3]  }
0x220c   :  { %8653 = dma.done.wait [#allocation3], 32  }
0x220d   :  { %8654 = vsyncadd [#allocation3], 4294967264 }
0x220e   :  { %6783 = vsyncpa [#allocation3], 1 }

</bundles_post_ra>
